<compile_context>
chip_gen: v6e
topology: v6e:2x2x1
jax: 0.10.0
libtpu: 0.0.40
codegen_flags: <defaults>
</compile_context>

<pallas_src>
import math

import jax
import jax.numpy as jnp
from jax.experimental import pallas as pl
from jax.experimental.pallas import tpu as pltpu


# ----------------------------------------------------------------------------
# Pallas kernel: full GOFAGNN stack, grid = (layers, edge tiles).
# ----------------------------------------------------------------------------
def gofa_gnn_kernel(
    # scalar prefetch (SMEM)
    src_ref,      # (E_pad,) int32 source node per edge (padded edges -> N)
    dst_ref,      # (E_pad,) int32 destination node per edge (padded edges -> N)
    # inputs (VMEM)
    x_ref,        # (N, L, D)   initial node tokens (read only at layer 0)
    xe_ref,       # (TE, L, D)  edge tokens of the current edge tile (pipelined)
    cos_ref,      # (TE*L, D)   rotary cos, pre-tiled over the edge tile
    sin_ref,      # (TE*L, D)   rotary sin
    rotp_ref,     # (D, D)      signed permutation == per-head rotate_half
    shead_ref,    # (D, H)      per-head sum matrix
    sheadT_ref,   # (H, D)      per-head broadcast matrix
    wxn_ref,      # (1, 1, D)   x_norm weight (current layer)
    wxen_ref,     # (1, 1, D)   xe_norm weight
    wpn_ref,      # (1, 1, D)   post_gnn_norm weight
    wqkv_ref,     # (1, D, 3D)  lin_qkv
    we_ref,       # (1, D, 2D)  e_proj
    wo_ref,       # (1, D, D)   o_proj
    wgu_ref,      # (1, D, 2I)  fused LlamaMLP gate_proj | up_proj
    wd_ref,       # (1, I, D)   LlamaMLP down_proj
    # output
    out_ref,      # (N, L, D)
    # scratch (VMEM, persistent across the whole grid)
    x_sc,         # (N, L, D)     node state carried across layers
    qkv_sc,       # (N+1, L, 3D)  q|k|v of every node (+ trash row N)
    m_sc,         # (N+1, L, H)   running per-destination segment max
    l_sc,         # (N+1, L, H)   running per-destination sum of exp
    acc_sc,       # (N+1, L, D)   running weighted-value accumulator
):
    N, L, D = x_ref.shape
    TE = xe_ref.shape[0]
    H = shead_ref.shape[1]
    Dh = D // H
    I2 = wgu_ref.shape[2]
    I = I2 // 2
    eps = 1e-6
    scale = 1.0 / math.sqrt(Dh)

    layer = pl.program_id(0)
    t = pl.program_id(1)
    n_tiles = pl.num_programs(1)

    def rmsnorm(v, w):
        var = jnp.mean(v * v, axis=-1, keepdims=True)
        return v * jax.lax.rsqrt(var + eps) * w

    # ---- very first grid step: bring the initial node state into the carried scratch.
    @pl.when(jnp.logical_and(layer == 0, t == 0))
    def _copy_in():
        x_sc[...] = x_ref[...]

    # ---- first tile of each layer: project ALL node tokens once; reset softmax state.
    @pl.when(t == 0)
    def _layer_init():
        x2 = x_sc[...].reshape(N * L, D)
        xn = rmsnorm(x2, wxn_ref[0])
        qkv = jnp.dot(xn, wqkv_ref[0], preferred_element_type=jnp.float32)
        qkv_sc[0:N] = qkv.reshape(N, L, 3 * D)
        qkv_sc[N] = jnp.zeros((L, 3 * D), jnp.float32)   # trash row for padded edges
        m_sc[...] = jnp.full(m_sc.shape, -1e30, dtype=jnp.float32)
        l_sc[...] = jnp.zeros_like(l_sc[...])
        acc_sc[...] = jnp.zeros_like(acc_sc[...])

    # ---- edge tile: batched xe_norm / e_proj / rotary / per-head scores.
    e0 = t * TE
    xe2 = xe_ref[...].reshape(TE * L, D)
    xen = rmsnorm(xe2, wxen_ref[0])
    ekv = jnp.dot(xen, we_ref[0], preferred_element_type=jnp.float32)   # (TE*L, 2D)

    # gather full q|k|v rows per edge (padded edges read the zeroed trash row N)
    rows_d = [qkv_sc[dst_ref[e0 + i]] for i in range(TE)]   # q_i source (dest node)
    rows_s = [qkv_sc[src_ref[e0 + i]] for i in range(TE)]   # k_j / v_j source
    g_d = jnp.concatenate(rows_d, axis=0)                   # (TE*L, 3D)
    g_s = jnp.concatenate(rows_s, axis=0)                   # (TE*L, 3D)
    q_i = g_d[:, :D]
    k_j = g_s[:, D:2 * D] + ekv[:, :D]
    v_j = g_s[:, 2 * D:] + ekv[:, D:]

    # rotary position embedding (rotate_half as a tiny signed-permutation matmul)
    cos = cos_ref[...]
    sin = sin_ref[...]
    rotp = rotp_ref[...]
    q_i = q_i * cos + jnp.dot(q_i, rotp, preferred_element_type=jnp.float32) * sin
    k_j = k_j * cos + jnp.dot(k_j, rotp, preferred_element_type=jnp.float32) * sin

    # per-head attention scores for the whole tile: (TE*L, H)
    s_all = jnp.dot(q_i * k_j, shead_ref[...],
                    preferred_element_type=jnp.float32) * scale

    # ---- per-edge online (flash-style) segment softmax scatter.
    sheadT = sheadT_ref[...]
    for i in range(TE):
        d_idx = dst_ref[e0 + i]
        s_e = s_all[i * L:(i + 1) * L, :]           # (L, H)
        v_e = v_j[i * L:(i + 1) * L, :]             # (L, D)
        m_old = m_sc[d_idx]                         # (L, H)
        m_new = jnp.maximum(m_old, s_e)
        corr = jnp.exp(m_old - m_new)
        p = jnp.exp(s_e - m_new)
        l_sc[d_idx] = l_sc[d_idx] * corr + p
        corr_f = jnp.dot(corr, sheadT, preferred_element_type=jnp.float32)   # (L, D)
        p_f = jnp.dot(p, sheadT, preferred_element_type=jnp.float32)         # (L, D)
        acc_sc[d_idx] = acc_sc[d_idx] * corr_f + p_f * v_e
        m_sc[d_idx] = m_new
    # TODO(synk): F.dropout on alpha skipped (dropout=0.0, inference mode).

    # ---- last tile of each layer: normalize, o_proj + residual, post-norm, LlamaMLP.
    @pl.when(t == n_tiles - 1)
    def _finalize():
        l_seg = l_sc[0:N].reshape(N * L, H)
        l_safe = jnp.where(l_seg > 0.0, l_seg, 1.0)       # empty segment -> agg = 0
        inv = pl.reciprocal(l_safe, approx=True)          # EUP, off the VPU crit path
        inv_full = jnp.dot(inv, sheadT, preferred_element_type=jnp.float32)
        agg = acc_sc[0:N].reshape(N * L, D) * inv_full

        attn = jnp.dot(agg, wo_ref[0], preferred_element_type=jnp.float32)
        x2 = x_sc[...].reshape(N * L, D)
        h = x2 + attn                                     # gating=False -> plain residual

        hn = rmsnorm(h, wpn_ref[0])
        gu = jnp.dot(hn, wgu_ref[0], preferred_element_type=jnp.float32)   # (NL, 2I)
        ff = jnp.dot(jax.nn.silu(gu[:, :I]) * gu[:, I:], wd_ref[0],
                     preferred_element_type=jnp.float32)
        new_x = (h + ff).reshape(N, L, D)
        x_sc[...] = new_x          # carry node state to the next layer
        out_ref[...] = new_x       # HBM writeback happens once, at grid end


def gofa_gnn_pallas(x_nodes, xe_edges, src, dst, cos_full, sin_full, rotp,
                    shead, sheadT, stacked, *, edge_tile=8):
    N, L, D = x_nodes.shape
    E = xe_edges.shape[0]
    H = shead.shape[1]
    num_layers = stacked['w_qkv'].shape[0]
    I = stacked['w_down'].shape[1]

    TE = int(edge_tile)
    n_tiles = max(1, -(-E // TE))
    E_pad = n_tiles * TE
    pad = E_pad - E
    if pad:
        # padded edges gather from the zeroed q/k/v trash row N and scatter into the
        # trash accumulator row N -> no branching needed, real nodes untouched.
        src = jnp.concatenate([src, jnp.full((pad,), N, jnp.int32)])
        dst = jnp.concatenate([dst, jnp.full((pad,), N, jnp.int32)])
        xe_edges = jnp.concatenate(
            [xe_edges, jnp.zeros((pad, L, D), xe_edges.dtype)], axis=0)

    cosT = jnp.tile(cos_full, (TE, 1))      # (TE*L, D), shared by every tile/layer
    sinT = jnp.tile(sin_full, (TE, 1))

    const3 = lambda l, t, s, d: (0, 0, 0)
    const2 = lambda l, t, s, d: (0, 0)
    per_layer = lambda l, t, s, d: (l, 0, 0)

    grid_spec = pltpu.PrefetchScalarGridSpec(
        num_scalar_prefetch=2,
        grid=(num_layers, n_tiles),
        in_specs=[
            pl.BlockSpec((N, L, D), const3),                         # x0 (resident)
            pl.BlockSpec((TE, L, D), lambda l, t, s, d: (t, 0, 0)),  # xe tile
            pl.BlockSpec((TE * L, D), const2),                       # cos (tiled)
            pl.BlockSpec((TE * L, D), const2),                       # sin (tiled)
            pl.BlockSpec((D, D), const2),                            # rotate_half perm
            pl.BlockSpec((D, H), const2),                            # head-sum
            pl.BlockSpec((H, D), const2),                            # head-broadcast
            pl.BlockSpec((1, 1, D), per_layer),                      # x_norm
            pl.BlockSpec((1, 1, D), per_layer),                      # xe_norm
            pl.BlockSpec((1, 1, D), per_layer),                      # post_gnn_norm
            pl.BlockSpec((1, D, 3 * D), per_layer),                  # lin_qkv
            pl.BlockSpec((1, D, 2 * D), per_layer),                  # e_proj
            pl.BlockSpec((1, D, D), per_layer),                      # o_proj
            pl.BlockSpec((1, D, 2 * I), per_layer),                  # gate|up fused
            pl.BlockSpec((1, I, D), per_layer),                      # down_proj
        ],
        out_specs=pl.BlockSpec((N, L, D), const3),
        scratch_shapes=[
            pltpu.VMEM((N, L, D), jnp.float32),         # node state
            pltpu.VMEM((N + 1, L, 3 * D), jnp.float32), # qkv (+ trash row)
            pltpu.VMEM((N + 1, L, H), jnp.float32),     # running segment max
            pltpu.VMEM((N + 1, L, H), jnp.float32),     # running exp-sum
            pltpu.VMEM((N + 1, L, D), jnp.float32),     # weighted-value accumulator
        ],
    )

    return pl.pallas_call(
        gofa_gnn_kernel,
        out_shape=jax.ShapeDtypeStruct((N, L, D), jnp.float32),
        grid_spec=grid_spec,
        compiler_params=pltpu.CompilerParams(
            dimension_semantics=("arbitrary", "arbitrary"),  # state carried on both axes
            vmem_limit_bytes=32 * 1024 * 1024,
        ),
    )(src, dst, x_nodes, xe_edges, cosT, sinT, rotp, shead, sheadT,
      stacked['w_xnorm'], stacked['w_xenorm'], stacked['w_postnorm'],
      stacked['w_qkv'], stacked['w_e'], stacked['w_o'],
      stacked['w_gu'], stacked['w_down'])


# ----------------------------------------------------------------------------
# Glue: static tables, parameters, GOFAGNN multi-layer forward
# ----------------------------------------------------------------------------
def build_rope_tables(L, Dh, H, theta=10000.0):
    inv_freq = 1.0 / (theta ** (jnp.arange(0, Dh, 2, dtype=jnp.float32) / Dh))
    t = jnp.arange(L, dtype=jnp.float32)
    freqs = jnp.outer(t, inv_freq)                    # (L, Dh/2)
    emb = jnp.concatenate([freqs, freqs], axis=-1)    # (L, Dh)
    cos_h = jnp.cos(emb)
    sin_h = jnp.sin(emb)
    cos_full = jnp.tile(cos_h, (1, H))                # (L, D) shared by all edges
    sin_full = jnp.tile(sin_h, (1, H))
    return cos_full, sin_full, cos_h, sin_h


def build_rot_half_matrix(D, H):
    Dh = D // H
    P = jnp.zeros((D, D), jnp.float32)
    for h in range(H):
        for i in range(Dh // 2):
            P = P.at[h * Dh + Dh // 2 + i, h * Dh + i].set(-1.0)
            P = P.at[h * Dh + i, h * Dh + Dh // 2 + i].set(1.0)
    return P


def build_head_matrices(D, H):
    Dh = D // H
    d_idx = jnp.arange(D) // Dh
    shead = jax.nn.one_hot(d_idx, H, dtype=jnp.float32)   # (D, H)
    return shead, shead.T                                  # (D, H), (H, D)


def make_layer_params(key, D, I):
    ks = jax.random.split(key, 6)
    s = 0.05
    return dict(
        w_xnorm=jnp.ones((1, D), jnp.float32),
        w_xenorm=jnp.ones((1, D), jnp.float32),
        w_postnorm=jnp.ones((1, D), jnp.float32),
        w_qkv=s * jax.random.normal(ks[0], (D, 3 * D), jnp.float32),
        w_e=s * jax.random.normal(ks[1], (D, 2 * D), jnp.float32),
        w_o=s * jax.random.normal(ks[2], (D, D), jnp.float32),
        w_gate=s * jax.random.normal(ks[3], (D, I), jnp.float32),
        w_up=s * jax.random.normal(ks[4], (D, I), jnp.float32),
        w_down=s * jax.random.normal(ks[5], (I, D), jnp.float32),
    )


def gofa_gnn_forward(hidden, edge_index, edge_map, num_node_feat,
                     params_list, L, D, H, theta=10000.0, edge_tile=8):
    """Mirrors GOFAGNN.forward (map_node=None)."""
    N = int(num_node_feat)
    Dh = D // H

    cos_full, sin_full, _, _ = build_rope_tables(L, Dh, H, theta)
    rotp = build_rot_half_matrix(D, H)
    shead, sheadT = build_head_matrices(D, H)

    mem = hidden.reshape(hidden.shape[0], L, D)
    node_mem = mem[:N]
    edge_mem = mem[N:]                                # never updated (matches module)
    xe = edge_mem[edge_map]                           # (E, L, D), gathered once
    src = edge_index[0].astype(jnp.int32)
    dst = edge_index[1].astype(jnp.int32)

    # stack per-layer params with a leading layer axis (pipelined by BlockSpec)
    stacked = dict(
        w_xnorm=jnp.stack([p['w_xnorm'] for p in params_list]),
        w_xenorm=jnp.stack([p['w_xenorm'] for p in params_list]),
        w_postnorm=jnp.stack([p['w_postnorm'] for p in params_list]),
        w_qkv=jnp.stack([p['w_qkv'] for p in params_list]),
        w_e=jnp.stack([p['w_e'] for p in params_list]),
        w_o=jnp.stack([p['w_o'] for p in params_list]),
        w_gu=jnp.stack([jnp.concatenate([p['w_gate'], p['w_up']], axis=1)
                        for p in params_list]),
        w_down=jnp.stack([p['w_down'] for p in params_list]),
    )

    node_out = gofa_gnn_pallas(node_mem, xe, src, dst, cos_full, sin_full,
                               rotp, shead, sheadT, stacked,
                               edge_tile=edge_tile)
    # single concat at the very end (no per-layer hidden re-materialization)
    return jnp.concatenate([node_out, edge_mem], axis=0)


# ----------------------------------------------------------------------------
# Pure-JAX reference (gather / segment ops), mirrors the PyTorch semantics
# ----------------------------------------------------------------------------
def reference_layer(x, xe, edge_index, params, cos, sin, L, D, H):
    Dh = D // H
    E = xe.shape[0]
    N = x.shape[0]

    def rms(v, w):
        var = jnp.mean(v * v, -1, keepdims=True)
        return v * jax.lax.rsqrt(var + 1e-6) * w

    residual = x
    xn = rms(x, params['w_xnorm'][0])
    xen = rms(xe, params['w_xenorm'][0])
    qkv = xn @ params['w_qkv']
    q, k, v = jnp.split(qkv, 3, -1)
    ekv = xen @ params['w_e']
    xek, xev = jnp.split(ekv, 2, -1)

    src, dst = edge_index[0], edge_index[1]
    q_i = q[dst]
    k_j = k[src] + xek
    v_j = v[src] + xev

    def heads(t):
        return t.reshape(t.shape[0], L, H, Dh)

    qh, kh, vh = heads(q_i), heads(k_j), heads(v_j)
    cos_b = cos[None, :, None, :]
    sin_b = sin[None, :, None, :]

    def rot_half(t):
        return jnp.concatenate([-t[..., Dh // 2:], t[..., :Dh // 2]], -1)

    qh = qh * cos_b + rot_half(qh) * sin_b
    kh = kh * cos_b + rot_half(kh) * sin_b

    alpha = (qh * kh).sum(-1) / math.sqrt(Dh)            # (E, L, H)
    amax = jax.ops.segment_max(alpha, dst, num_segments=N)
    alpha = jnp.exp(alpha - amax[dst])
    denom = jax.ops.segment_sum(alpha, dst, num_segments=N)
    alpha = alpha / denom[dst]

    msg = (vh * alpha[..., None]).reshape(E, L, D)
    agg = jax.ops.segment_sum(msg, dst, num_segments=N)
    h = residual + agg @ params['w_o']
    hn = rms(h, params['w_postnorm'][0])
    ff = (jax.nn.silu(hn @ params['w_gate']) * (hn @ params['w_up'])) @ params['w_down']
    return h + ff


def reference_forward(hidden, edge_index, edge_map, num_node_feat,
                      params_list, L, D, H, theta=10000.0):
    N = int(num_node_feat)
    Dh = D // H
    _, _, cos, sin = build_rope_tables(L, Dh, H, theta)
    mem = hidden.reshape(hidden.shape[0], L, D)
    for params in params_list:
        x = mem[:N]
        xe = mem[N:][edge_map]
        out = reference_layer(x, xe, edge_index, params, cos, sin, L, D, H)
        mem = jnp.concatenate([out, mem[N:]], axis=0)
    return mem


# ----------------------------------------------------------------------------
if __name__ == "__main__":
    # small deterministic config
    D, H, L = 32, 4, 8          # dim, head, mem_token
    I = 2 * D                   # LlamaMLP intermediate size
    num_layers = 2
    N = 4                       # graph.num_node_feat
    num_edge_feat = 3
    theta = 10000.0

    key = jax.random.PRNGKey(0)
    k_hidden, k_params = jax.random.split(key)

    edge_index = jnp.array([[0, 1, 2, 3, 0, 2],
                            [1, 2, 3, 0, 2, 1]], dtype=jnp.int32)   # (2, E)
    edge_map = jnp.array([0, 1, 2, 0, 1, 2], dtype=jnp.int32)       # (E,)
    total = N + num_edge_feat
    hidden_states = jax.random.normal(k_hidden, (total, L * D), jnp.float32)

    params_list = [make_layer_params(k, D, I)
                   for k in jax.random.split(k_params, num_layers)]

    out = gofa_gnn_forward(hidden_states, edge_index, edge_map, N,
                           params_list, L, D, H, theta)
    out = jax.block_until_ready(out)

    ref = reference_forward(hidden_states, edge_index, edge_map, N,
                            params_list, L, D, H, theta)
    ref = jax.block_until_ready(ref)

    assert out.shape == (total, L, D)
    assert bool(jnp.all(jnp.isfinite(out)))
    assert bool(jnp.allclose(out, ref, rtol=3e-3, atol=3e-3)), (
        float(jnp.max(jnp.abs(out - ref))))

    print("KERNEL_OK")
</pallas_src>

<mosaic_0001>
module attributes {stable_mosaic.version = 11 : i64} {
  func.func @gofa_gnn_kernel(%arg0: i32, %arg1: i32, %arg2: memref<8xi32, #tpu.memory_space<smem>>, %arg3: memref<8xi32, #tpu.memory_space<smem>>, %arg4: memref<4x8x32xf32, #tpu.memory_space<vmem>>, %arg5: memref<8x8x32xf32, #tpu.memory_space<vmem>>, %arg6: memref<64x32xf32, #tpu.memory_space<vmem>>, %arg7: memref<64x32xf32, #tpu.memory_space<vmem>>, %arg8: memref<32x32xf32, #tpu.memory_space<vmem>>, %arg9: memref<32x4xf32, #tpu.memory_space<vmem>>, %arg10: memref<4x32xf32, #tpu.memory_space<vmem>>, %arg11: memref<1x1x32xf32, #tpu.memory_space<vmem>>, %arg12: memref<1x1x32xf32, #tpu.memory_space<vmem>>, %arg13: memref<1x1x32xf32, #tpu.memory_space<vmem>>, %arg14: memref<1x32x96xf32, #tpu.memory_space<vmem>>, %arg15: memref<1x32x64xf32, #tpu.memory_space<vmem>>, %arg16: memref<1x32x32xf32, #tpu.memory_space<vmem>>, %arg17: memref<1x32x128xf32, #tpu.memory_space<vmem>>, %arg18: memref<1x64x32xf32, #tpu.memory_space<vmem>>, %arg19: memref<4x8x32xf32, #tpu.memory_space<vmem>>, %arg20: memref<4x8x32xf32, #tpu.memory_space<vmem>>, %arg21: memref<5x8x96xf32, #tpu.memory_space<vmem>>, %arg22: memref<5x8x4xf32, #tpu.memory_space<vmem>>, %arg23: memref<5x8x4xf32, #tpu.memory_space<vmem>>, %arg24: memref<5x8x32xf32, #tpu.memory_space<vmem>>) attributes {dimension_semantics = [#tpu.dimension_semantics<arbitrary>, #tpu.dimension_semantics<arbitrary>], iteration_bounds = array<i64: 2, 1>, scalar_prefetch = 2 : i64, scratch_operands = 5 : i64, tpu.core_type = #tpu.core_type<tc>, window_params = [{pipeline_mode = #tpu.pipeline_mode<synchronous>, transform_indices = @transform_0, window_bounds = array<i64: 4, 8, 32>}, {transform_indices = @transform_1, window_bounds = array<i64: 8, 8, 32>}, {pipeline_mode = #tpu.pipeline_mode<synchronous>, transform_indices = @transform_2, window_bounds = array<i64: 64, 32>}, {pipeline_mode = #tpu.pipeline_mode<synchronous>, transform_indices = @transform_3, window_bounds = array<i64: 64, 32>}, {pipeline_mode = #tpu.pipeline_mode<synchronous>, transform_indices = @transform_4, window_bounds = array<i64: 32, 32>}, {pipeline_mode = #tpu.pipeline_mode<synchronous>, transform_indices = @transform_5, window_bounds = array<i64: 32, 4>}, {pipeline_mode = #tpu.pipeline_mode<synchronous>, transform_indices = @transform_6, window_bounds = array<i64: 4, 32>}, {transform_indices = @transform_7, window_bounds = array<i64: 1, 1, 32>}, {transform_indices = @transform_8, window_bounds = array<i64: 1, 1, 32>}, {transform_indices = @transform_9, window_bounds = array<i64: 1, 1, 32>}, {transform_indices = @transform_10, window_bounds = array<i64: 1, 32, 96>}, {transform_indices = @transform_11, window_bounds = array<i64: 1, 32, 64>}, {transform_indices = @transform_12, window_bounds = array<i64: 1, 32, 32>}, {transform_indices = @transform_13, window_bounds = array<i64: 1, 32, 128>}, {transform_indices = @transform_14, window_bounds = array<i64: 1, 64, 32>}, {pipeline_mode = #tpu.pipeline_mode<synchronous>, transform_indices = @transform_15, window_bounds = array<i64: 4, 8, 32>}]} {
    %c0_i32 = arith.constant 0 : i32
    %0 = arith.cmpi eq, %arg0, %c0_i32 : i32
    %c0_i32_0 = arith.constant 0 : i32
    %1 = arith.cmpi eq, %arg1, %c0_i32_0 : i32
    %2 = arith.andi %0, %1 : i1
    %3 = arith.extui %2 : i1 to i32
    %c0_i32_1 = arith.constant 0 : i32
    %4 = arith.cmpi ne, %3, %c0_i32_1 : i32
    scf.if %4 {
      %c0_192 = arith.constant 0 : index
      %c0_193 = arith.constant 0 : index
      %c0_194 = arith.constant 0 : index
      %457 = vector.load %arg4[%c0_192, %c0_193, %c0_194] : memref<4x8x32xf32, #tpu.memory_space<vmem>>, vector<4x8x32xf32>
      %c0_195 = arith.constant 0 : index
      %c0_196 = arith.constant 0 : index
      %c0_197 = arith.constant 0 : index
      %458 = vector.load %arg20[%c0_195, %c0_196, %c0_197] : memref<4x8x32xf32, #tpu.memory_space<vmem>>, vector<4x8x32xf32>
      tpu.vector_store %arg20[%c0_195, %c0_196, %c0_197], %457 {strides = array<i32>} : memref<4x8x32xf32, #tpu.memory_space<vmem>>, vector<4x8x32xf32>,
    } else {
    }
    %c0_i32_2 = arith.constant 0 : i32
    %5 = arith.cmpi eq, %arg1, %c0_i32_2 : i32
    %6 = arith.extui %5 : i1 to i32
    %c0_i32_3 = arith.constant 0 : i32
    %7 = arith.cmpi ne, %6, %c0_i32_3 : i32
    scf.if %7 {
      %c0_192 = arith.constant 0 : index
      %c0_193 = arith.constant 0 : index
      %c0_194 = arith.constant 0 : index
      %457 = vector.load %arg20[%c0_192, %c0_193, %c0_194] : memref<4x8x32xf32, #tpu.memory_space<vmem>>, vector<4x8x32xf32>
      %458 = vector.shape_cast %457 : vector<4x8x32xf32> to vector<32x32xf32>
      %c0_195 = arith.constant 0 : index
      %c0_196 = arith.constant 0 : index
      %c0_197 = arith.constant 0 : index
      %459 = vector.load %arg11[%c0_195, %c0_196, %c0_197] : memref<1x1x32xf32, #tpu.memory_space<vmem>>, vector<1x1x32xf32>
      %460 = vector.shape_cast %459 : vector<1x1x32xf32> to vector<1x32xf32>
      %461 = arith.mulf %458, %458 : vector<32x32xf32>
      %cst_198 = arith.constant dense<0.000000e+00> : vector<32xf32>
      %462 = vector.multi_reduction <add>, %461, %cst_198 [1] : vector<32x32xf32> to vector<32xf32>
      %463 = vector.shape_cast %462 : vector<32xf32> to vector<32x1xf32>
      %cst_199 = arith.constant 3.200000e+01 : f32
      %464 = vector.broadcast %cst_199 : f32 to vector<32x1xf32>
      %465 = arith.divf %463, %464 : vector<32x1xf32>
      %cst_200 = arith.constant 9.99999997E-7 : f32
      %466 = vector.broadcast %cst_200 : f32 to vector<32x1xf32>
      %467 = arith.addf %465, %466 : vector<32x1xf32>
      %468 = math.rsqrt %467 : vector<32x1xf32>
      %469 = vector.broadcast %468 : vector<32x1xf32> to vector<32x32xf32>
      %470 = arith.mulf %458, %469 : vector<32x32xf32>
      %471 = vector.broadcast %460 : vector<1x32xf32> to vector<32x32xf32>
      %472 = arith.mulf %470, %471 : vector<32x32xf32>
      %c0_201 = arith.constant 0 : index
      %c0_202 = arith.constant 0 : index
      %c0_203 = arith.constant 0 : index
      %473 = vector.load %arg14[%c0_201, %c0_202, %c0_203] : memref<1x32x96xf32, #tpu.memory_space<vmem>>, vector<1x32x96xf32>
      %474 = vector.shape_cast %473 : vector<1x32x96xf32> to vector<32x96xf32>
      %cst_204 = arith.constant dense<0.000000e+00> : vector<32x96xf32>
      %475 = tpu.matmul %472, %474, %cst_204 {dimension_numbers = #tpu.dot_dimension_numbers<[1], [0], [0], [1], [0, 0, 1, 1], [], []>} : vector<32x32xf32>, vector<32x96xf32>, vector<32x96xf32> -> vector<32x96xf32>
      %476 = vector.shape_cast %475 : vector<32x96xf32> to vector<4x8x96xf32>
      %c0_205 = arith.constant 0 : index
      %c0_206 = arith.constant 0 : index
      %c0_207 = arith.constant 0 : index
      %477 = vector.load %arg21[%c0_205, %c0_206, %c0_207] : memref<5x8x96xf32, #tpu.memory_space<vmem>>, vector<4x8x96xf32>
      tpu.vector_store %arg21[%c0_205, %c0_206, %c0_207], %476 {strides = array<i32>} : memref<5x8x96xf32, #tpu.memory_space<vmem>>, vector<4x8x96xf32>,
      %cst_208 = arith.constant 0.000000e+00 : f32
      %478 = vector.broadcast %cst_208 : f32 to vector<8x96xf32>
      %c4 = arith.constant 4 : index
      %c0_209 = arith.constant 0 : index
      %c0_210 = arith.constant 0 : index
      %479 = vector.load %arg21[%c4, %c0_209, %c0_210] : memref<5x8x96xf32, #tpu.memory_space<vmem>>, vector<1x8x96xf32>
      %480 = vector.shape_cast %479 : vector<1x8x96xf32> to vector<8x96xf32>
      %481 = vector.shape_cast %478 : vector<8x96xf32> to vector<1x8x96xf32>
      tpu.vector_store %arg21[%c4, %c0_209, %c0_210], %481 {strides = array<i32>} : memref<5x8x96xf32, #tpu.memory_space<vmem>>, vector<1x8x96xf32>,
      %cst_211 = arith.constant -1.000000e+30 : f32
      %482 = vector.broadcast %cst_211 : f32 to vector<5x8x4xf32>
      %c0_212 = arith.constant 0 : index
      %c0_213 = arith.constant 0 : index
      %c0_214 = arith.constant 0 : index
      %483 = vector.load %arg22[%c0_212, %c0_213, %c0_214] : memref<5x8x4xf32, #tpu.memory_space<vmem>>, vector<5x8x4xf32>
      tpu.vector_store %arg22[%c0_212, %c0_213, %c0_214], %482 {strides = array<i32>} : memref<5x8x4xf32, #tpu.memory_space<vmem>>, vector<5x8x4xf32>,
      %cst_215 = arith.constant 0.000000e+00 : f32
      %484 = vector.broadcast %cst_215 : f32 to vector<5x8x4xf32>
      %c0_216 = arith.constant 0 : index
      %c0_217 = arith.constant 0 : index
      %c0_218 = arith.constant 0 : index
      %485 = vector.load %arg23[%c0_216, %c0_217, %c0_218] : memref<5x8x4xf32, #tpu.memory_space<vmem>>, vector<5x8x4xf32>
      tpu.vector_store %arg23[%c0_216, %c0_217, %c0_218], %484 {strides = array<i32>} : memref<5x8x4xf32, #tpu.memory_space<vmem>>, vector<5x8x4xf32>,
      %cst_219 = arith.constant 0.000000e+00 : f32
      %486 = vector.broadcast %cst_219 : f32 to vector<5x8x32xf32>
      %c0_220 = arith.constant 0 : index
      %c0_221 = arith.constant 0 : index
      %c0_222 = arith.constant 0 : index
      %487 = vector.load %arg24[%c0_220, %c0_221, %c0_222] : memref<5x8x32xf32, #tpu.memory_space<vmem>>, vector<5x8x32xf32>
      tpu.vector_store %arg24[%c0_220, %c0_221, %c0_222], %486 {strides = array<i32>} : memref<5x8x32xf32, #tpu.memory_space<vmem>>, vector<5x8x32xf32>,
    } else {
    }
    %c8_i32 = arith.constant 8 : i32
    %8 = arith.muli %arg1, %c8_i32 : i32
    %c0 = arith.constant 0 : index
    %c0_4 = arith.constant 0 : index
    %c0_5 = arith.constant 0 : index
    %9 = vector.load %arg5[%c0, %c0_4, %c0_5] : memref<8x8x32xf32, #tpu.memory_space<vmem>>, vector<8x8x32xf32>
    %10 = vector.shape_cast %9 : vector<8x8x32xf32> to vector<64x32xf32>
    %c0_6 = arith.constant 0 : index
    %c0_7 = arith.constant 0 : index
    %c0_8 = arith.constant 0 : index
    %11 = vector.load %arg12[%c0_6, %c0_7, %c0_8] : memref<1x1x32xf32, #tpu.memory_space<vmem>>, vector<1x1x32xf32>
    %12 = vector.shape_cast %11 : vector<1x1x32xf32> to vector<1x32xf32>
    %13 = arith.mulf %10, %10 : vector<64x32xf32>
    %cst = arith.constant dense<0.000000e+00> : vector<64xf32>
    %14 = vector.multi_reduction <add>, %13, %cst [1] : vector<64x32xf32> to vector<64xf32>
    %15 = vector.shape_cast %14 : vector<64xf32> to vector<64x1xf32>
    %cst_9 = arith.constant 3.200000e+01 : f32
    %16 = vector.broadcast %cst_9 : f32 to vector<64x1xf32>
    %17 = arith.divf %15, %16 : vector<64x1xf32>
    %cst_10 = arith.constant 9.99999997E-7 : f32
    %18 = vector.broadcast %cst_10 : f32 to vector<64x1xf32>
    %19 = arith.addf %17, %18 : vector<64x1xf32>
    %20 = math.rsqrt %19 : vector<64x1xf32>
    %21 = vector.broadcast %20 : vector<64x1xf32> to vector<64x32xf32>
    %22 = arith.mulf %10, %21 : vector<64x32xf32>
    %23 = vector.broadcast %12 : vector<1x32xf32> to vector<64x32xf32>
    %24 = arith.mulf %22, %23 : vector<64x32xf32>
    %c0_11 = arith.constant 0 : index
    %c0_12 = arith.constant 0 : index
    %c0_13 = arith.constant 0 : index
    %25 = vector.load %arg15[%c0_11, %c0_12, %c0_13] : memref<1x32x64xf32, #tpu.memory_space<vmem>>, vector<1x32x64xf32>
    %26 = vector.shape_cast %25 : vector<1x32x64xf32> to vector<32x64xf32>
    %cst_14 = arith.constant dense<0.000000e+00> : vector<64x64xf32>
    %27 = tpu.matmul %24, %26, %cst_14 {dimension_numbers = #tpu.dot_dimension_numbers<[1], [0], [0], [1], [0, 0, 1, 1], [], []>} : vector<64x32xf32>, vector<32x64xf32>, vector<64x64xf32> -> vector<64x64xf32>
    %c0_i32_15 = arith.constant 0 : i32
    %28 = arith.addi %8, %c0_i32_15 : i32
    %29 = arith.index_cast %28 : i32 to index
    %30 = memref.load %arg3[%29] : memref<8xi32, #tpu.memory_space<smem>>
    %31 = arith.index_cast %30 : i32 to index
    %c0_16 = arith.constant 0 : index
    %c0_17 = arith.constant 0 : index
    %32 = vector.load %arg21[%31, %c0_16, %c0_17] : memref<5x8x96xf32, #tpu.memory_space<vmem>>, vector<1x8x96xf32>
    %33 = vector.shape_cast %32 : vector<1x8x96xf32> to vector<8x96xf32>
    %c1_i32 = arith.constant 1 : i32
    %34 = arith.addi %8, %c1_i32 : i32
    %35 = arith.index_cast %34 : i32 to index
    %36 = memref.load %arg3[%35] : memref<8xi32, #tpu.memory_space<smem>>
    %37 = arith.index_cast %36 : i32 to index
    %c0_18 = arith.constant 0 : index
    %c0_19 = arith.constant 0 : index
    %38 = vector.load %arg21[%37, %c0_18, %c0_19] : memref<5x8x96xf32, #tpu.memory_space<vmem>>, vector<1x8x96xf32>
    %39 = vector.shape_cast %38 : vector<1x8x96xf32> to vector<8x96xf32>
    %c2_i32 = arith.constant 2 : i32
    %40 = arith.addi %8, %c2_i32 : i32
    %41 = arith.index_cast %40 : i32 to index
    %42 = memref.load %arg3[%41] : memref<8xi32, #tpu.memory_space<smem>>
    %43 = arith.index_cast %42 : i32 to index
    %c0_20 = arith.constant 0 : index
    %c0_21 = arith.constant 0 : index
    %44 = vector.load %arg21[%43, %c0_20, %c0_21] : memref<5x8x96xf32, #tpu.memory_space<vmem>>, vector<1x8x96xf32>
    %45 = vector.shape_cast %44 : vector<1x8x96xf32> to vector<8x96xf32>
    %c3_i32 = arith.constant 3 : i32
    %46 = arith.addi %8, %c3_i32 : i32
    %47 = arith.index_cast %46 : i32 to index
    %48 = memref.load %arg3[%47] : memref<8xi32, #tpu.memory_space<smem>>
    %49 = arith.index_cast %48 : i32 to index
    %c0_22 = arith.constant 0 : index
    %c0_23 = arith.constant 0 : index
    %50 = vector.load %arg21[%49, %c0_22, %c0_23] : memref<5x8x96xf32, #tpu.memory_space<vmem>>, vector<1x8x96xf32>
    %51 = vector.shape_cast %50 : vector<1x8x96xf32> to vector<8x96xf32>
    %c4_i32 = arith.constant 4 : i32
    %52 = arith.addi %8, %c4_i32 : i32
    %53 = arith.index_cast %52 : i32 to index
    %54 = memref.load %arg3[%53] : memref<8xi32, #tpu.memory_space<smem>>
    %55 = arith.index_cast %54 : i32 to index
    %c0_24 = arith.constant 0 : index
    %c0_25 = arith.constant 0 : index
    %56 = vector.load %arg21[%55, %c0_24, %c0_25] : memref<5x8x96xf32, #tpu.memory_space<vmem>>, vector<1x8x96xf32>
    %57 = vector.shape_cast %56 : vector<1x8x96xf32> to vector<8x96xf32>
    %c5_i32 = arith.constant 5 : i32
    %58 = arith.addi %8, %c5_i32 : i32
    %59 = arith.index_cast %58 : i32 to index
    %60 = memref.load %arg3[%59] : memref<8xi32, #tpu.memory_space<smem>>
    %61 = arith.index_cast %60 : i32 to index
    %c0_26 = arith.constant 0 : index
    %c0_27 = arith.constant 0 : index
    %62 = vector.load %arg21[%61, %c0_26, %c0_27] : memref<5x8x96xf32, #tpu.memory_space<vmem>>, vector<1x8x96xf32>
    %63 = vector.shape_cast %62 : vector<1x8x96xf32> to vector<8x96xf32>
    %c6_i32 = arith.constant 6 : i32
    %64 = arith.addi %8, %c6_i32 : i32
    %65 = arith.index_cast %64 : i32 to index
    %66 = memref.load %arg3[%65] : memref<8xi32, #tpu.memory_space<smem>>
    %67 = arith.index_cast %66 : i32 to index
    %c0_28 = arith.constant 0 : index
    %c0_29 = arith.constant 0 : index
    %68 = vector.load %arg21[%67, %c0_28, %c0_29] : memref<5x8x96xf32, #tpu.memory_space<vmem>>, vector<1x8x96xf32>
    %69 = vector.shape_cast %68 : vector<1x8x96xf32> to vector<8x96xf32>
    %c7_i32 = arith.constant 7 : i32
    %70 = arith.addi %8, %c7_i32 : i32
    %71 = arith.index_cast %70 : i32 to index
    %72 = memref.load %arg3[%71] : memref<8xi32, #tpu.memory_space<smem>>
    %73 = arith.index_cast %72 : i32 to index
    %c0_30 = arith.constant 0 : index
    %c0_31 = arith.constant 0 : index
    %74 = vector.load %arg21[%73, %c0_30, %c0_31] : memref<5x8x96xf32, #tpu.memory_space<vmem>>, vector<1x8x96xf32>
    %75 = vector.shape_cast %74 : vector<1x8x96xf32> to vector<8x96xf32>
    %c0_i32_32 = arith.constant 0 : i32
    %76 = arith.addi %8, %c0_i32_32 : i32
    %77 = arith.index_cast %76 : i32 to index
    %78 = memref.load %arg2[%77] : memref<8xi32, #tpu.memory_space<smem>>
    %79 = arith.index_cast %78 : i32 to index
    %c0_33 = arith.constant 0 : index
    %c0_34 = arith.constant 0 : index
    %80 = vector.load %arg21[%79, %c0_33, %c0_34] : memref<5x8x96xf32, #tpu.memory_space<vmem>>, vector<1x8x96xf32>
    %81 = vector.shape_cast %80 : vector<1x8x96xf32> to vector<8x96xf32>
    %c1_i32_35 = arith.constant 1 : i32
    %82 = arith.addi %8, %c1_i32_35 : i32
    %83 = arith.index_cast %82 : i32 to index
    %84 = memref.load %arg2[%83] : memref<8xi32, #tpu.memory_space<smem>>
    %85 = arith.index_cast %84 : i32 to index
    %c0_36 = arith.constant 0 : index
    %c0_37 = arith.constant 0 : index
    %86 = vector.load %arg21[%85, %c0_36, %c0_37] : memref<5x8x96xf32, #tpu.memory_space<vmem>>, vector<1x8x96xf32>
    %87 = vector.shape_cast %86 : vector<1x8x96xf32> to vector<8x96xf32>
    %c2_i32_38 = arith.constant 2 : i32
    %88 = arith.addi %8, %c2_i32_38 : i32
    %89 = arith.index_cast %88 : i32 to index
    %90 = memref.load %arg2[%89] : memref<8xi32, #tpu.memory_space<smem>>
    %91 = arith.index_cast %90 : i32 to index
    %c0_39 = arith.constant 0 : index
    %c0_40 = arith.constant 0 : index
    %92 = vector.load %arg21[%91, %c0_39, %c0_40] : memref<5x8x96xf32, #tpu.memory_space<vmem>>, vector<1x8x96xf32>
    %93 = vector.shape_cast %92 : vector<1x8x96xf32> to vector<8x96xf32>
    %c3_i32_41 = arith.constant 3 : i32
    %94 = arith.addi %8, %c3_i32_41 : i32
    %95 = arith.index_cast %94 : i32 to index
    %96 = memref.load %arg2[%95] : memref<8xi32, #tpu.memory_space<smem>>
    %97 = arith.index_cast %96 : i32 to index
    %c0_42 = arith.constant 0 : index
    %c0_43 = arith.constant 0 : index
    %98 = vector.load %arg21[%97, %c0_42, %c0_43] : memref<5x8x96xf32, #tpu.memory_space<vmem>>, vector<1x8x96xf32>
    %99 = vector.shape_cast %98 : vector<1x8x96xf32> to vector<8x96xf32>
    %c4_i32_44 = arith.constant 4 : i32
    %100 = arith.addi %8, %c4_i32_44 : i32
    %101 = arith.index_cast %100 : i32 to index
    %102 = memref.load %arg2[%101] : memref<8xi32, #tpu.memory_space<smem>>
    %103 = arith.index_cast %102 : i32 to index
    %c0_45 = arith.constant 0 : index
    %c0_46 = arith.constant 0 : index
    %104 = vector.load %arg21[%103, %c0_45, %c0_46] : memref<5x8x96xf32, #tpu.memory_space<vmem>>, vector<1x8x96xf32>
    %105 = vector.shape_cast %104 : vector<1x8x96xf32> to vector<8x96xf32>
    %c5_i32_47 = arith.constant 5 : i32
    %106 = arith.addi %8, %c5_i32_47 : i32
    %107 = arith.index_cast %106 : i32 to index
    %108 = memref.load %arg2[%107] : memref<8xi32, #tpu.memory_space<smem>>
    %109 = arith.index_cast %108 : i32 to index
    %c0_48 = arith.constant 0 : index
    %c0_49 = arith.constant 0 : index
    %110 = vector.load %arg21[%109, %c0_48, %c0_49] : memref<5x8x96xf32, #tpu.memory_space<vmem>>, vector<1x8x96xf32>
    %111 = vector.shape_cast %110 : vector<1x8x96xf32> to vector<8x96xf32>
    %c6_i32_50 = arith.constant 6 : i32
    %112 = arith.addi %8, %c6_i32_50 : i32
    %113 = arith.index_cast %112 : i32 to index
    %114 = memref.load %arg2[%113] : memref<8xi32, #tpu.memory_space<smem>>
    %115 = arith.index_cast %114 : i32 to index
    %c0_51 = arith.constant 0 : index
    %c0_52 = arith.constant 0 : index
    %116 = vector.load %arg21[%115, %c0_51, %c0_52] : memref<5x8x96xf32, #tpu.memory_space<vmem>>, vector<1x8x96xf32>
    %117 = vector.shape_cast %116 : vector<1x8x96xf32> to vector<8x96xf32>
    %c7_i32_53 = arith.constant 7 : i32
    %118 = arith.addi %8, %c7_i32_53 : i32
    %119 = arith.index_cast %118 : i32 to index
    %120 = memref.load %arg2[%119] : memref<8xi32, #tpu.memory_space<smem>>
    %121 = arith.index_cast %120 : i32 to index
    %c0_54 = arith.constant 0 : index
    %c0_55 = arith.constant 0 : index
    %122 = vector.load %arg21[%121, %c0_54, %c0_55] : memref<5x8x96xf32, #tpu.memory_space<vmem>>, vector<1x8x96xf32>
    %123 = vector.shape_cast %122 : vector<1x8x96xf32> to vector<8x96xf32>
    %124 = tpu.concatenate %33, %39, %45, %51, %57, %63, %69, %75 in 0 : vector<8x96xf32>, vector<8x96xf32>, vector<8x96xf32>, vector<8x96xf32>, vector<8x96xf32>, vector<8x96xf32>, vector<8x96xf32>, vector<8x96xf32> -> vector<64x96xf32>
    %125 = tpu.concatenate %81, %87, %93, %99, %105, %111, %117, %123 in 0 : vector<8x96xf32>, vector<8x96xf32>, vector<8x96xf32>, vector<8x96xf32>, vector<8x96xf32>, vector<8x96xf32>, vector<8x96xf32>, vector<8x96xf32> -> vector<64x96xf32>
    %126 = vector.extract_strided_slice %124 {offsets = [0, 0], sizes = [64, 32], strides = [1, 1]} : vector<64x96xf32> to vector<64x32xf32>
    %127 = vector.extract_strided_slice %125 {offsets = [0, 32], sizes = [64, 32], strides = [1, 1]} : vector<64x96xf32> to vector<64x32xf32>
    %128 = vector.extract_strided_slice %27 {offsets = [0, 0], sizes = [64, 32], strides = [1, 1]} : vector<64x64xf32> to vector<64x32xf32>
    %129 = arith.addf %127, %128 : vector<64x32xf32>
    %130 = vector.extract_strided_slice %125 {offsets = [0, 64], sizes = [64, 32], strides = [1, 1]} : vector<64x96xf32> to vector<64x32xf32>
    %131 = vector.extract_strided_slice %27 {offsets = [0, 32], sizes = [64, 32], strides = [1, 1]} : vector<64x64xf32> to vector<64x32xf32>
    %132 = arith.addf %130, %131 : vector<64x32xf32>
    %c0_56 = arith.constant 0 : index
    %c0_57 = arith.constant 0 : index
    %133 = vector.load %arg6[%c0_56, %c0_57] : memref<64x32xf32, #tpu.memory_space<vmem>>, vector<64x32xf32>
    %c0_58 = arith.constant 0 : index
    %c0_59 = arith.constant 0 : index
    %134 = vector.load %arg7[%c0_58, %c0_59] : memref<64x32xf32, #tpu.memory_space<vmem>>, vector<64x32xf32>
    %c0_60 = arith.constant 0 : index
    %c0_61 = arith.constant 0 : index
    %135 = vector.load %arg8[%c0_60, %c0_61] : memref<32x32xf32, #tpu.memory_space<vmem>>, vector<32x32xf32>
    %136 = arith.mulf %126, %133 : vector<64x32xf32>
    %cst_62 = arith.constant dense<0.000000e+00> : vector<64x32xf32>
    %137 = tpu.matmul %126, %135, %cst_62 {dimension_numbers = #tpu.dot_dimension_numbers<[1], [0], [0], [1], [0, 0, 1, 1], [], []>} : vector<64x32xf32>, vector<32x32xf32>, vector<64x32xf32> -> vector<64x32xf32>
    %138 = arith.mulf %137, %134 : vector<64x32xf32>
    %139 = arith.addf %136, %138 : vector<64x32xf32>
    %140 = arith.mulf %129, %133 : vector<64x32xf32>
    %cst_63 = arith.constant dense<0.000000e+00> : vector<64x32xf32>
    %141 = tpu.matmul %129, %135, %cst_63 {dimension_numbers = #tpu.dot_dimension_numbers<[1], [0], [0], [1], [0, 0, 1, 1], [], []>} : vector<64x32xf32>, vector<32x32xf32>, vector<64x32xf32> -> vector<64x32xf32>
    %142 = arith.mulf %141, %134 : vector<64x32xf32>
    %143 = arith.addf %140, %142 : vector<64x32xf32>
    %144 = arith.mulf %139, %143 : vector<64x32xf32>
    %c0_64 = arith.constant 0 : index
    %c0_65 = arith.constant 0 : index
    %145 = vector.load %arg9[%c0_64, %c0_65] : memref<32x4xf32, #tpu.memory_space<vmem>>, vector<32x4xf32>
    %cst_66 = arith.constant dense<0.000000e+00> : vector<64x4xf32>
    %146 = tpu.matmul %144, %145, %cst_66 {dimension_numbers = #tpu.dot_dimension_numbers<[1], [0], [0], [1], [0, 0, 1, 1], [], []>} : vector<64x32xf32>, vector<32x4xf32>, vector<64x4xf32> -> vector<64x4xf32>
    %cst_67 = arith.constant 0.353553385 : f32
    %147 = vector.broadcast %cst_67 : f32 to vector<64x4xf32>
    %148 = arith.mulf %146, %147 : vector<64x4xf32>
    %c0_68 = arith.constant 0 : index
    %c0_69 = arith.constant 0 : index
    %149 = vector.load %arg10[%c0_68, %c0_69] : memref<4x32xf32, #tpu.memory_space<vmem>>, vector<4x32xf32>
    %c0_i32_70 = arith.constant 0 : i32
    %150 = arith.addi %8, %c0_i32_70 : i32
    %151 = arith.index_cast %150 : i32 to index
    %152 = memref.load %arg3[%151] : memref<8xi32, #tpu.memory_space<smem>>
    %153 = vector.extract_strided_slice %148 {offsets = [0, 0], sizes = [8, 4], strides = [1, 1]} : vector<64x4xf32> to vector<8x4xf32>
    %154 = vector.extract_strided_slice %132 {offsets = [0, 0], sizes = [8, 32], strides = [1, 1]} : vector<64x32xf32> to vector<8x32xf32>
    %155 = arith.index_cast %152 : i32 to index
    %c0_71 = arith.constant 0 : index
    %c0_72 = arith.constant 0 : index
    %156 = vector.load %arg22[%155, %c0_71, %c0_72] : memref<5x8x4xf32, #tpu.memory_space<vmem>>, vector<1x8x4xf32>
    %157 = vector.shape_cast %156 : vector<1x8x4xf32> to vector<8x4xf32>
    %158 = arith.maximumf %157, %153 : vector<8x4xf32>
    %159 = arith.subf %157, %158 : vector<8x4xf32>
    %160 = math.exp %159 : vector<8x4xf32>
    %161 = arith.subf %153, %158 : vector<8x4xf32>
    %162 = math.exp %161 : vector<8x4xf32>
    %163 = arith.index_cast %152 : i32 to index
    %c0_73 = arith.constant 0 : index
    %c0_74 = arith.constant 0 : index
    %164 = vector.load %arg23[%163, %c0_73, %c0_74] : memref<5x8x4xf32, #tpu.memory_space<vmem>>, vector<1x8x4xf32>
    %165 = vector.shape_cast %164 : vector<1x8x4xf32> to vector<8x4xf32>
    %166 = arith.mulf %165, %160 : vector<8x4xf32>
    %167 = arith.addf %166, %162 : vector<8x4xf32>
    %168 = arith.index_cast %152 : i32 to index
    %c0_75 = arith.constant 0 : index
    %c0_76 = arith.constant 0 : index
    %169 = vector.load %arg23[%168, %c0_75, %c0_76] : memref<5x8x4xf32, #tpu.memory_space<vmem>>, vector<1x8x4xf32>
    %170 = vector.shape_cast %169 : vector<1x8x4xf32> to vector<8x4xf32>
    %171 = vector.shape_cast %167 : vector<8x4xf32> to vector<1x8x4xf32>
    tpu.vector_store %arg23[%168, %c0_75, %c0_76], %171 {strides = array<i32>} : memref<5x8x4xf32, #tpu.memory_space<vmem>>, vector<1x8x4xf32>,
    %cst_77 = arith.constant dense<0.000000e+00> : vector<8x32xf32>
    %172 = tpu.matmul %160, %149, %cst_77 {dimension_numbers = #tpu.dot_dimension_numbers<[1], [0], [0], [1], [0, 0, 1, 1], [], []>} : vector<8x4xf32>, vector<4x32xf32>, vector<8x32xf32> -> vector<8x32xf32>
    %cst_78 = arith.constant dense<0.000000e+00> : vector<8x32xf32>
    %173 = tpu.matmul %162, %149, %cst_78 {dimension_numbers = #tpu.dot_dimension_numbers<[1], [0], [0], [1], [0, 0, 1, 1], [], []>} : vector<8x4xf32>, vector<4x32xf32>, vector<8x32xf32> -> vector<8x32xf32>
    %174 = arith.index_cast %152 : i32 to index
    %c0_79 = arith.constant 0 : index
    %c0_80 = arith.constant 0 : index
    %175 = vector.load %arg24[%174, %c0_79, %c0_80] : memref<5x8x32xf32, #tpu.memory_space<vmem>>, vector<1x8x32xf32>
    %176 = vector.shape_cast %175 : vector<1x8x32xf32> to vector<8x32xf32>
    %177 = arith.mulf %176, %172 : vector<8x32xf32>
    %178 = arith.mulf %173, %154 : vector<8x32xf32>
    %179 = arith.addf %177, %178 : vector<8x32xf32>
    %180 = arith.index_cast %152 : i32 to index
    %c0_81 = arith.constant 0 : index
    %c0_82 = arith.constant 0 : index
    %181 = vector.load %arg24[%180, %c0_81, %c0_82] : memref<5x8x32xf32, #tpu.memory_space<vmem>>, vector<1x8x32xf32>
    %182 = vector.shape_cast %181 : vector<1x8x32xf32> to vector<8x32xf32>
    %183 = vector.shape_cast %179 : vector<8x32xf32> to vector<1x8x32xf32>
    tpu.vector_store %arg24[%180, %c0_81, %c0_82], %183 {strides = array<i32>} : memref<5x8x32xf32, #tpu.memory_space<vmem>>, vector<1x8x32xf32>,
    %184 = arith.index_cast %152 : i32 to index
    %c0_83 = arith.constant 0 : index
    %c0_84 = arith.constant 0 : index
    %185 = vector.load %arg22[%184, %c0_83, %c0_84] : memref<5x8x4xf32, #tpu.memory_space<vmem>>, vector<1x8x4xf32>
    %186 = vector.shape_cast %185 : vector<1x8x4xf32> to vector<8x4xf32>
    %187 = vector.shape_cast %158 : vector<8x4xf32> to vector<1x8x4xf32>
    tpu.vector_store %arg22[%184, %c0_83, %c0_84], %187 {strides = array<i32>} : memref<5x8x4xf32, #tpu.memory_space<vmem>>, vector<1x8x4xf32>,
    %c1_i32_85 = arith.constant 1 : i32
    %188 = arith.addi %8, %c1_i32_85 : i32
    %189 = arith.index_cast %188 : i32 to index
    %190 = memref.load %arg3[%189] : memref<8xi32, #tpu.memory_space<smem>>
    %191 = vector.extract_strided_slice %148 {offsets = [8, 0], sizes = [8, 4], strides = [1, 1]} : vector<64x4xf32> to vector<8x4xf32>
    %192 = vector.extract_strided_slice %132 {offsets = [8, 0], sizes = [8, 32], strides = [1, 1]} : vector<64x32xf32> to vector<8x32xf32>
    %193 = arith.index_cast %190 : i32 to index
    %c0_86 = arith.constant 0 : index
    %c0_87 = arith.constant 0 : index
    %194 = vector.load %arg22[%193, %c0_86, %c0_87] : memref<5x8x4xf32, #tpu.memory_space<vmem>>, vector<1x8x4xf32>
    %195 = vector.shape_cast %194 : vector<1x8x4xf32> to vector<8x4xf32>
    %196 = arith.maximumf %195, %191 : vector<8x4xf32>
    %197 = arith.subf %195, %196 : vector<8x4xf32>
    %198 = math.exp %197 : vector<8x4xf32>
    %199 = arith.subf %191, %196 : vector<8x4xf32>
    %200 = math.exp %199 : vector<8x4xf32>
    %201 = arith.index_cast %190 : i32 to index
    %c0_88 = arith.constant 0 : index
    %c0_89 = arith.constant 0 : index
    %202 = vector.load %arg23[%201, %c0_88, %c0_89] : memref<5x8x4xf32, #tpu.memory_space<vmem>>, vector<1x8x4xf32>
    %203 = vector.shape_cast %202 : vector<1x8x4xf32> to vector<8x4xf32>
    %204 = arith.mulf %203, %198 : vector<8x4xf32>
    %205 = arith.addf %204, %200 : vector<8x4xf32>
    %206 = arith.index_cast %190 : i32 to index
    %c0_90 = arith.constant 0 : index
    %c0_91 = arith.constant 0 : index
    %207 = vector.load %arg23[%206, %c0_90, %c0_91] : memref<5x8x4xf32, #tpu.memory_space<vmem>>, vector<1x8x4xf32>
    %208 = vector.shape_cast %207 : vector<1x8x4xf32> to vector<8x4xf32>
    %209 = vector.shape_cast %205 : vector<8x4xf32> to vector<1x8x4xf32>
    tpu.vector_store %arg23[%206, %c0_90, %c0_91], %209 {strides = array<i32>} : memref<5x8x4xf32, #tpu.memory_space<vmem>>, vector<1x8x4xf32>,
    %cst_92 = arith.constant dense<0.000000e+00> : vector<8x32xf32>
    %210 = tpu.matmul %198, %149, %cst_92 {dimension_numbers = #tpu.dot_dimension_numbers<[1], [0], [0], [1], [0, 0, 1, 1], [], []>} : vector<8x4xf32>, vector<4x32xf32>, vector<8x32xf32> -> vector<8x32xf32>
    %cst_93 = arith.constant dense<0.000000e+00> : vector<8x32xf32>
    %211 = tpu.matmul %200, %149, %cst_93 {dimension_numbers = #tpu.dot_dimension_numbers<[1], [0], [0], [1], [0, 0, 1, 1], [], []>} : vector<8x4xf32>, vector<4x32xf32>, vector<8x32xf32> -> vector<8x32xf32>
    %212 = arith.index_cast %190 : i32 to index
    %c0_94 = arith.constant 0 : index
    %c0_95 = arith.constant 0 : index
    %213 = vector.load %arg24[%212, %c0_94, %c0_95] : memref<5x8x32xf32, #tpu.memory_space<vmem>>, vector<1x8x32xf32>
    %214 = vector.shape_cast %213 : vector<1x8x32xf32> to vector<8x32xf32>
    %215 = arith.mulf %214, %210 : vector<8x32xf32>
    %216 = arith.mulf %211, %192 : vector<8x32xf32>
    %217 = arith.addf %215, %216 : vector<8x32xf32>
    %218 = arith.index_cast %190 : i32 to index
    %c0_96 = arith.constant 0 : index
    %c0_97 = arith.constant 0 : index
    %219 = vector.load %arg24[%218, %c0_96, %c0_97] : memref<5x8x32xf32, #tpu.memory_space<vmem>>, vector<1x8x32xf32>
    %220 = vector.shape_cast %219 : vector<1x8x32xf32> to vector<8x32xf32>
    %221 = vector.shape_cast %217 : vector<8x32xf32> to vector<1x8x32xf32>
    tpu.vector_store %arg24[%218, %c0_96, %c0_97], %221 {strides = array<i32>} : memref<5x8x32xf32, #tpu.memory_space<vmem>>, vector<1x8x32xf32>,
    %222 = arith.index_cast %190 : i32 to index
    %c0_98 = arith.constant 0 : index
    %c0_99 = arith.constant 0 : index
    %223 = vector.load %arg22[%222, %c0_98, %c0_99] : memref<5x8x4xf32, #tpu.memory_space<vmem>>, vector<1x8x4xf32>
    %224 = vector.shape_cast %223 : vector<1x8x4xf32> to vector<8x4xf32>
    %225 = vector.shape_cast %196 : vector<8x4xf32> to vector<1x8x4xf32>
    tpu.vector_store %arg22[%222, %c0_98, %c0_99], %225 {strides = array<i32>} : memref<5x8x4xf32, #tpu.memory_space<vmem>>, vector<1x8x4xf32>,
    %c2_i32_100 = arith.constant 2 : i32
    %226 = arith.addi %8, %c2_i32_100 : i32
    %227 = arith.index_cast %226 : i32 to index
    %228 = memref.load %arg3[%227] : memref<8xi32, #tpu.memory_space<smem>>
    %229 = vector.extract_strided_slice %148 {offsets = [16, 0], sizes = [8, 4], strides = [1, 1]} : vector<64x4xf32> to vector<8x4xf32>
    %230 = vector.extract_strided_slice %132 {offsets = [16, 0], sizes = [8, 32], strides = [1, 1]} : vector<64x32xf32> to vector<8x32xf32>
    %231 = arith.index_cast %228 : i32 to index
    %c0_101 = arith.constant 0 : index
    %c0_102 = arith.constant 0 : index
    %232 = vector.load %arg22[%231, %c0_101, %c0_102] : memref<5x8x4xf32, #tpu.memory_space<vmem>>, vector<1x8x4xf32>
    %233 = vector.shape_cast %232 : vector<1x8x4xf32> to vector<8x4xf32>
    %234 = arith.maximumf %233, %229 : vector<8x4xf32>
    %235 = arith.subf %233, %234 : vector<8x4xf32>
    %236 = math.exp %235 : vector<8x4xf32>
    %237 = arith.subf %229, %234 : vector<8x4xf32>
    %238 = math.exp %237 : vector<8x4xf32>
    %239 = arith.index_cast %228 : i32 to index
    %c0_103 = arith.constant 0 : index
    %c0_104 = arith.constant 0 : index
    %240 = vector.load %arg23[%239, %c0_103, %c0_104] : memref<5x8x4xf32, #tpu.memory_space<vmem>>, vector<1x8x4xf32>
    %241 = vector.shape_cast %240 : vector<1x8x4xf32> to vector<8x4xf32>
    %242 = arith.mulf %241, %236 : vector<8x4xf32>
    %243 = arith.addf %242, %238 : vector<8x4xf32>
    %244 = arith.index_cast %228 : i32 to index
    %c0_105 = arith.constant 0 : index
    %c0_106 = arith.constant 0 : index
    %245 = vector.load %arg23[%244, %c0_105, %c0_106] : memref<5x8x4xf32, #tpu.memory_space<vmem>>, vector<1x8x4xf32>
    %246 = vector.shape_cast %245 : vector<1x8x4xf32> to vector<8x4xf32>
    %247 = vector.shape_cast %243 : vector<8x4xf32> to vector<1x8x4xf32>
    tpu.vector_store %arg23[%244, %c0_105, %c0_106], %247 {strides = array<i32>} : memref<5x8x4xf32, #tpu.memory_space<vmem>>, vector<1x8x4xf32>,
    %cst_107 = arith.constant dense<0.000000e+00> : vector<8x32xf32>
    %248 = tpu.matmul %236, %149, %cst_107 {dimension_numbers = #tpu.dot_dimension_numbers<[1], [0], [0], [1], [0, 0, 1, 1], [], []>} : vector<8x4xf32>, vector<4x32xf32>, vector<8x32xf32> -> vector<8x32xf32>
    %cst_108 = arith.constant dense<0.000000e+00> : vector<8x32xf32>
    %249 = tpu.matmul %238, %149, %cst_108 {dimension_numbers = #tpu.dot_dimension_numbers<[1], [0], [0], [1], [0, 0, 1, 1], [], []>} : vector<8x4xf32>, vector<4x32xf32>, vector<8x32xf32> -> vector<8x32xf32>
    %250 = arith.index_cast %228 : i32 to index
    %c0_109 = arith.constant 0 : index
    %c0_110 = arith.constant 0 : index
    %251 = vector.load %arg24[%250, %c0_109, %c0_110] : memref<5x8x32xf32, #tpu.memory_space<vmem>>, vector<1x8x32xf32>
    %252 = vector.shape_cast %251 : vector<1x8x32xf32> to vector<8x32xf32>
    %253 = arith.mulf %252, %248 : vector<8x32xf32>
    %254 = arith.mulf %249, %230 : vector<8x32xf32>
    %255 = arith.addf %253, %254 : vector<8x32xf32>
    %256 = arith.index_cast %228 : i32 to index
    %c0_111 = arith.constant 0 : index
    %c0_112 = arith.constant 0 : index
    %257 = vector.load %arg24[%256, %c0_111, %c0_112] : memref<5x8x32xf32, #tpu.memory_space<vmem>>, vector<1x8x32xf32>
    %258 = vector.shape_cast %257 : vector<1x8x32xf32> to vector<8x32xf32>
    %259 = vector.shape_cast %255 : vector<8x32xf32> to vector<1x8x32xf32>
    tpu.vector_store %arg24[%256, %c0_111, %c0_112], %259 {strides = array<i32>} : memref<5x8x32xf32, #tpu.memory_space<vmem>>, vector<1x8x32xf32>,
    %260 = arith.index_cast %228 : i32 to index
    %c0_113 = arith.constant 0 : index
    %c0_114 = arith.constant 0 : index
    %261 = vector.load %arg22[%260, %c0_113, %c0_114] : memref<5x8x4xf32, #tpu.memory_space<vmem>>, vector<1x8x4xf32>
    %262 = vector.shape_cast %261 : vector<1x8x4xf32> to vector<8x4xf32>
    %263 = vector.shape_cast %234 : vector<8x4xf32> to vector<1x8x4xf32>
    tpu.vector_store %arg22[%260, %c0_113, %c0_114], %263 {strides = array<i32>} : memref<5x8x4xf32, #tpu.memory_space<vmem>>, vector<1x8x4xf32>,
    %c3_i32_115 = arith.constant 3 : i32
    %264 = arith.addi %8, %c3_i32_115 : i32
    %265 = arith.index_cast %264 : i32 to index
    %266 = memref.load %arg3[%265] : memref<8xi32, #tpu.memory_space<smem>>
    %267 = vector.extract_strided_slice %148 {offsets = [24, 0], sizes = [8, 4], strides = [1, 1]} : vector<64x4xf32> to vector<8x4xf32>
    %268 = vector.extract_strided_slice %132 {offsets = [24, 0], sizes = [8, 32], strides = [1, 1]} : vector<64x32xf32> to vector<8x32xf32>
    %269 = arith.index_cast %266 : i32 to index
    %c0_116 = arith.constant 0 : index
    %c0_117 = arith.constant 0 : index
    %270 = vector.load %arg22[%269, %c0_116, %c0_117] : memref<5x8x4xf32, #tpu.memory_space<vmem>>, vector<1x8x4xf32>
    %271 = vector.shape_cast %270 : vector<1x8x4xf32> to vector<8x4xf32>
    %272 = arith.maximumf %271, %267 : vector<8x4xf32>
    %273 = arith.subf %271, %272 : vector<8x4xf32>
    %274 = math.exp %273 : vector<8x4xf32>
    %275 = arith.subf %267, %272 : vector<8x4xf32>
    %276 = math.exp %275 : vector<8x4xf32>
    %277 = arith.index_cast %266 : i32 to index
    %c0_118 = arith.constant 0 : index
    %c0_119 = arith.constant 0 : index
    %278 = vector.load %arg23[%277, %c0_118, %c0_119] : memref<5x8x4xf32, #tpu.memory_space<vmem>>, vector<1x8x4xf32>
    %279 = vector.shape_cast %278 : vector<1x8x4xf32> to vector<8x4xf32>
    %280 = arith.mulf %279, %274 : vector<8x4xf32>
    %281 = arith.addf %280, %276 : vector<8x4xf32>
    %282 = arith.index_cast %266 : i32 to index
    %c0_120 = arith.constant 0 : index
    %c0_121 = arith.constant 0 : index
    %283 = vector.load %arg23[%282, %c0_120, %c0_121] : memref<5x8x4xf32, #tpu.memory_space<vmem>>, vector<1x8x4xf32>
    %284 = vector.shape_cast %283 : vector<1x8x4xf32> to vector<8x4xf32>
    %285 = vector.shape_cast %281 : vector<8x4xf32> to vector<1x8x4xf32>
    tpu.vector_store %arg23[%282, %c0_120, %c0_121], %285 {strides = array<i32>} : memref<5x8x4xf32, #tpu.memory_space<vmem>>, vector<1x8x4xf32>,
    %cst_122 = arith.constant dense<0.000000e+00> : vector<8x32xf32>
    %286 = tpu.matmul %274, %149, %cst_122 {dimension_numbers = #tpu.dot_dimension_numbers<[1], [0], [0], [1], [0, 0, 1, 1], [], []>} : vector<8x4xf32>, vector<4x32xf32>, vector<8x32xf32> -> vector<8x32xf32>
    %cst_123 = arith.constant dense<0.000000e+00> : vector<8x32xf32>
    %287 = tpu.matmul %276, %149, %cst_123 {dimension_numbers = #tpu.dot_dimension_numbers<[1], [0], [0], [1], [0, 0, 1, 1], [], []>} : vector<8x4xf32>, vector<4x32xf32>, vector<8x32xf32> -> vector<8x32xf32>
    %288 = arith.index_cast %266 : i32 to index
    %c0_124 = arith.constant 0 : index
    %c0_125 = arith.constant 0 : index
    %289 = vector.load %arg24[%288, %c0_124, %c0_125] : memref<5x8x32xf32, #tpu.memory_space<vmem>>, vector<1x8x32xf32>
    %290 = vector.shape_cast %289 : vector<1x8x32xf32> to vector<8x32xf32>
    %291 = arith.mulf %290, %286 : vector<8x32xf32>
    %292 = arith.mulf %287, %268 : vector<8x32xf32>
    %293 = arith.addf %291, %292 : vector<8x32xf32>
    %294 = arith.index_cast %266 : i32 to index
    %c0_126 = arith.constant 0 : index
    %c0_127 = arith.constant 0 : index
    %295 = vector.load %arg24[%294, %c0_126, %c0_127] : memref<5x8x32xf32, #tpu.memory_space<vmem>>, vector<1x8x32xf32>
    %296 = vector.shape_cast %295 : vector<1x8x32xf32> to vector<8x32xf32>
    %297 = vector.shape_cast %293 : vector<8x32xf32> to vector<1x8x32xf32>
    tpu.vector_store %arg24[%294, %c0_126, %c0_127], %297 {strides = array<i32>} : memref<5x8x32xf32, #tpu.memory_space<vmem>>, vector<1x8x32xf32>,
    %298 = arith.index_cast %266 : i32 to index
    %c0_128 = arith.constant 0 : index
    %c0_129 = arith.constant 0 : index
    %299 = vector.load %arg22[%298, %c0_128, %c0_129] : memref<5x8x4xf32, #tpu.memory_space<vmem>>, vector<1x8x4xf32>
    %300 = vector.shape_cast %299 : vector<1x8x4xf32> to vector<8x4xf32>
    %301 = vector.shape_cast %272 : vector<8x4xf32> to vector<1x8x4xf32>
    tpu.vector_store %arg22[%298, %c0_128, %c0_129], %301 {strides = array<i32>} : memref<5x8x4xf32, #tpu.memory_space<vmem>>, vector<1x8x4xf32>,
    %c4_i32_130 = arith.constant 4 : i32
    %302 = arith.addi %8, %c4_i32_130 : i32
    %303 = arith.index_cast %302 : i32 to index
    %304 = memref.load %arg3[%303] : memref<8xi32, #tpu.memory_space<smem>>
    %305 = vector.extract_strided_slice %148 {offsets = [32, 0], sizes = [8, 4], strides = [1, 1]} : vector<64x4xf32> to vector<8x4xf32>
    %306 = vector.extract_strided_slice %132 {offsets = [32, 0], sizes = [8, 32], strides = [1, 1]} : vector<64x32xf32> to vector<8x32xf32>
    %307 = arith.index_cast %304 : i32 to index
    %c0_131 = arith.constant 0 : index
    %c0_132 = arith.constant 0 : index
    %308 = vector.load %arg22[%307, %c0_131, %c0_132] : memref<5x8x4xf32, #tpu.memory_space<vmem>>, vector<1x8x4xf32>
    %309 = vector.shape_cast %308 : vector<1x8x4xf32> to vector<8x4xf32>
    %310 = arith.maximumf %309, %305 : vector<8x4xf32>
    %311 = arith.subf %309, %310 : vector<8x4xf32>
    %312 = math.exp %311 : vector<8x4xf32>
    %313 = arith.subf %305, %310 : vector<8x4xf32>
    %314 = math.exp %313 : vector<8x4xf32>
    %315 = arith.index_cast %304 : i32 to index
    %c0_133 = arith.constant 0 : index
    %c0_134 = arith.constant 0 : index
    %316 = vector.load %arg23[%315, %c0_133, %c0_134] : memref<5x8x4xf32, #tpu.memory_space<vmem>>, vector<1x8x4xf32>
    %317 = vector.shape_cast %316 : vector<1x8x4xf32> to vector<8x4xf32>
    %318 = arith.mulf %317, %312 : vector<8x4xf32>
    %319 = arith.addf %318, %314 : vector<8x4xf32>
    %320 = arith.index_cast %304 : i32 to index
    %c0_135 = arith.constant 0 : index
    %c0_136 = arith.constant 0 : index
    %321 = vector.load %arg23[%320, %c0_135, %c0_136] : memref<5x8x4xf32, #tpu.memory_space<vmem>>, vector<1x8x4xf32>
    %322 = vector.shape_cast %321 : vector<1x8x4xf32> to vector<8x4xf32>
    %323 = vector.shape_cast %319 : vector<8x4xf32> to vector<1x8x4xf32>
    tpu.vector_store %arg23[%320, %c0_135, %c0_136], %323 {strides = array<i32>} : memref<5x8x4xf32, #tpu.memory_space<vmem>>, vector<1x8x4xf32>,
    %cst_137 = arith.constant dense<0.000000e+00> : vector<8x32xf32>
    %324 = tpu.matmul %312, %149, %cst_137 {dimension_numbers = #tpu.dot_dimension_numbers<[1], [0], [0], [1], [0, 0, 1, 1], [], []>} : vector<8x4xf32>, vector<4x32xf32>, vector<8x32xf32> -> vector<8x32xf32>
    %cst_138 = arith.constant dense<0.000000e+00> : vector<8x32xf32>
    %325 = tpu.matmul %314, %149, %cst_138 {dimension_numbers = #tpu.dot_dimension_numbers<[1], [0], [0], [1], [0, 0, 1, 1], [], []>} : vector<8x4xf32>, vector<4x32xf32>, vector<8x32xf32> -> vector<8x32xf32>
    %326 = arith.index_cast %304 : i32 to index
    %c0_139 = arith.constant 0 : index
    %c0_140 = arith.constant 0 : index
    %327 = vector.load %arg24[%326, %c0_139, %c0_140] : memref<5x8x32xf32, #tpu.memory_space<vmem>>, vector<1x8x32xf32>
    %328 = vector.shape_cast %327 : vector<1x8x32xf32> to vector<8x32xf32>
    %329 = arith.mulf %328, %324 : vector<8x32xf32>
    %330 = arith.mulf %325, %306 : vector<8x32xf32>
    %331 = arith.addf %329, %330 : vector<8x32xf32>
    %332 = arith.index_cast %304 : i32 to index
    %c0_141 = arith.constant 0 : index
    %c0_142 = arith.constant 0 : index
    %333 = vector.load %arg24[%332, %c0_141, %c0_142] : memref<5x8x32xf32, #tpu.memory_space<vmem>>, vector<1x8x32xf32>
    %334 = vector.shape_cast %333 : vector<1x8x32xf32> to vector<8x32xf32>
    %335 = vector.shape_cast %331 : vector<8x32xf32> to vector<1x8x32xf32>
    tpu.vector_store %arg24[%332, %c0_141, %c0_142], %335 {strides = array<i32>} : memref<5x8x32xf32, #tpu.memory_space<vmem>>, vector<1x8x32xf32>,
    %336 = arith.index_cast %304 : i32 to index
    %c0_143 = arith.constant 0 : index
    %c0_144 = arith.constant 0 : index
    %337 = vector.load %arg22[%336, %c0_143, %c0_144] : memref<5x8x4xf32, #tpu.memory_space<vmem>>, vector<1x8x4xf32>
    %338 = vector.shape_cast %337 : vector<1x8x4xf32> to vector<8x4xf32>
    %339 = vector.shape_cast %310 : vector<8x4xf32> to vector<1x8x4xf32>
    tpu.vector_store %arg22[%336, %c0_143, %c0_144], %339 {strides = array<i32>} : memref<5x8x4xf32, #tpu.memory_space<vmem>>, vector<1x8x4xf32>,
    %c5_i32_145 = arith.constant 5 : i32
    %340 = arith.addi %8, %c5_i32_145 : i32
    %341 = arith.index_cast %340 : i32 to index
    %342 = memref.load %arg3[%341] : memref<8xi32, #tpu.memory_space<smem>>
    %343 = vector.extract_strided_slice %148 {offsets = [40, 0], sizes = [8, 4], strides = [1, 1]} : vector<64x4xf32> to vector<8x4xf32>
    %344 = vector.extract_strided_slice %132 {offsets = [40, 0], sizes = [8, 32], strides = [1, 1]} : vector<64x32xf32> to vector<8x32xf32>
    %345 = arith.index_cast %342 : i32 to index
    %c0_146 = arith.constant 0 : index
    %c0_147 = arith.constant 0 : index
    %346 = vector.load %arg22[%345, %c0_146, %c0_147] : memref<5x8x4xf32, #tpu.memory_space<vmem>>, vector<1x8x4xf32>
    %347 = vector.shape_cast %346 : vector<1x8x4xf32> to vector<8x4xf32>
    %348 = arith.maximumf %347, %343 : vector<8x4xf32>
    %349 = arith.subf %347, %348 : vector<8x4xf32>
    %350 = math.exp %349 : vector<8x4xf32>
    %351 = arith.subf %343, %348 : vector<8x4xf32>
    %352 = math.exp %351 : vector<8x4xf32>
    %353 = arith.index_cast %342 : i32 to index
    %c0_148 = arith.constant 0 : index
    %c0_149 = arith.constant 0 : index
    %354 = vector.load %arg23[%353, %c0_148, %c0_149] : memref<5x8x4xf32, #tpu.memory_space<vmem>>, vector<1x8x4xf32>
    %355 = vector.shape_cast %354 : vector<1x8x4xf32> to vector<8x4xf32>
    %356 = arith.mulf %355, %350 : vector<8x4xf32>
    %357 = arith.addf %356, %352 : vector<8x4xf32>
    %358 = arith.index_cast %342 : i32 to index
    %c0_150 = arith.constant 0 : index
    %c0_151 = arith.constant 0 : index
    %359 = vector.load %arg23[%358, %c0_150, %c0_151] : memref<5x8x4xf32, #tpu.memory_space<vmem>>, vector<1x8x4xf32>
    %360 = vector.shape_cast %359 : vector<1x8x4xf32> to vector<8x4xf32>
    %361 = vector.shape_cast %357 : vector<8x4xf32> to vector<1x8x4xf32>
    tpu.vector_store %arg23[%358, %c0_150, %c0_151], %361 {strides = array<i32>} : memref<5x8x4xf32, #tpu.memory_space<vmem>>, vector<1x8x4xf32>,
    %cst_152 = arith.constant dense<0.000000e+00> : vector<8x32xf32>
    %362 = tpu.matmul %350, %149, %cst_152 {dimension_numbers = #tpu.dot_dimension_numbers<[1], [0], [0], [1], [0, 0, 1, 1], [], []>} : vector<8x4xf32>, vector<4x32xf32>, vector<8x32xf32> -> vector<8x32xf32>
    %cst_153 = arith.constant dense<0.000000e+00> : vector<8x32xf32>
    %363 = tpu.matmul %352, %149, %cst_153 {dimension_numbers = #tpu.dot_dimension_numbers<[1], [0], [0], [1], [0, 0, 1, 1], [], []>} : vector<8x4xf32>, vector<4x32xf32>, vector<8x32xf32> -> vector<8x32xf32>
    %364 = arith.index_cast %342 : i32 to index
    %c0_154 = arith.constant 0 : index
    %c0_155 = arith.constant 0 : index
    %365 = vector.load %arg24[%364, %c0_154, %c0_155] : memref<5x8x32xf32, #tpu.memory_space<vmem>>, vector<1x8x32xf32>
    %366 = vector.shape_cast %365 : vector<1x8x32xf32> to vector<8x32xf32>
    %367 = arith.mulf %366, %362 : vector<8x32xf32>
    %368 = arith.mulf %363, %344 : vector<8x32xf32>
    %369 = arith.addf %367, %368 : vector<8x32xf32>
    %370 = arith.index_cast %342 : i32 to index
    %c0_156 = arith.constant 0 : index
    %c0_157 = arith.constant 0 : index
    %371 = vector.load %arg24[%370, %c0_156, %c0_157] : memref<5x8x32xf32, #tpu.memory_space<vmem>>, vector<1x8x32xf32>
    %372 = vector.shape_cast %371 : vector<1x8x32xf32> to vector<8x32xf32>
    %373 = vector.shape_cast %369 : vector<8x32xf32> to vector<1x8x32xf32>
    tpu.vector_store %arg24[%370, %c0_156, %c0_157], %373 {strides = array<i32>} : memref<5x8x32xf32, #tpu.memory_space<vmem>>, vector<1x8x32xf32>,
    %374 = arith.index_cast %342 : i32 to index
    %c0_158 = arith.constant 0 : index
    %c0_159 = arith.constant 0 : index
    %375 = vector.load %arg22[%374, %c0_158, %c0_159] : memref<5x8x4xf32, #tpu.memory_space<vmem>>, vector<1x8x4xf32>
    %376 = vector.shape_cast %375 : vector<1x8x4xf32> to vector<8x4xf32>
    %377 = vector.shape_cast %348 : vector<8x4xf32> to vector<1x8x4xf32>
    tpu.vector_store %arg22[%374, %c0_158, %c0_159], %377 {strides = array<i32>} : memref<5x8x4xf32, #tpu.memory_space<vmem>>, vector<1x8x4xf32>,
    %c6_i32_160 = arith.constant 6 : i32
    %378 = arith.addi %8, %c6_i32_160 : i32
    %379 = arith.index_cast %378 : i32 to index
    %380 = memref.load %arg3[%379] : memref<8xi32, #tpu.memory_space<smem>>
    %381 = vector.extract_strided_slice %148 {offsets = [48, 0], sizes = [8, 4], strides = [1, 1]} : vector<64x4xf32> to vector<8x4xf32>
    %382 = vector.extract_strided_slice %132 {offsets = [48, 0], sizes = [8, 32], strides = [1, 1]} : vector<64x32xf32> to vector<8x32xf32>
    %383 = arith.index_cast %380 : i32 to index
    %c0_161 = arith.constant 0 : index
    %c0_162 = arith.constant 0 : index
    %384 = vector.load %arg22[%383, %c0_161, %c0_162] : memref<5x8x4xf32, #tpu.memory_space<vmem>>, vector<1x8x4xf32>
    %385 = vector.shape_cast %384 : vector<1x8x4xf32> to vector<8x4xf32>
    %386 = arith.maximumf %385, %381 : vector<8x4xf32>
    %387 = arith.subf %385, %386 : vector<8x4xf32>
    %388 = math.exp %387 : vector<8x4xf32>
    %389 = arith.subf %381, %386 : vector<8x4xf32>
    %390 = math.exp %389 : vector<8x4xf32>
    %391 = arith.index_cast %380 : i32 to index
    %c0_163 = arith.constant 0 : index
    %c0_164 = arith.constant 0 : index
    %392 = vector.load %arg23[%391, %c0_163, %c0_164] : memref<5x8x4xf32, #tpu.memory_space<vmem>>, vector<1x8x4xf32>
    %393 = vector.shape_cast %392 : vector<1x8x4xf32> to vector<8x4xf32>
    %394 = arith.mulf %393, %388 : vector<8x4xf32>
    %395 = arith.addf %394, %390 : vector<8x4xf32>
    %396 = arith.index_cast %380 : i32 to index
    %c0_165 = arith.constant 0 : index
    %c0_166 = arith.constant 0 : index
    %397 = vector.load %arg23[%396, %c0_165, %c0_166] : memref<5x8x4xf32, #tpu.memory_space<vmem>>, vector<1x8x4xf32>
    %398 = vector.shape_cast %397 : vector<1x8x4xf32> to vector<8x4xf32>
    %399 = vector.shape_cast %395 : vector<8x4xf32> to vector<1x8x4xf32>
    tpu.vector_store %arg23[%396, %c0_165, %c0_166], %399 {strides = array<i32>} : memref<5x8x4xf32, #tpu.memory_space<vmem>>, vector<1x8x4xf32>,
    %cst_167 = arith.constant dense<0.000000e+00> : vector<8x32xf32>
    %400 = tpu.matmul %388, %149, %cst_167 {dimension_numbers = #tpu.dot_dimension_numbers<[1], [0], [0], [1], [0, 0, 1, 1], [], []>} : vector<8x4xf32>, vector<4x32xf32>, vector<8x32xf32> -> vector<8x32xf32>
    %cst_168 = arith.constant dense<0.000000e+00> : vector<8x32xf32>
    %401 = tpu.matmul %390, %149, %cst_168 {dimension_numbers = #tpu.dot_dimension_numbers<[1], [0], [0], [1], [0, 0, 1, 1], [], []>} : vector<8x4xf32>, vector<4x32xf32>, vector<8x32xf32> -> vector<8x32xf32>
    %402 = arith.index_cast %380 : i32 to index
    %c0_169 = arith.constant 0 : index
    %c0_170 = arith.constant 0 : index
    %403 = vector.load %arg24[%402, %c0_169, %c0_170] : memref<5x8x32xf32, #tpu.memory_space<vmem>>, vector<1x8x32xf32>
    %404 = vector.shape_cast %403 : vector<1x8x32xf32> to vector<8x32xf32>
    %405 = arith.mulf %404, %400 : vector<8x32xf32>
    %406 = arith.mulf %401, %382 : vector<8x32xf32>
    %407 = arith.addf %405, %406 : vector<8x32xf32>
    %408 = arith.index_cast %380 : i32 to index
    %c0_171 = arith.constant 0 : index
    %c0_172 = arith.constant 0 : index
    %409 = vector.load %arg24[%408, %c0_171, %c0_172] : memref<5x8x32xf32, #tpu.memory_space<vmem>>, vector<1x8x32xf32>
    %410 = vector.shape_cast %409 : vector<1x8x32xf32> to vector<8x32xf32>
    %411 = vector.shape_cast %407 : vector<8x32xf32> to vector<1x8x32xf32>
    tpu.vector_store %arg24[%408, %c0_171, %c0_172], %411 {strides = array<i32>} : memref<5x8x32xf32, #tpu.memory_space<vmem>>, vector<1x8x32xf32>,
    %412 = arith.index_cast %380 : i32 to index
    %c0_173 = arith.constant 0 : index
    %c0_174 = arith.constant 0 : index
    %413 = vector.load %arg22[%412, %c0_173, %c0_174] : memref<5x8x4xf32, #tpu.memory_space<vmem>>, vector<1x8x4xf32>
    %414 = vector.shape_cast %413 : vector<1x8x4xf32> to vector<8x4xf32>
    %415 = vector.shape_cast %386 : vector<8x4xf32> to vector<1x8x4xf32>
    tpu.vector_store %arg22[%412, %c0_173, %c0_174], %415 {strides = array<i32>} : memref<5x8x4xf32, #tpu.memory_space<vmem>>, vector<1x8x4xf32>,
    %c7_i32_175 = arith.constant 7 : i32
    %416 = arith.addi %8, %c7_i32_175 : i32
    %417 = arith.index_cast %416 : i32 to index
    %418 = memref.load %arg3[%417] : memref<8xi32, #tpu.memory_space<smem>>
    %419 = vector.extract_strided_slice %148 {offsets = [56, 0], sizes = [8, 4], strides = [1, 1]} : vector<64x4xf32> to vector<8x4xf32>
    %420 = vector.extract_strided_slice %132 {offsets = [56, 0], sizes = [8, 32], strides = [1, 1]} : vector<64x32xf32> to vector<8x32xf32>
    %421 = arith.index_cast %418 : i32 to index
    %c0_176 = arith.constant 0 : index
    %c0_177 = arith.constant 0 : index
    %422 = vector.load %arg22[%421, %c0_176, %c0_177] : memref<5x8x4xf32, #tpu.memory_space<vmem>>, vector<1x8x4xf32>
    %423 = vector.shape_cast %422 : vector<1x8x4xf32> to vector<8x4xf32>
    %424 = arith.maximumf %423, %419 : vector<8x4xf32>
    %425 = arith.subf %423, %424 : vector<8x4xf32>
    %426 = math.exp %425 : vector<8x4xf32>
    %427 = arith.subf %419, %424 : vector<8x4xf32>
    %428 = math.exp %427 : vector<8x4xf32>
    %429 = arith.index_cast %418 : i32 to index
    %c0_178 = arith.constant 0 : index
    %c0_179 = arith.constant 0 : index
    %430 = vector.load %arg23[%429, %c0_178, %c0_179] : memref<5x8x4xf32, #tpu.memory_space<vmem>>, vector<1x8x4xf32>
    %431 = vector.shape_cast %430 : vector<1x8x4xf32> to vector<8x4xf32>
    %432 = arith.mulf %431, %426 : vector<8x4xf32>
    %433 = arith.addf %432, %428 : vector<8x4xf32>
    %434 = arith.index_cast %418 : i32 to index
    %c0_180 = arith.constant 0 : index
    %c0_181 = arith.constant 0 : index
    %435 = vector.load %arg23[%434, %c0_180, %c0_181] : memref<5x8x4xf32, #tpu.memory_space<vmem>>, vector<1x8x4xf32>
    %436 = vector.shape_cast %435 : vector<1x8x4xf32> to vector<8x4xf32>
    %437 = vector.shape_cast %433 : vector<8x4xf32> to vector<1x8x4xf32>
    tpu.vector_store %arg23[%434, %c0_180, %c0_181], %437 {strides = array<i32>} : memref<5x8x4xf32, #tpu.memory_space<vmem>>, vector<1x8x4xf32>,
    %cst_182 = arith.constant dense<0.000000e+00> : vector<8x32xf32>
    %438 = tpu.matmul %426, %149, %cst_182 {dimension_numbers = #tpu.dot_dimension_numbers<[1], [0], [0], [1], [0, 0, 1, 1], [], []>} : vector<8x4xf32>, vector<4x32xf32>, vector<8x32xf32> -> vector<8x32xf32>
    %cst_183 = arith.constant dense<0.000000e+00> : vector<8x32xf32>
    %439 = tpu.matmul %428, %149, %cst_183 {dimension_numbers = #tpu.dot_dimension_numbers<[1], [0], [0], [1], [0, 0, 1, 1], [], []>} : vector<8x4xf32>, vector<4x32xf32>, vector<8x32xf32> -> vector<8x32xf32>
    %440 = arith.index_cast %418 : i32 to index
    %c0_184 = arith.constant 0 : index
    %c0_185 = arith.constant 0 : index
    %441 = vector.load %arg24[%440, %c0_184, %c0_185] : memref<5x8x32xf32, #tpu.memory_space<vmem>>, vector<1x8x32xf32>
    %442 = vector.shape_cast %441 : vector<1x8x32xf32> to vector<8x32xf32>
    %443 = arith.mulf %442, %438 : vector<8x32xf32>
    %444 = arith.mulf %439, %420 : vector<8x32xf32>
    %445 = arith.addf %443, %444 : vector<8x32xf32>
    %446 = arith.index_cast %418 : i32 to index
    %c0_186 = arith.constant 0 : index
    %c0_187 = arith.constant 0 : index
    %447 = vector.load %arg24[%446, %c0_186, %c0_187] : memref<5x8x32xf32, #tpu.memory_space<vmem>>, vector<1x8x32xf32>
    %448 = vector.shape_cast %447 : vector<1x8x32xf32> to vector<8x32xf32>
    %449 = vector.shape_cast %445 : vector<8x32xf32> to vector<1x8x32xf32>
    tpu.vector_store %arg24[%446, %c0_186, %c0_187], %449 {strides = array<i32>} : memref<5x8x32xf32, #tpu.memory_space<vmem>>, vector<1x8x32xf32>,
    %450 = arith.index_cast %418 : i32 to index
    %c0_188 = arith.constant 0 : index
    %c0_189 = arith.constant 0 : index
    %451 = vector.load %arg22[%450, %c0_188, %c0_189] : memref<5x8x4xf32, #tpu.memory_space<vmem>>, vector<1x8x4xf32>
    %452 = vector.shape_cast %451 : vector<1x8x4xf32> to vector<8x4xf32>
    %453 = vector.shape_cast %424 : vector<8x4xf32> to vector<1x8x4xf32>
    tpu.vector_store %arg22[%450, %c0_188, %c0_189], %453 {strides = array<i32>} : memref<5x8x4xf32, #tpu.memory_space<vmem>>, vector<1x8x4xf32>,
    %c0_i32_190 = arith.constant 0 : i32
    %454 = arith.cmpi eq, %arg1, %c0_i32_190 : i32
    %455 = arith.extui %454 : i1 to i32
    %c0_i32_191 = arith.constant 0 : i32
    %456 = arith.cmpi ne, %455, %c0_i32_191 : i32
    scf.if %456 {
      %c0_192 = arith.constant 0 : index
      %c0_193 = arith.constant 0 : index
      %c0_194 = arith.constant 0 : index
      %457 = vector.load %arg23[%c0_192, %c0_193, %c0_194] : memref<5x8x4xf32, #tpu.memory_space<vmem>>, vector<4x8x4xf32>
      %458 = vector.shape_cast %457 : vector<4x8x4xf32> to vector<32x4xf32>
      %cst_195 = arith.constant 0.000000e+00 : f32
      %459 = vector.broadcast %cst_195 : f32 to vector<32x4xf32>
      %460 = arith.cmpf ogt, %458, %459 : vector<32x4xf32>
      %cst_196 = arith.constant 1.000000e+00 : f32
      %461 = vector.broadcast %cst_196 : f32 to vector<32x4xf32>
      %462 = arith.select %460, %458, %461 : vector<32x4xi1>, vector<32x4xf32>
      %463 = tpu.reciprocal %462 {approx = true} : vector<32x4xf32> -> vector<32x4xf32>
      %cst_197 = arith.constant dense<0.000000e+00> : vector<32x32xf32>
      %464 = tpu.matmul %463, %149, %cst_197 {dimension_numbers = #tpu.dot_dimension_numbers<[1], [0], [0], [1], [0, 0, 1, 1], [], []>} : vector<32x4xf32>, vector<4x32xf32>, vector<32x32xf32> -> vector<32x32xf32>
      %c0_198 = arith.constant 0 : index
      %c0_199 = arith.constant 0 : index
      %c0_200 = arith.constant 0 : index
      %465 = vector.load %arg24[%c0_198, %c0_199, %c0_200] : memref<5x8x32xf32, #tpu.memory_space<vmem>>, vector<4x8x32xf32>
      %466 = vector.shape_cast %465 : vector<4x8x32xf32> to vector<32x32xf32>
      %467 = arith.mulf %466, %464 : vector<32x32xf32>
      %c0_201 = arith.constant 0 : index
      %c0_202 = arith.constant 0 : index
      %c0_203 = arith.constant 0 : index
      %468 = vector.load %arg16[%c0_201, %c0_202, %c0_203] : memref<1x32x32xf32, #tpu.memory_space<vmem>>, vector<1x32x32xf32>
      %469 = vector.shape_cast %468 : vector<1x32x32xf32> to vector<32x32xf32>
      %cst_204 = arith.constant dense<0.000000e+00> : vector<32x32xf32>
      %470 = tpu.matmul %467, %469, %cst_204 {dimension_numbers = #tpu.dot_dimension_numbers<[1], [0], [0], [1], [0, 0, 1, 1], [], []>} : vector<32x32xf32>, vector<32x32xf32>, vector<32x32xf32> -> vector<32x32xf32>
      %c0_205 = arith.constant 0 : index
      %c0_206 = arith.constant 0 : index
      %c0_207 = arith.constant 0 : index
      %471 = vector.load %arg20[%c0_205, %c0_206, %c0_207] : memref<4x8x32xf32, #tpu.memory_space<vmem>>, vector<4x8x32xf32>
      %472 = vector.shape_cast %471 : vector<4x8x32xf32> to vector<32x32xf32>
      %473 = arith.addf %472, %470 : vector<32x32xf32>
      %c0_208 = arith.constant 0 : index
      %c0_209 = arith.constant 0 : index
      %c0_210 = arith.constant 0 : index
      %474 = vector.load %arg13[%c0_208, %c0_209, %c0_210] : memref<1x1x32xf32, #tpu.memory_space<vmem>>, vector<1x1x32xf32>
      %475 = vector.shape_cast %474 : vector<1x1x32xf32> to vector<1x32xf32>
      %476 = arith.mulf %473, %473 : vector<32x32xf32>
      %cst_211 = arith.constant dense<0.000000e+00> : vector<32xf32>
      %477 = vector.multi_reduction <add>, %476, %cst_211 [1] : vector<32x32xf32> to vector<32xf32>
      %478 = vector.shape_cast %477 : vector<32xf32> to vector<32x1xf32>
      %cst_212 = arith.constant 3.200000e+01 : f32
      %479 = vector.broadcast %cst_212 : f32 to vector<32x1xf32>
      %480 = arith.divf %478, %479 : vector<32x1xf32>
      %cst_213 = arith.constant 9.99999997E-7 : f32
      %481 = vector.broadcast %cst_213 : f32 to vector<32x1xf32>
      %482 = arith.addf %480, %481 : vector<32x1xf32>
      %483 = math.rsqrt %482 : vector<32x1xf32>
      %484 = vector.broadcast %483 : vector<32x1xf32> to vector<32x32xf32>
      %485 = arith.mulf %473, %484 : vector<32x32xf32>
      %486 = vector.broadcast %475 : vector<1x32xf32> to vector<32x32xf32>
      %487 = arith.mulf %485, %486 : vector<32x32xf32>
      %c0_214 = arith.constant 0 : index
      %c0_215 = arith.constant 0 : index
      %c0_216 = arith.constant 0 : index
      %488 = vector.load %arg17[%c0_214, %c0_215, %c0_216] : memref<1x32x128xf32, #tpu.memory_space<vmem>>, vector<1x32x128xf32>
      %489 = vector.shape_cast %488 : vector<1x32x128xf32> to vector<32x128xf32>
      %cst_217 = arith.constant dense<0.000000e+00> : vector<32x128xf32>
      %490 = tpu.matmul %487, %489, %cst_217 {dimension_numbers = #tpu.dot_dimension_numbers<[1], [0], [0], [1], [0, 0, 1, 1], [], []>} : vector<32x32xf32>, vector<32x128xf32>, vector<32x128xf32> -> vector<32x128xf32>
      %491 = vector.extract_strided_slice %490 {offsets = [0, 0], sizes = [32, 64], strides = [1, 1]} : vector<32x128xf32> to vector<32x64xf32>
      %492 = arith.negf %491 : vector<32x64xf32>
      %493 = math.exp %492 : vector<32x64xf32>
      %cst_218 = arith.constant 1.000000e+00 : f32
      %494 = vector.broadcast %cst_218 : f32 to vector<32x64xf32>
      %495 = arith.addf %494, %493 : vector<32x64xf32>
      %496 = arith.divf %494, %495 : vector<32x64xf32>
      %497 = arith.mulf %491, %496 : vector<32x64xf32>
      %498 = vector.extract_strided_slice %490 {offsets = [0, 64], sizes = [32, 64], strides = [1, 1]} : vector<32x128xf32> to vector<32x64xf32>
      %499 = arith.mulf %497, %498 : vector<32x64xf32>
      %c0_219 = arith.constant 0 : index
      %c0_220 = arith.constant 0 : index
      %c0_221 = arith.constant 0 : index
      %500 = vector.load %arg18[%c0_219, %c0_220, %c0_221] : memref<1x64x32xf32, #tpu.memory_space<vmem>>, vector<1x64x32xf32>
      %501 = vector.shape_cast %500 : vector<1x64x32xf32> to vector<64x32xf32>
      %cst_222 = arith.constant dense<0.000000e+00> : vector<32x32xf32>
      %502 = tpu.matmul %499, %501, %cst_222 {dimension_numbers = #tpu.dot_dimension_numbers<[1], [0], [0], [1], [0, 0, 1, 1], [], []>} : vector<32x64xf32>, vector<64x32xf32>, vector<32x32xf32> -> vector<32x32xf32>
      %503 = arith.addf %473, %502 : vector<32x32xf32>
      %504 = vector.shape_cast %503 : vector<32x32xf32> to vector<4x8x32xf32>
      %c0_223 = arith.constant 0 : index
      %c0_224 = arith.constant 0 : index
      %c0_225 = arith.constant 0 : index
      %505 = vector.load %arg20[%c0_223, %c0_224, %c0_225] : memref<4x8x32xf32, #tpu.memory_space<vmem>>, vector<4x8x32xf32>
      tpu.vector_store %arg20[%c0_223, %c0_224, %c0_225], %504 {strides = array<i32>} : memref<4x8x32xf32, #tpu.memory_space<vmem>>, vector<4x8x32xf32>,
      %c0_226 = arith.constant 0 : index
      %c0_227 = arith.constant 0 : index
      %c0_228 = arith.constant 0 : index
      %506 = vector.load %arg19[%c0_226, %c0_227, %c0_228] : memref<4x8x32xf32, #tpu.memory_space<vmem>>, vector<4x8x32xf32>
      tpu.vector_store %arg19[%c0_226, %c0_227, %c0_228], %504 {strides = array<i32>} : memref<4x8x32xf32, #tpu.memory_space<vmem>>, vector<4x8x32xf32>,
    } else {
    }
    return
  }
  func.func @transform_0(%arg0: i32, %arg1: i32, %arg2: memref<8xi32, #tpu.memory_space<smem>>, %arg3: memref<8xi32, #tpu.memory_space<smem>>) -> (i32, i32, i32) {
    %c0_i32 = arith.constant 0 : i32
    %c0_i32_0 = arith.constant 0 : i32
    %c0_i32_1 = arith.constant 0 : i32
    %c0_i32_2 = arith.constant 0 : i32
    return %c0_i32, %c0_i32_0, %c0_i32_1 : i32, i32, i32
  }
  func.func @transform_1(%arg0: i32, %arg1: i32, %arg2: memref<8xi32, #tpu.memory_space<smem>>, %arg3: memref<8xi32, #tpu.memory_space<smem>>) -> (i32, i32, i32) {
    %c0_i32 = arith.constant 0 : i32
    %c0_i32_0 = arith.constant 0 : i32
    %c0_i32_1 = arith.constant 0 : i32
    return %arg1, %c0_i32, %c0_i32_0 : i32, i32, i32
  }
  func.func @transform_2(%arg0: i32, %arg1: i32, %arg2: memref<8xi32, #tpu.memory_space<smem>>, %arg3: memref<8xi32, #tpu.memory_space<smem>>) -> (i32, i32) {
    %c0_i32 = arith.constant 0 : i32
    %c0_i32_0 = arith.constant 0 : i32
    %c0_i32_1 = arith.constant 0 : i32
    return %c0_i32, %c0_i32_0 : i32, i32
  }
  func.func @transform_3(%arg0: i32, %arg1: i32, %arg2: memref<8xi32, #tpu.memory_space<smem>>, %arg3: memref<8xi32, #tpu.memory_space<smem>>) -> (i32, i32) {
    %c0_i32 = arith.constant 0 : i32
    %c0_i32_0 = arith.constant 0 : i32
    %c0_i32_1 = arith.constant 0 : i32
    return %c0_i32, %c0_i32_0 : i32, i32
  }
  func.func @transform_4(%arg0: i32, %arg1: i32, %arg2: memref<8xi32, #tpu.memory_space<smem>>, %arg3: memref<8xi32, #tpu.memory_space<smem>>) -> (i32, i32) {
    %c0_i32 = arith.constant 0 : i32
    %c0_i32_0 = arith.constant 0 : i32
    %c0_i32_1 = arith.constant 0 : i32
    return %c0_i32, %c0_i32_0 : i32, i32
  }
  func.func @transform_5(%arg0: i32, %arg1: i32, %arg2: memref<8xi32, #tpu.memory_space<smem>>, %arg3: memref<8xi32, #tpu.memory_space<smem>>) -> (i32, i32) {
    %c0_i32 = arith.constant 0 : i32
    %c0_i32_0 = arith.constant 0 : i32
    %c0_i32_1 = arith.constant 0 : i32
    return %c0_i32, %c0_i32_0 : i32, i32
  }
  func.func @transform_6(%arg0: i32, %arg1: i32, %arg2: memref<8xi32, #tpu.memory_space<smem>>, %arg3: memref<8xi32, #tpu.memory_space<smem>>) -> (i32, i32) {
    %c0_i32 = arith.constant 0 : i32
    %c0_i32_0 = arith.constant 0 : i32
    %c0_i32_1 = arith.constant 0 : i32
    return %c0_i32, %c0_i32_0 : i32, i32
  }
  func.func @transform_7(%arg0: i32, %arg1: i32, %arg2: memref<8xi32, #tpu.memory_space<smem>>, %arg3: memref<8xi32, #tpu.memory_space<smem>>) -> (i32, i32, i32) {
    %c0_i32 = arith.constant 0 : i32
    %c0_i32_0 = arith.constant 0 : i32
    %c0_i32_1 = arith.constant 0 : i32
    return %arg0, %c0_i32, %c0_i32_0 : i32, i32, i32
  }
  func.func @transform_8(%arg0: i32, %arg1: i32, %arg2: memref<8xi32, #tpu.memory_space<smem>>, %arg3: memref<8xi32, #tpu.memory_space<smem>>) -> (i32, i32, i32) {
    %c0_i32 = arith.constant 0 : i32
    %c0_i32_0 = arith.constant 0 : i32
    %c0_i32_1 = arith.constant 0 : i32
    return %arg0, %c0_i32, %c0_i32_0 : i32, i32, i32
  }
  func.func @transform_9(%arg0: i32, %arg1: i32, %arg2: memref<8xi32, #tpu.memory_space<smem>>, %arg3: memref<8xi32, #tpu.memory_space<smem>>) -> (i32, i32, i32) {
    %c0_i32 = arith.constant 0 : i32
    %c0_i32_0 = arith.constant 0 : i32
    %c0_i32_1 = arith.constant 0 : i32
    return %arg0, %c0_i32, %c0_i32_0 : i32, i32, i32
  }
  func.func @transform_10(%arg0: i32, %arg1: i32, %arg2: memref<8xi32, #tpu.memory_space<smem>>, %arg3: memref<8xi32, #tpu.memory_space<smem>>) -> (i32, i32, i32) {
    %c0_i32 = arith.constant 0 : i32
    %c0_i32_0 = arith.constant 0 : i32
    %c0_i32_1 = arith.constant 0 : i32
    return %arg0, %c0_i32, %c0_i32_0 : i32, i32, i32
  }
  func.func @transform_11(%arg0: i32, %arg1: i32, %arg2: memref<8xi32, #tpu.memory_space<smem>>, %arg3: memref<8xi32, #tpu.memory_space<smem>>) -> (i32, i32, i32) {
    %c0_i32 = arith.constant 0 : i32
    %c0_i32_0 = arith.constant 0 : i32
    %c0_i32_1 = arith.constant 0 : i32
    return %arg0, %c0_i32, %c0_i32_0 : i32, i32, i32
  }
  func.func @transform_12(%arg0: i32, %arg1: i32, %arg2: memref<8xi32, #tpu.memory_space<smem>>, %arg3: memref<8xi32, #tpu.memory_space<smem>>) -> (i32, i32, i32) {
    %c0_i32 = arith.constant 0 : i32
    %c0_i32_0 = arith.constant 0 : i32
    %c0_i32_1 = arith.constant 0 : i32
    return %arg0, %c0_i32, %c0_i32_0 : i32, i32, i32
  }
  func.func @transform_13(%arg0: i32, %arg1: i32, %arg2: memref<8xi32, #tpu.memory_space<smem>>, %arg3: memref<8xi32, #tpu.memory_space<smem>>) -> (i32, i32, i32) {
    %c0_i32 = arith.constant 0 : i32
    %c0_i32_0 = arith.constant 0 : i32
    %c0_i32_1 = arith.constant 0 : i32
    return %arg0, %c0_i32, %c0_i32_0 : i32, i32, i32
  }
  func.func @transform_14(%arg0: i32, %arg1: i32, %arg2: memref<8xi32, #tpu.memory_space<smem>>, %arg3: memref<8xi32, #tpu.memory_space<smem>>) -> (i32, i32, i32) {
    %c0_i32 = arith.constant 0 : i32
    %c0_i32_0 = arith.constant 0 : i32
    %c0_i32_1 = arith.constant 0 : i32
    return %arg0, %c0_i32, %c0_i32_0 : i32, i32, i32
  }
  func.func @transform_15(%arg0: i32, %arg1: i32, %arg2: memref<8xi32, #tpu.memory_space<smem>>, %arg3: memref<8xi32, #tpu.memory_space<smem>>) -> (i32, i32, i32) {
    %c0_i32 = arith.constant 0 : i32
    %c0_i32_0 = arith.constant 0 : i32
    %c0_i32_1 = arith.constant 0 : i32
    %c0_i32_2 = arith.constant 0 : i32
    return %c0_i32, %c0_i32_0, %c0_i32_1 : i32, i32, i32
  }
}

</mosaic_0001>

<bundles_post_ra>
// kernel: tpu_custom_call.1
= control target key start
LH: loop header
LB: loop body
LE: loop exit
PB: predicated region body
PF: predicated region fallthrough
CT: control target
= control target key end

     0   :  { %s4768_s24 = smov [#allocation8]   ;;  %s4769_s27 = smov [#allocation9]   ;;  %s5721_s0 = inlined_call_operand.hbm [shape: s32[8], index: 0, kind: input, shape index: {}]   ;;  %s5722_s2 = inlined_call_operand.hbm [shape: f32[4,8,32], index: 2, kind: input, shape index: {}]   ;;  %s5723_s3 = inlined_call_operand.vmem [shape: f32[8,8,32], index: 3, kind: input, shape index: {}]   ;;  %s5724_s4 = inlined_call_operand.vmem [shape: f32[64,32], index: 4, kind: input, shape index: {}]   ;;  %s5725_s5 = inlined_call_operand.vmem [shape: f32[64,32], index: 5, kind: input, shape index: {}]   ;;  %s5726_s6 = inlined_call_operand.hbm [shape: f32[32,32], index: 6, kind: input, shape index: {}]   ;;  %s5727_s7 = inlined_call_operand.vmem [shape: f32[32,4], index: 7, kind: input, shape index: {}]   ;;  %s5728_s8 = inlined_call_operand.vmem [shape: f32[4,32], index: 8, kind: input, shape index: {}]   ;;  %s5729_s9 = inlined_call_operand.vmem [shape: f32[2,1,32], index: 9, kind: input, shape index: {}]   ;;  %s5730_s10 = inlined_call_operand.vmem [shape: f32[2,1,32], index: 10, kind: input, shape index: {}]   ;;  %s5731_s11 = inlined_call_operand.vmem [shape: f32[2,1,32], index: 11, kind: input, shape index: {}]   ;;  %s5732_s12 = inlined_call_operand.vmem [shape: f32[2,32,96], index: 12, kind: input, shape index: {}]   ;;  %s5733_s13 = inlined_call_operand.vmem [shape: f32[2,32,64], index: 13, kind: input, shape index: {}]   ;;  %s5734_s14 = inlined_call_operand.vmem [shape: f32[2,32,32], index: 14, kind: input, shape index: {}]   ;;  %s5735_s15 = inlined_call_operand.vmem [shape: f32[2,32,128], index: 15, kind: input, shape index: {}]   ;;  %s5736_s16 = inlined_call_operand.vmem [shape: f32[2,64,32], index: 16, kind: input, shape index: {}]   ;;  %s5737_s17 = inlined_call_operand.hbm [shape: f32[4,8,32], index: 17, kind: output, shape index: {}]   ;;  %s5738_s1 = inlined_call_operand.hbm [shape: s32[8], index: 1, kind: input, shape index: {}]  }
   0x1   :  { %5742 = sst [smem:[#allocation21_spill]] %s5721_s0 }
   0x2   :  { %5743 = sst [smem:[#allocation22_spill]] %s5722_s2 }
   0x3   :  { %5744 = sst [smem:[#allocation23_spill]] %s5723_s3 }
   0x4   :  { %5745 = sst [smem:[#allocation24_spill]] %s5726_s6 }
   0x5   :  { %5746 = sst [smem:[#allocation25_spill]] %s5728_s8 }
   0x6   :  { %5747 = sst [smem:[#allocation26_spill]] %s5729_s9 }
   0x7   :  { %5748 = sst [smem:[#allocation27_spill]] %s5730_s10 }
   0x8   :  { %5749 = sst [smem:[#allocation28_spill]] %s5732_s12 }
   0x9   :  { %5750 = sst [smem:[#allocation29_spill]] %s5733_s13 }
   0xa   :  { %5751 = sst [smem:[#allocation30_spill]] %s5734_s14 }
   0xb   :  { %5752 = sst [smem:[#allocation31_spill]] %s5735_s15 }
   0xc   :  { %5753 = sst [smem:[#allocation32_spill]] %s5736_s16 }
   0xd   :  { %s5754_s8 = sld [smem:[#allocation21_spill]] }
  0x13   :  { %23 = dma.hbm_to_smem %s5754_s8, 16, %s4768_s24, [#allocation7] }
  0x14   :  { %25 = dma.hbm_to_smem %s5738_s1, 16, %s4769_s27, [#allocation7] }
  0x15   :  { %4742 = dma.done.wait [#allocation7], 32 }
  0x16   :  { %4743 = vsyncadd [#allocation7], 4294967264 }
  0x17   :  { %27 = sfence }
  0x18   :  { %28 = vsyncpa [#allocation11], 0 }
  0x19   :  { %29 = vsyncpa [#allocation14], 0 }
  0x1a   :  { %30 = vsyncpa [#allocation12], 0  ;;  %s4879_s0 = smov 0   ;;  %s4881_s30 = smov 0  }
  0x1b   :  { %s4883_s18 = smov 0  }
  0x1c LB: > { %s5739_s1 = sadd.s32 4294967295, %s4766_s18   ;;  %s48_s8 = sadd.s32 1, %s4762_s30  ;;  %s4766_s18 = sphi %s4883_s18, %s36_s18   ;;  %s4762_s30 = sphi %s4881_s30, %s5780_s30   ;;  %s4758_s0 = sphi %s4879_s0, %s5779_s0  }
  0x1d   : > { %p50_p0 = scmp.ge.s32.totalorder %s48_s8, 2  ;;  %p3960_p1 = scmp.ge.s32.totalorder %s4766_s18, 1 }
  0x1e   : > { %p434_p2 = scmp.lt.s32.totalorder %s4766_s18, 3  ;;  %p4906_p4 = scmp.eq.s32.totalorder %s5739_s1, 0 }
  0x1f   : > { %s5782_s8 = smov (%p50_p0, %s48_s8), 0  ;;  %s4770_s20 = smov [#allocation10]  }
  0x20   : > { %5755 = sst [smem:[#allocation20_spill]] %s5782_s8  ;;  %p4900_p3 = pnand %p3960_p1, %p434_p2 }
  0x21   : > { %s446_s21 = sshll.u32 %s4770_s20, 4  ;;  %s4771_s23 = smov [#allocation13]   ;;  %s447_s21 = int_to_ptr.vmem [resolvable:$true] %s446_s21 }
  0x22   : > { %p4498_p5 = pneg %p4900_p3  ;;  %s474_s24 = sshll.u32 %s4771_s23, 4  ;;  %s475_s24 = int_to_ptr.vmem [resolvable:$true] %s474_s24 }
  0x23   : > { %s4665_s25 = scalar_lea.vmem %s447_s21, 512  ;;  %p4673_p11 = scmp.lt.s32.totalorder %s447_s21, %s447_s21 }
  0x24   : > { %p4914_p6 = pnand %p4906_p4, %p4498_p5  ;;  %p4666_p8 = scmp.ne.s32.totalorder %s447_s21, %s4665_s25 }
  0x25   : > { %p4674_p12 = scmp.lt.s32.totalorder %s4665_s25, %s4665_s25 }
  0x26   : > { %p4656_p7 = pneg %p4914_p6 }
  0x27   : > { %p4675_p13 = por %p4674_p12, %p4673_p11 }
  0x28   : > { %p4668_p9 = pnand %p4666_p8, %p4656_p7 }
  0x2a   : > { %p4669_p10 = pneg %p4668_p9 }
  0x2c   : > { %p4676_p0 = pnand %p4675_p13, %p4669_p10 }
  0x2e   : > { %4679 = shalt.err (!%p4676_p0)
}
  0x2f   : > { %s4772_s26 = smov 128   ;;  %s4773_s27 = smov 8  }
  0x30   : > { %s5759_s20 = sld [smem:[#allocation22_spill]]  ;;  %s4691_s23 = scalar_lea.vmem %s475_s24, 512 }
  0x31   : > { %p4692_p1 = scmp.ne.s32.totalorder %s475_s24, %s4691_s23  ;;  %p4699_p8 = scmp.lt.s32.totalorder %s475_s24, %s475_s24 }
  0x32   : > { %p4700_p9 = scmp.lt.s32.totalorder %s4691_s23, %s4691_s23 }
  0x33   : > { %p4694_p2 = pnand %p4692_p1, %p4656_p7 }
  0x34   : > { %p4701_p11 = por %p4700_p9, %p4699_p8 }
  0x35   : > { %p4695_p5 = pneg %p4694_p2 }
  0x36   : > { %4501 = dma.hbm_to_vmem [thread:$0]  (!%p4914_p6), %s5759_s20, 512, %s447_s21, [#allocation11], %s4772_s26, %s4772_s26, %s4773_s27  }
  0x37   : > { %p4702_p10 = pnand %p4701_p11, %p4695_p5 }
  0x39   : > { %4705 = shalt.err (!%p4702_p10)
}
  0x3a   : > { %s5760_s6 = sld [smem:[#allocation24_spill]] }
  0x3c   : > { %554 = sbr.rel (%p4900_p3) target bundleno = 2585 (0xa19), region = 80 }
  0x40   : > { %4504 = dma.hbm_to_vmem [thread:$0]  (!%p4914_p6), %s5760_s6, 512, %s475_s24, [#allocation14], %s4772_s26, %s4772_s26, %s4773_s27  }
  0x41   : > { %4745 = dma.done.wait (%p4906_p4), [#allocation11], 512  }
  0x42   : > { %4747 = vsyncadd (%p4906_p4), [#allocation11], 4294966784 }
  0x43   : > { %4749 = dma.done.wait (%p4906_p4), [#allocation14], 512  }
  0x44   : > { %4751 = vsyncadd (%p4906_p4), [#allocation14], 4294966784  ;;  %p641_p7 = scmp.lt.s32.totalorder %s4758_s0, 1  ;;  %p675_p6 = scmp.eq.s32.totalorder %s4758_s0, 0 }
  0x45   : > { %s5763_s12 = sld [smem:[#allocation28_spill]]  ;;  %v681_v0 = vld [vmem:[#allocation10] sm:$0xff] (%p675_p6)  ;;  %vm685_vm0 = vcmask (%p675_p6), 261120   ;;  %v682_v1 = vld [vmem:[#allocation10 + $0x8] sm:$0xff] (%p675_p6)  ;;  %v683_v2 = vld [vmem:[#allocation10 + $0x10] sm:$0xff] (%p675_p6) }
  0x46   : > { %s5784_s0 = smov (!%p641_p7, %s4758_s0), 1  ;;  %s5764_s13 = sld [smem:[#allocation29_spill]]  ;;  %686 = vst.msk [vmem:[#allocation2] sm:$0xff] (%p675_p6), %vm685_vm0, %v681_v0  ;;  %687 = vst.msk [vmem:[#allocation2 + $0x8] sm:$0xff] (%p675_p6), %vm685_vm0, %v682_v1  ;;  %v684_v3 = vld [vmem:[#allocation10 + $0x18] sm:$0xff] (%p675_p6) }
  0x47   : > { %s4119_s29 = sshll.u32 %s5784_s0, 5  ;;  %s5765_s14 = sld [smem:[#allocation30_spill]]  ;;  %688 = vst.msk [vmem:[#allocation2 + $0x10] sm:$0xff] (%p675_p6), %vm685_vm0, %v683_v2  ;;  %689 = vst.msk [vmem:[#allocation2 + $0x18] sm:$0xff] (%p675_p6), %vm685_vm0, %v684_v3 }
  0x48   : > { %s5766_s15 = sld [smem:[#allocation31_spill]]  ;;  %s4123_s27 = sshll.u32 %s5784_s0, 6 }
  0x49   : > { %s5767_s16 = sld [smem:[#allocation32_spill]] }
  0x4b   : > { %s4967_s25 = scalar_lea.vmem %s5763_s12, %s4119_s29  ;;  %680 = sbr.rel (!%p675_p6) target bundleno = 80 (0x50), region = 92 }
  0x4c   : > { %s4972_s6 = scalar_lea.vmem %s5764_s13, %s4119_s29 }
  0x4d   : > { %s4977_s22 = scalar_lea.vmem %s5765_s14, %s4119_s29 }
  0x4e   : > { %s4982_s26 = scalar_lea.vmem %s5766_s15, %s4119_s29 }
  0x4f   : > { %s4988_s23 = scalar_lea.vmem %s5767_s16, %s4123_s27 }
  0x50 PF: > { %v4990_v4 = vld [vmem:[#allocation2] sm:$0xff]  ;;  %vm702_vm1 = vcmask 261120   ;;  %v4992_v5 = vld [vmem:[#allocation2 + $0x10] sm:$0xff]  ;;  %v4994_v6 = vld [vmem:[#allocation2 + $0x8] sm:$0xff]  ;;  %s5768_s3 = sld [smem:[#allocation23_spill]]  ;;  %vm843_vm2 = vcmask 785408  }
  0x51   : > { %v698_v7 = vmul.f32 %v4990_v4, %v4990_v4  ;;  %v700_v8 = vmul.f32 %v4992_v5, %v4992_v5  ;;  %v699_v9 = vmul.f32 %v4994_v6, %v4994_v6  ;;  %v5002_v10 = vld [vmem:[#allocation2 + $0x18] sm:$0xff]  ;;  %v744_v41 = vld [vmem:[%s4967_s25 + $0x10] sm:$0xff]  ;;  %v743_v42 = vld [vmem:[%s4967_s25 + $0x8] sm:$0xff]  ;;  %s5769_s9 = sld [smem:[#allocation26_spill]]  ;;  %vm850_vm3 = vcmask 31744  }
  0x52   : > { %v701_v11 = vmul.f32 %v5002_v10, %v5002_v10  ;;  %v745_v40 = vld [vmem:[%s4967_s25 + $0x18] sm:$0xff]  ;;  %v742_v43 = vld [vmem:[%s4967_s25] sm:$0xff]  ;;  %v5084_v45 = vld [vmem:[%s4972_s6 + $0x10] sm:$0xff]  ;;  %s5771_s10 = sld [smem:[#allocation27_spill]]  ;;  %s5740_s25 = smov 32   ;;  %vm1806_vm4 = vcmask 1043456  }
  0x53   : > { %v703_v14 = vsel %vm702_vm1, %v698_v7, 0.0  ;;  %v709_v15 = vsel %vm702_vm1, %v700_v8, 0.0  ;;  %v706_v16 = vsel %vm702_vm1, %v699_v9, 0.0  ;;  %4246 = vmatprep.subr.mxu0 %v745_v40  ;;  %v5079_v44 = vld [vmem:[%s4972_s6 + $0x18] sm:$0xff]  ;;  %v5089_v46 = vld [vmem:[%s4972_s6 + $0x8] sm:$0xff]  ;;  %v5094_v47 = vld [vmem:[%s4972_s6] sm:$0xff] }
  0x54   : > { %704 = vadd.xlane.f32.xlu0 %v703_v14  ;;  %710 = vadd.xlane.f32.xlu1 %v709_v15  ;;  %v712_v17 = vsel %vm702_vm1, %v701_v11, 0.0  ;;  %s1089_s8 = sld [smem:[#allocation9]]  ;;  %vm4779_vm5 = vmmov 0   ;;  %vm3600_vm10 = vcmask 523264  }
  0x55   : > { %4247 = vmatpush3.msra.mxu0 %v745_v40  ;;  %4478 = vmatprep.subr.mxu1 %v5079_v44  ;;  %s3994_s21 = sld [smem:[#allocation9 + $0x1]] }
  0x56   : > { %v5009_v12 = vld [vmem:[%s5768_s3] sm:$0xff]  ;;  %v5014_v13 = vld [vmem:[%s5768_s3 + $0x8] sm:$0xff]  ;;  %v5027_v20 = vld [vmem:[%s5768_s3 + $0x10] sm:$0xff]  ;;  %4248 = vmatprep.subr.mxu0 %v744_v41  ;;  %4482 = vmatpush3.msra.mxu1 %v5079_v44  ;;  %s3996_s2 = sld [smem:[#allocation9 + $0x2]] }
  0x57   : > { %v876_v18 = vmul.f32 %v5009_v12, %v5009_v12  ;;  %v877_v19 = vmul.f32 %v5014_v13, %v5014_v13  ;;  %v5032_v21 = vld [vmem:[%s5768_s3 + $0x18] sm:$0xff]  ;;  %v878_v24 = vmul.f32 %v5027_v20, %v5027_v20  ;;  %v5043_v26 = vld [vmem:[%s5768_s3 + $0x20] sm:$0xff]  ;;  %v5048_v27 = vld [vmem:[%s5768_s3 + $0x28] sm:$0xff]  ;;  %4249 = vmatpush3.msra.mxu0 %v744_v41  ;;  %4479 = vmatprep.subr.mxu1 %v5084_v45  ;;  %s5770_s19 = scalar_lea.vmem %s5769_s9, %s5784_s0  ;;  %s3998_s28 = sld [smem:[#allocation9 + $0x3]] }
  0x58   : > { %707 = vadd.xlane.f32.xlu0 %v706_v16  ;;  %713 = vadd.xlane.f32.xlu1 %v712_v17  ;;  %v879_v25 = vmul.f32 %v5032_v21, %v5032_v21  ;;  %v880_v30 = vmul.f32 %v5043_v26, %v5043_v26  ;;  %v881_v31 = vmul.f32 %v5048_v27, %v5048_v27  ;;  %v5059_v32 = vld [vmem:[%s5768_s3 + $0x30] sm:$0xff]  ;;  %v5064_v33 = vld [vmem:[%s5768_s3 + $0x38] sm:$0xff]  ;;  %s5772_s20 = scalar_lea.vmem %s5771_s10, %s5784_s0  ;;  %s4000_s29 = sld [smem:[#allocation9 + $0x4]] }
  0x59   : > { %v885_v22 = vsel %vm702_vm1, %v876_v18, 0.0  ;;  %v888_v23 = vsel %vm702_vm1, %v877_v19, 0.0  ;;  %v891_v28 = vsel %vm702_vm1, %v878_v24, 0.0  ;;  %v882_v36 = vmul.f32 %v5059_v32, %v5059_v32  ;;  %4250 = vmatprep.subr.mxu0 %v743_v42  ;;  %4483 = vmatpush3.msra.mxu1 %v5084_v45  ;;  %v3979_v19 = vld [vmem:[%s5770_s19] ss:$0 sm:$0xff]  ;;  %s4002_s24 = sld [smem:[#allocation9 + $0x5]] }
  0x5a   : > { %v894_v29 = vsel %vm702_vm1, %v879_v25, 0.0  ;;  %v897_v34 = vsel %vm702_vm1, %v880_v30, 0.0  ;;  %v900_v35 = vsel %vm702_vm1, %v881_v31, 0.0  ;;  %v883_v37 = vmul.f32 %v5064_v33, %v5064_v33  ;;  %4251 = vmatpush3.msra.mxu0 %v743_v42  ;;  %4480 = vmatprep.subr.mxu1 %v5089_v46  ;;  %s5157_s1 = sshll.u32 %s1089_s8, 3  ;;  %s4004_s27 = sld [smem:[#allocation9 + $0x6]] }
  0x5b   : > { %v903_v38 = vsel %vm702_vm1, %v882_v36, 0.0  ;;  %4252 = vmatprep.subr.mxu0 %v742_v43  ;;  %4484 = vmatpush3.msra.mxu1 %v5089_v46  ;;  %s5159_s6 = sshll.u32 %s3994_s21, 3  ;;  %s4006_s8 = sld [smem:[#allocation9 + $0x7]] }
  0x5c   : > { %886 = vadd.xlane.f32.xlu0 %v885_v22  ;;  %889 = vadd.xlane.f32.xlu1 %v888_v23  ;;  %v906_v39 = vsel %vm702_vm1, %v883_v37, 0.0  ;;  %s5162_s19 = sshll.u32 %s3996_s2, 3  ;;  %s1091_s21 = scalar_lea.vmem [#allocation3], %s5157_s1 }
  0x5d   : > { %4253 = vmatpush3.msra.mxu0 %v742_v43  ;;  %4481 = vmatprep.subr.mxu1 %v5094_v47  ;;  %v3984_v43 = vld [vmem:[%s5772_s20] ss:$0 sm:$0xff]  ;;  %s5165_s20 = sshll.u32 %s3998_s28, 3  ;;  %s1096_s3 = scalar_lea.vmem [#allocation3], %s5159_s6 }
  0x5e   : > { %4260 = vmatprep.subr.mxu0 %v5079_v44  ;;  %4485 = vmatpush3.msra.mxu1 %v5094_v47  ;;  %s5173_s2 = sshll.u32 %s4000_s29, 3  ;;  %s1101_s28 = scalar_lea.vmem [#allocation3], %s5162_s19 }
  0x5f   : > { %s1111_s9 = scalar_lea.vmem [#allocation3], %s5173_s2  ;;  %s4013_s12 = sld [smem:[#allocation8 + $0x3]] }
  0x60   : > { %892 = vadd.xlane.f32.xlu0 %v891_v28  ;;  %895 = vadd.xlane.f32.xlu1 %v894_v29  ;;  %s5188_s29 = sshll.u32 %s4004_s27, 3  ;;  %s5219_s13 = sld [smem:[#allocation8 + $0x4]] }
  0x64   : > { %898 = vadd.xlane.f32.xlu0 %v897_v34  ;;  %901 = vadd.xlane.f32.xlu1 %v900_v35 }
  0x66   : > { %s4016_s15 = sshll.u32 %s5219_s13, 3 }
  0x68   : > { %904 = vadd.xlane.f32.xlu0 %v903_v38  ;;  %907 = vadd.xlane.f32.xlu1 %v906_v39 }
  0xdd   : > { %v705_v48 = vpop.xlane.xlu0 %704  ;;  %v711_v49 = vpop.xlane.xlu1 %710 }
  0xde   : > { %v716_v50 = vmul.f32 0.03125, %v705_v48  ;;  %v718_v51 = vmul.f32 0.03125, %v711_v49 }
  0xe0   : > { %v720_v52 = vadd.f32 1e-06, %v716_v50  ;;  %v722_v53 = vadd.f32 1e-06, %v718_v51 }
  0xe1   : > { %v708_v54 = vpop.xlane.xlu0 %707  ;;  %v714_v55 = vpop.xlane.xlu1 %713 }
  0xe2   : > { %4550 = vrsqrt.f32 %v720_v52  ;;  %v717_v56 = vmul.f32 0.03125, %v708_v54  ;;  %v719_v57 = vmul.f32 0.03125, %v714_v55 }
  0xe3   : > { %4552 = vrsqrt.f32 %v722_v53 }
  0xe4   : > { %v721_v58 = vadd.f32 1e-06, %v717_v56  ;;  %v723_v59 = vadd.f32 1e-06, %v719_v57 }
  0xe5   : > { %v887_v60 = vpop.xlane.xlu0 %886  ;;  %v890_v61 = vpop.xlane.xlu1 %889 }
  0xe6   : > { %4554 = vrsqrt.f32 %v721_v58  ;;  %v910_v62 = vmul.f32 0.03125, %v887_v60  ;;  %v911_v63 = vmul.f32 0.03125, %v890_v61  ;;  %v1217_v61 = vld [vmem:[#allocation13 + $0x8] sm:$0xff] }
  0xe7   : > { %4556 = vrsqrt.f32 %v723_v59 }
  0xe8   : > { %v918_v0 = vadd.f32 1e-06, %v910_v62  ;;  %v919_v1 = vadd.f32 1e-06, %v911_v63  ;;  %v1216_v62 = vld [vmem:[#allocation13] sm:$0xff] }
  0xe9   : > { %v893_v2 = vpop.xlane.xlu0 %892  ;;  %v896_v3 = vpop.xlane.xlu1 %895 }
  0xea   : > { %4558 = vrsqrt.f32 %v918_v0  ;;  %v912_v7 = vmul.f32 0.03125, %v893_v2  ;;  %v913_v8 = vmul.f32 0.03125, %v896_v3 }
  0xeb   : > { %4560 = vrsqrt.f32 %v919_v1 }
  0xec   : > { %v920_v9 = vadd.f32 1e-06, %v912_v7  ;;  %v921_v11 = vadd.f32 1e-06, %v913_v8 }
  0xed   : > { %v899_v14 = vpop.xlane.xlu0 %898  ;;  %v902_v15 = vpop.xlane.xlu1 %901 }
  0xee   : > { %4562 = vrsqrt.f32 %v920_v9  ;;  %v914_v16 = vmul.f32 0.03125, %v899_v14  ;;  %v915_v17 = vmul.f32 0.03125, %v902_v15 }
  0xef   : > { %v4551_v18 = vpop.eup %4550  ;;  %4564 = vrsqrt.f32 %v921_v11 }
  0xf0   : > { %v4553_v22 = vpop.eup %4552  ;;  %v922_v23 = vadd.f32 1e-06, %v914_v16  ;;  %v923_v24 = vadd.f32 1e-06, %v915_v17  ;;  %v728_v25 = vmul.f32 %v4551_v18, %v4990_v4 }
  0xf1   : > { %v730_v28 = vmul.f32 %v4553_v22, %v4992_v5  ;;  %v905_v29 = vpop.xlane.xlu0 %904  ;;  %v908_v30 = vpop.xlane.xlu1 %907 }
  0xf2   : > { %4566 = vrsqrt.f32 %v922_v23  ;;  %v738_v31 = vmul.f32 %v3979_v19, %v728_v25  ;;  %v916_v34 = vmul.f32 0.03125, %v905_v29  ;;  %v917_v35 = vmul.f32 0.03125, %v908_v30 }
  0xf3   : > { %v4555_v36 = vpop.eup %4554  ;;  %4568 = vrsqrt.f32 %v923_v24  ;;  %v740_v41 = vmul.f32 %v3979_v19, %v730_v28 }
  0xf4   : > { %v4557_v37 = vpop.eup %4556  ;;  %4254 = vmatprep.mubr.msk.f32.mxu0 %vm702_vm1, %v738_v31  ;;  %v729_v38 = vmul.f32 %v4555_v36, %v4994_v6  ;;  %v924_v39 = vadd.f32 1e-06, %v916_v34  ;;  %v925_v40 = vadd.f32 1e-06, %v917_v35 }
  0xf5   : > { %v731_v4 = vmul.f32 %v4557_v37, %v5002_v10 }
  0xf6   : > { %v739_v5 = vmul.f32 %v3979_v19, %v729_v38  ;;  %4570 = vrsqrt.f32 %v924_v39 }
  0xf7   : > { %v4559_v42 = vpop.eup %4558  ;;  %4572 = vrsqrt.f32 %v925_v40  ;;  %v741_v49 = vmul.f32 %v3979_v19, %v731_v4 }
  0xf8   : > { %v4561_v48 = vpop.eup %4560  ;;  %4255 = vmatmul.mubr.msk.f32.vlgmr.msra.gmra.mxu0 %vm702_vm1, %v739_v5  ;;  %v934_v6 = vmul.f32 %v4559_v42, %v5009_v12 }
  0xf9   : > { %v935_v50 = vmul.f32 %v4561_v48, %v5014_v13  ;;  %4261 = vmatpush3.msra.mxu0 %v5079_v44  ;;  %4257 = vmatprep.mubr.msk.f32.mxu0 %vm702_vm1, %v740_v41 }
  0xfa   : > { %4262 = vmatprep.subr.mxu0 %v5084_v45  ;;  %v948_v10 = vmul.f32 %v3984_v43, %v934_v6 }
  0xfb   : > { %v4563_v51 = vpop.eup %4562  ;;  %4263 = vmatpush3.msra.mxu0 %v5084_v45  ;;  %v949_v53 = vmul.f32 %v3984_v43, %v935_v50 }
  0xfc   : > { %v4565_v52 = vpop.eup %4564  ;;  %4264 = vmatprep.subr.mxu0 %v5089_v46  ;;  %4258 = vmatmul.mubr.msk.f32.gmra.mxu0 %vm702_vm1, %v741_v49  ;;  %v936_v12 = vmul.f32 %v4563_v51, %v5027_v20 }
  0xfd   : > { %4265 = vmatpush3.msra.mxu0 %v5089_v46  ;;  %4268 = vmatprep.mubr.msk.f32.mxu0 %vm702_vm1, %v948_v10  ;;  %v937_v13 = vmul.f32 %v4565_v52, %v5032_v21 }
  0xfe   : > { %4266 = vmatprep.subr.mxu0 %v5094_v47  ;;  %v950_v44 = vmul.f32 %v3984_v43, %v936_v12 }
  0xff   : > { %v4567_v54 = vpop.eup %4566  ;;  %4267 = vmatpush3.msra.mxu0 %v5094_v47  ;;  %v951_v55 = vmul.f32 %v3984_v43, %v937_v13 }
 0x100   : > { %v4569_v45 = vpop.eup %4568  ;;  %4269 = vmatmul.mubr.msk.f32.vlgmr.msra.gmra.mxu0 %vm702_vm1, %v949_v53  ;;  %v938_v56 = vmul.f32 %v4567_v54, %v5043_v26 }
 0x101   : > { %4271 = vmatprep.mubr.msk.f32.mxu0 %vm702_vm1, %v950_v44  ;;  %v939_v20 = vmul.f32 %v4569_v45, %v5048_v27  ;;  %v4774_v27 = vmov 0.0  }
 0x102   : > { %v952_v46 = vmul.f32 %v3984_v43, %v938_v56  ;;  %849 = vst.msk [vmem:[#allocation3 + $0x20] sm:$0xff] %vm843_vm2, %v4774_v27  ;;  %v5273_v56 = vld [vmem:[%s5724_s4] sm:$0xff] }
 0x103   : > { %v4571_v57 = vpop.eup %4570  ;;  %v953_v58 = vmul.f32 %v3984_v43, %v939_v20  ;;  %861 = vst.msk [vmem:[#allocation6] sm:$0xff] %vm702_vm1, %v4774_v27  ;;  %862 = vst.msk [vmem:[#allocation6 + $0x8] sm:$0xff] %vm702_vm1, %v4774_v27 }
 0x104   : > { %v4573_v21 = vpop.eup %4572  ;;  %4272 = vmatmul.mubr.msk.f32.gmra.mxu0 %vm702_vm1, %v951_v55  ;;  %4274 = vmatprep.mubr.msk.f32.mxu1 %vm702_vm1, %v952_v46  ;;  %v940_v47 = vmul.f32 %v4571_v57, %v5059_v32  ;;  %863 = vst.msk [vmem:[#allocation6 + $0x10] sm:$0xff] %vm702_vm1, %v4774_v27  ;;  %864 = vst.msk [vmem:[#allocation6 + $0x18] sm:$0xff] %vm702_vm1, %v4774_v27  ;;  %v1219_v32 = vld [vmem:[#allocation13 + $0x18] sm:$0xff]  ;;  %v5264_v55 = vld [vmem:[%s5724_s4 + $0x8] sm:$0xff] }
 0x105   : > { %4275 = vmatmul.mubr.msk.f32.vlgmr.msra.gmra.mxu1 %vm702_vm1, %v953_v58  ;;  %v941_v59 = vmul.f32 %v4573_v21, %v5064_v33  ;;  %865 = vst.msk [vmem:[#allocation6 + $0x20] sm:$0xff] %vm702_vm1, %v4774_v27  ;;  %4280 = vmatprep.subr.mxu0 %v1219_v32  ;;  %v1218_v33 = vld [vmem:[#allocation13 + $0x10] sm:$0xff]  ;;  %v5284_v21 = vld [vmem:[%s5725_s5 + $0x8] sm:$0xff] }
 0x106   : > { %v954_v60 = vmul.f32 %v3984_v43, %v940_v47  ;;  %4300 = vmatprep.subr.mxu1 %v1219_v32  ;;  %4281 = vmatpush3.msra.mxu0 %v1219_v32  ;;  %856 = vst.msk [vmem:[#allocation5] sm:$0xff] %vm850_vm3, %v4774_v27  ;;  %857 = vst.msk [vmem:[#allocation5 + $0x8] sm:$0xff] %vm850_vm3, %v4774_v27 }
 0x107   : > { %v955_v26 = vmul.f32 %v3984_v43, %v941_v59  ;;  %4301 = vmatpush3.msra.mxu1 %v1219_v32  ;;  %4282 = vmatprep.subr.mxu0 %v1218_v33  ;;  %858 = vst.msk [vmem:[#allocation5 + $0x10] sm:$0xff] %vm850_vm3, %v4774_v27  ;;  %859 = vst.msk [vmem:[#allocation5 + $0x18] sm:$0xff] %vm850_vm3, %v4774_v27 }
 0x108   : > { %4277 = vmatprep.mubr.msk.f32.mxu1 %vm702_vm1, %v954_v60  ;;  %4302 = vmatprep.subr.mxu1 %v1218_v33  ;;  %v5290_v60 = vld [vmem:[%s5725_s5] sm:$0xff]  ;;  %860 = vst.msk [vmem:[#allocation5 + $0x20] sm:$0xff] %vm850_vm3, %v4774_v27 }
 0x109   : > { %4278 = vmatmul.mubr.msk.f32.gmra.mxu1 %vm702_vm1, %v955_v26  ;;  %4283 = vmatpush3.msra.mxu0 %v1218_v33 }
 0x10a   : > { %4303 = vmatpush3.msra.mxu1 %v1218_v33  ;;  %4284 = vmatprep.subr.mxu0 %v1217_v61  ;;  %v5298_v33 = vld [vmem:[%s5724_s4 + $0x18] sm:$0xff] }
 0x10b   : > { %4304 = vmatprep.subr.mxu1 %v1217_v61  ;;  %4285 = vmatpush3.msra.mxu0 %v1217_v61 }
 0x10c   : > { %4305 = vmatpush3.msra.mxu1 %v1217_v61  ;;  %4286 = vmatprep.subr.mxu0 %v1216_v62  ;;  %v5305_v61 = vld [vmem:[%s5725_s5 + $0x18] sm:$0xff] }
 0x10d   : > { %4306 = vmatprep.subr.mxu1 %v1216_v62  ;;  %4287 = vmatpush3.msra.mxu0 %v1216_v62 }
 0x10e   : > { %4307 = vmatpush3.msra.mxu1 %v1216_v62 }
 0x10f   : > { %4340 = vmatprep.subr.mxu1 %v4774_v27 }
 0x1b8   : > { %v4256_v63 = vpop.f32.mrf.mxu0 }
 0x1b9   : > { %845 = vst.msk [vmem:[#allocation3 + $0x8] sm:$0xff] %vm843_vm2, %v4256_v63  ;;  %v5310_v63 = vld [vmem:[%s5724_s4 + $0x10] sm:$0xff] }
 0x1ba   : > { %v824_v0 = vpop.f32.mrf.mxu0 }
 0x1bb   : > { %844 = vst.msk [vmem:[#allocation3] sm:$0xff] %vm843_vm2, %v824_v0 }
 0x1bc   : > { %v4259_v1 = vpop.f32.mrf.mxu0 }
 0x1bd   : > { %847 = vst.msk [vmem:[#allocation3 + $0x18] sm:$0xff] %vm843_vm2, %v4259_v1  ;;  %v5318_v1 = vld [vmem:[%s5725_s5 + $0x10] sm:$0xff] }
 0x1be   : > { %v834_v2 = vpop.f32.mrf.mxu0 }
 0x1bf   : > { %846 = vst.msk [vmem:[#allocation3 + $0x10] sm:$0xff] %vm843_vm2, %v834_v2 }
 0x1c0   : > { %v4270_v3 = vpop.f32.mrf.mxu0 }
 0x1c1   : > { %1170 = vrot.lane.b32.xlu1 %v4270_v3, %s5740_s25  ;;  %v1649_v3 = vld [vmem:[%s5727_s7 + $0x18] sm:$0xff] }
 0x1c2   : > { %v1050_v7 = vpop.f32.mrf.mxu0  ;;  %4320 = vmatprep.subr.mxu0 %v1649_v3 }
 0x1c3   : > { %1168 = vrot.lane.b32.xlu0 %v1050_v7, %s5740_s25  ;;  %v1648_v7 = vld [vmem:[%s5727_s7 + $0x10] sm:$0xff] }
 0x1c4   : > { %v4273_v8 = vpop.f32.mrf.mxu0 }
 0x1c5   : > { %v4276_v9 = vpop.f32.mrf.mxu1 }
 0x1c6   : > { %v1060_v11 = vpop.f32.mrf.mxu0  ;;  %v5168_v14 = vld [vmem:[%s1091_s21] sm:$0xff]  ;;  %s1106_s21 = scalar_lea.vmem [#allocation3], %s5165_s20 }
 0x1c7   : > { %v5171_v15 = vld [vmem:[%s1096_s3] sm:$0xff]  ;;  %4288 = vmatprep.mubr.msk.f32.mxu0 %vm702_vm1, %v5168_v14  ;;  %1172 = vrot.lane.b32.xlu1 %v1060_v11, %s5740_s25  ;;  %v1070_v16 = vpop.f32.mrf.mxu1  ;;  %s5186_s3 = sshll.u32 %s4002_s24, 3  ;;  %s5201_s24 = sshll.u32 %s4006_s8, 3  ;;  %v5332_v11 = vld [vmem:[%s5724_s4 + $0x28] sm:$0xff] }
 0x1c8   : > { %4289 = vmatmul.mubr.msk.f32.vlgmr.msra.gmra.mxu0 %vm702_vm1, %v5171_v15  ;;  %1176 = vrot.lane.b32.xlu0 %v1070_v16, %s5740_s25  ;;  %v5182_v17 = vld [vmem:[%s1101_s28] sm:$0xff]  ;;  %s1116_s27 = scalar_lea.vmem [#allocation3], %s5186_s3  ;;  %s1121_s28 = scalar_lea.vmem [#allocation3], %s5188_s29  ;;  %v5339_v16 = vld [vmem:[%s5725_s5 + $0x28] sm:$0xff] }
 0x1c9   : > { %4291 = vmatprep.mubr.msk.f32.mxu0 %vm702_vm1, %v5182_v17  ;;  %v5192_v18 = vld [vmem:[%s1106_s21] sm:$0xff]  ;;  %s4009_s8 = sld [smem:[#allocation8 + $0x1]]  ;;  %v4279_v34 = vpop.f32.mrf.mxu1  ;;  %4321 = vmatpush3.msra.mxu0 %v1649_v3 }
 0x1ca   : > { %v5197_v19 = vld [vmem:[%s1111_s9] sm:$0xff]  ;;  %s1126_s9 = scalar_lea.vmem [#allocation3], %s5201_s24  ;;  %s1128_s21 = sld [smem:[#allocation8]]  ;;  %4322 = vmatprep.subr.mxu0 %v1648_v7 }
 0x1cb   : > { %1174 = vrot.lane.b32.xlu1 %v4273_v8, %s5740_s25  ;;  %v5205_v22 = vld [vmem:[%s1116_s27] sm:$0xff]  ;;  %s4011_s27 = sld [smem:[#allocation8 + $0x2]]  ;;  %v1080_v37 = vpop.f32.mrf.mxu1  ;;  %4323 = vmatpush3.msra.mxu0 %v1648_v7 }
 0x1cc   : > { %4292 = vmatmul.mubr.msk.f32.gmra.mxu0 %vm702_vm1, %v5192_v18  ;;  %v5210_v23 = vld [vmem:[%s1121_s28] sm:$0xff]  ;;  %s5221_s28 = sld [smem:[#allocation8 + $0x5]] }
 0x1cd   : > { %4294 = vmatprep.mubr.msk.f32.mxu0 %vm702_vm1, %v5197_v19  ;;  %v5215_v24 = vld [vmem:[%s1126_s9] sm:$0xff] }
 0x1cf   : > { %1178 = vrot.lane.b32.xlu1 %v4276_v9, %s5740_s25  ;;  %s4010_s25 = sshll.u32 %s4009_s8, 3  ;;  %s4776_s8 = smov 96  }
 0x1d0   : > { %4295 = vmatmul.mubr.msk.f32.gmra.mxu0 %vm702_vm1, %v5205_v22  ;;  %s4008_s10 = sshll.u32 %s1128_s21, 3  ;;  %s1134_s14 = scalar_lea.vmem [#allocation3], %s4010_s25 }
 0x1d1   : > { %4297 = vmatprep.mubr.msk.f32.mxu0 %vm702_vm1, %v5210_v23  ;;  %v1135_v25 = vld [vmem:[%s1134_s14] sm:$0xff]  ;;  %s1130_s9 = scalar_lea.vmem [#allocation3], %s4008_s10  ;;  %s4012_s21 = sshll.u32 %s4011_s27, 3 }
 0x1d2   : > { %v1131_v30 = vld [vmem:[%s1130_s9] sm:$0xff]  ;;  %s4014_s25 = sshll.u32 %s4013_s12, 3  ;;  %s5773_s14 = smov 32  }
 0x1d3   : > { %s4018_s10 = sshll.u32 %s5221_s28, 3  ;;  %s1138_s9 = scalar_lea.vmem [#allocation3], %s4012_s21 }
 0x1d4   : > { %4298 = vmatmul.mubr.msk.f32.gmra.mxu0 %vm702_vm1, %v5215_v24  ;;  %v1139_v38 = vld [vmem:[%s1138_s9] sm:$0xff]  ;;  %s1142_s16 = scalar_lea.vmem [#allocation3], %s4014_s25  ;;  %s1146_s12 = scalar_lea.vmem [#allocation3], %s4016_s15 }
 0x1d5   : > { %v1143_v39 = vld [vmem:[%s1142_s16] sm:$0xff]  ;;  %s1150_s13 = scalar_lea.vmem [#allocation3], %s4018_s10  ;;  %s4021_s16 = sld [smem:[#allocation8 + $0x7]] }
 0x1d6   : > { %v1147_v42 = vld [vmem:[%s1146_s12] sm:$0xff]  ;;  %s4019_s27 = sld [smem:[#allocation8 + $0x6]]  ;;  %s1788_s12 = scalar_lea.vmem [#allocation4], %s5157_s1 }
 0x1d7   : > { %v1151_v43 = vld [vmem:[%s1150_s13] sm:$0xff]  ;;  %s5774_s9 = sld [smem:[#allocation25_spill]]  ;;  %s1965_s13 = scalar_lea.vmem [#allocation4], %s5159_s6 }
 0x1d8   : > { %s2318_s10 = scalar_lea.vmem [#allocation5], %s5165_s20 }
 0x1db   : > { %s4022_s28 = sshll.u32 %s4021_s16, 3  ;;  %s1797_s16 = scalar_lea.vmem [#allocation5], %s5157_s1 }
 0x1dc   : > { %s4020_s21 = sshll.u32 %s4019_s27, 3  ;;  %s1158_s15 = scalar_lea.vmem [#allocation3], %s4022_s28 }
 0x1dd   : > { %v1159_v51 = vld [vmem:[%s1158_s15] sm:$0xff]  ;;  %s1154_s25 = scalar_lea.vmem [#allocation3], %s4020_s21  ;;  %s2137_s27 = scalar_lea.vmem [#allocation4], %s5162_s19 }
 0x1de   : > { %v1155_v12 = vld [vmem:[%s1154_s25] sm:$0xff]  ;;  %s2309_s28 = scalar_lea.vmem [#allocation4], %s5165_s20  ;;  %s1974_s21 = scalar_lea.vmem [#allocation5], %s5159_s6 }
 0x1df   : > { %s2481_s15 = scalar_lea.vmem [#allocation4], %s5173_s2  ;;  %s2146_s25 = scalar_lea.vmem [#allocation5], %s5162_s19 }
 0x233   : > { %v1171_v28 = vpop.permute.xlu1 %1170 }
 0x234   : > { %v5223_v29 = vadd.f32 %v1171_v28, %v1135_v25  ;;  %v5344_v28 = vld [vmem:[%s5724_s4 + $0x20] sm:$0xff] }
 0x235   : > { %v1169_v31 = vpop.permute.xlu0 %1168 }
 0x236   : > { %v5225_v35 = vadd.f32 %v1169_v31, %v1131_v30  ;;  %1423 = vrot.lane.b32.xlu1 %v5223_v29, %s4776_s8  ;;  %v5352_v31 = vld [vmem:[%s5725_s5 + $0x20] sm:$0xff] }
 0x238   : > { %1421 = vrot.lane.b32.xlu0 %v5225_v35, %s4776_s8 }
 0x239   : > { %v1173_v36 = vpop.permute.xlu1 %1172 }
 0x23a   : > { %1182 = vrot.lane.b32.xlu1 %v4279_v34, %s5773_s14  ;;  %v5235_v41 = vadd.f32 %v1173_v36, %v1139_v38  ;;  %v1177_v5 = vpop.permute.xlu0 %1176  ;;  %v1647_v36 = vld [vmem:[%s5727_s7 + $0x8] sm:$0xff] }
 0x23b   : > { %v5243_v49 = vadd.f32 %v1177_v5, %v1147_v42  ;;  %4324 = vmatprep.subr.mxu0 %v1647_v36 }
 0x23c   : > { %1180 = vrot.lane.b32.xlu0 %v1080_v37, %s5773_s14  ;;  %4325 = vmatpush3.msra.mxu0 %v1647_v36  ;;  %v1646_v37 = vld [vmem:[%s5727_s7] sm:$0xff] }
 0x23d   : > { %v1175_v40 = vpop.permute.xlu1 %1174  ;;  %4326 = vmatprep.subr.mxu0 %v1646_v37 }
 0x23e   : > { %v5237_v4 = vadd.f32 %v1175_v40, %v1143_v39  ;;  %4327 = vmatpush3.msra.mxu0 %v1646_v37 }
 0x23f   : > { %4350 = vmatprep.subr.mxu0 %v4774_v27 }
 0x240   : > { %1427 = vrot.lane.b32.xlu1 %v5237_v4, %s4776_s8  ;;  %1425 = vrot.lane.b32.xlu0 %v5235_v41, %s4776_s8 }
 0x241   : > { %v1179_v48 = vpop.permute.xlu1 %1178 }
 0x242   : > { %v5245_v6 = vadd.f32 %v1179_v48, %v1151_v43 }
 0x244   : > { %1431 = vrot.lane.b32.xlu1 %v5245_v6, %s4776_s8  ;;  %1429 = vrot.lane.b32.xlu0 %v5243_v49, %s4776_s8 }
 0x2a8   : > { %v1424_v50 = vpop.permute.xlu1 %1423 }
 0x2aa   : > { %v1422_v10 = vpop.permute.xlu0 %1421 }
 0x2ab   : > { %4308 = vmatprep.mubr.msk.f32.mxu1 %vm702_vm1, %v1422_v10 }
 0x2ac   : > { %v1183_v52 = vpop.permute.xlu1 %1182  ;;  %4309 = vmatmul.mubr.msk.f32.vlgmr.msra.gmra.mxu1 %vm702_vm1, %v1424_v50 }
 0x2ad   : > { %v5253_v53 = vadd.f32 %v1183_v52, %v1159_v51 }
 0x2ae   : > { %v1181_v13 = vpop.permute.xlu0 %1180 }
 0x2af   : > { %v5255_v44 = vadd.f32 %v1181_v13, %v1155_v12  ;;  %1435 = vrot.lane.b32.xlu1 %v5253_v53, %s4776_s8  ;;  %v5371_v12 = vld [vmem:[%s5724_s4 + $0x38] sm:$0xff] }
 0x2b0   : > { %v5378_v13 = vld [vmem:[%s5725_s5 + $0x38] sm:$0xff] }
 0x2b1   : > { %1433 = vrot.lane.b32.xlu0 %v5255_v44, %s4776_s8 }
 0x2b2   : > { %v1428_v54 = vpop.permute.xlu1 %1427  ;;  %v1426_v45 = vpop.permute.xlu0 %1425 }
 0x2b3   : > { %1383 = vrot.lane.b32.xlu1 %v5264_v55, %s5773_s14  ;;  %4311 = vmatprep.mubr.msk.f32.mxu1 %vm702_vm1, %v1426_v45 }
 0x2b4   : > { %4312 = vmatmul.mubr.msk.f32.gmra.mxu1 %vm702_vm1, %v1428_v54 }
 0x2b5   : > { %1381 = vrot.lane.b32.xlu0 %v5273_v56, %s5773_s14 }
 0x2b6   : > { %v1432_v20 = vpop.permute.xlu1 %1431  ;;  %v1430_v46 = vpop.permute.xlu0 %1429 }
 0x2b7   : > { %4314 = vmatprep.mubr.msk.f32.mxu1 %vm702_vm1, %v1430_v46 }
 0x2b8   : > { %4315 = vmatmul.mubr.msk.f32.gmra.mxu1 %vm702_vm1, %v1432_v20  ;;  %v5383_v20 = vld [vmem:[%s5724_s4 + $0x30] sm:$0xff] }
 0x321   : > { %v1436_v58 = vpop.permute.xlu1 %1435 }
 0x323   : > { %v1434_v57 = vpop.permute.xlu0 %1433 }
 0x324   : > { %4317 = vmatprep.mubr.msk.f32.mxu1 %vm702_vm1, %v1434_v57  ;;  %v5391_v57 = vld [vmem:[%s5725_s5 + $0x30] sm:$0xff] }
 0x325   : > { %4318 = vmatmul.mubr.msk.f32.gmra.mxu1 %vm702_vm1, %v1436_v58  ;;  %v1384_v38 = vpop.permute.xlu1 %1383 }
 0x326   : > { %v1406_v40 = vmul.f32 %v1384_v38, %v5223_v29  ;;  %4342 = vmatprep.mubr.msk.f32.mxu1 %vm4779_vm5, %v4774_v27 }
 0x327   : > { %v1382_v39 = vpop.permute.xlu0 %1381 }
 0x328   : > { %v1405_v42 = vmul.f32 %v1382_v39, %v5225_v35 }
 0x36c   : > { %v4310_v47 = vpop.f32.mrf.mxu1 }
 0x36d   : > { %v1559_v59 = vmul.f32 %v4310_v47, %v5284_v21 }
 0x36e   : > { %v1519_v26 = vpop.f32.mrf.mxu1 }
 0x36f   : > { %v1558_v32 = vmul.f32 %v1519_v26, %v5290_v60  ;;  %1576 = vrot.lane.b32.xlu1 %v1559_v59, %s5773_s14 }
 0x371   : > { %1574 = vrot.lane.b32.xlu0 %v1558_v32, %s5773_s14 }
 0x373   : > { %1387 = vrot.lane.b32.xlu1 %v5298_v33, %s5773_s14 }
 0x374   : > { %v4313_v62 = vpop.f32.mrf.mxu1 }
 0x375   : > { %v1561_v0 = vmul.f32 %v4313_v62, %v5305_v61  ;;  %1385 = vrot.lane.b32.xlu0 %v5310_v63, %s5773_s14 }
 0x376   : > { %v1529_v2 = vpop.f32.mrf.mxu1 }
 0x377   : > { %v1560_v8 = vmul.f32 %v1529_v2, %v5318_v1  ;;  %1580 = vrot.lane.b32.xlu1 %v1561_v0, %s5773_s14 }
 0x378   : > { %v4316_v9 = vpop.f32.mrf.mxu1 }
 0x379   : > { %1578 = vrot.lane.b32.xlu0 %v1560_v8, %s5773_s14  ;;  %v1563_v30 = vmul.f32 %v4316_v9, %v5339_v16 }
 0x37a   : > { %v1539_v25 = vpop.f32.mrf.mxu1 }
 0x37b   : > { %1391 = vrot.lane.b32.xlu1 %v5332_v11, %s5773_s14  ;;  %v1562_v34 = vmul.f32 %v1539_v25, %v5352_v31 }
 0x37d   : > { %1389 = vrot.lane.b32.xlu0 %v5344_v28, %s5773_s14 }
 0x37f   : > { %1584 = vrot.lane.b32.xlu1 %v1563_v30, %s5773_s14 }
 0x381   : > { %1582 = vrot.lane.b32.xlu0 %v1562_v34, %s5773_s14  ;;  %v4290_v34 = vpop.f32.mrf.mxu0 }
 0x382   : > { %v1358_v38 = vmul.f32 %v4290_v34, %v5284_v21 }
 0x383   : > { %v1318_v36 = vpop.f32.mrf.mxu0 }
 0x384   : > { %v1357_v37 = vmul.f32 %v1318_v36, %v5290_v60 }
 0x385   : > { %v4293_v39 = vpop.f32.mrf.mxu0 }
 0x3e1   : > { %v1577_v5 = vpop.permute.xlu1 %1576 }
 0x3e2   : > { %v1599_v43 = vadd.f32 %v1577_v5, %v1406_v40  ;;  %v1220_v40 = vmul.f32 %v5273_v56, %v5168_v14  ;;  %v1221_v5 = vmul.f32 %v5264_v55, %v5171_v15 }
 0x3e3   : > { %v1575_v48 = vpop.permute.xlu0 %1574 }
 0x3e4   : > { %v1598_v50 = vadd.f32 %v1575_v48, %v1405_v42  ;;  %1616 = vrot.lane.b32.xlu1 %v1599_v43, %s4776_s8  ;;  %v1365_v43 = vadd.f32 %v1357_v37, %v1220_v40  ;;  %v1328_v48 = vpop.f32.mrf.mxu0 }
 0x3e5   : > { %v1388_v10 = vpop.permute.xlu1 %1387  ;;  %v4319_v51 = vpop.f32.mrf.mxu1  ;;  %v1359_v56 = vmul.f32 %v1328_v48, %v5318_v1 }
 0x3e6   : > { %1614 = vrot.lane.b32.xlu0 %v1598_v50, %s4776_s8  ;;  %v1565_v46 = vmul.f32 %v4319_v51, %v5378_v13  ;;  %v1408_v47 = vmul.f32 %v1388_v10, %v5237_v4  ;;  %v1366_v50 = vadd.f32 %v1358_v38, %v1221_v5  ;;  %v4296_v60 = vpop.f32.mrf.mxu0 }
 0x3e7   : > { %v1386_v52 = vpop.permute.xlu0 %1385  ;;  %v1549_v54 = vpop.f32.mrf.mxu1 }
 0x3e8   : > { %1395 = vrot.lane.b32.xlu1 %v5371_v12, %s5773_s14  ;;  %v1564_v59 = vmul.f32 %v1549_v54, %v5391_v57  ;;  %v1407_v32 = vmul.f32 %v1386_v52, %v5235_v41 }
 0x3e9   : > { %v1581_v45 = vpop.permute.xlu1 %1580 }
 0x3ea   : > { %1393 = vrot.lane.b32.xlu0 %v5383_v20, %s5773_s14  ;;  %v1601_v62 = vadd.f32 %v1581_v45, %v1408_v47 }
 0x3eb   : > { %v1579_v58 = vpop.permute.xlu0 %1578 }
 0x3ec   : > { %1588 = vrot.lane.b32.xlu1 %v1565_v46, %s5773_s14  ;;  %v1600_v2 = vadd.f32 %v1579_v58, %v1407_v32  ;;  %v1360_v46 = vmul.f32 %v4293_v39, %v5305_v61  ;;  %v1338_v58 = vpop.f32.mrf.mxu0  ;;  %v1223_v32 = vmul.f32 %v5298_v33, %v5192_v18  ;;  %v1225_v18 = vmul.f32 %v5332_v11, %v5205_v22 }
 0x3ed   : > { %v1392_v26 = vpop.permute.xlu1 %1391  ;;  %v4778_v22 = vmov -1e+30  }
 0x3ee   : > { %1586 = vrot.lane.b32.xlu0 %v1564_v59, %s5773_s14  ;;  %v1410_v3 = vmul.f32 %v1392_v26, %v5245_v6  ;;  %v1222_v59 = vmul.f32 %v5310_v63, %v5182_v17  ;;  %v1368_v61 = vadd.f32 %v1360_v46, %v1223_v32  ;;  %s4777_s14 = smov 64   ;;  %851 = vst.msk [vmem:[#allocation4] sm:$0xff] %vm850_vm3, %v4778_v22  ;;  %852 = vst.msk [vmem:[#allocation4 + $0x8] sm:$0xff] %vm850_vm3, %v4778_v22 }
 0x3ef   : > { %v1390_v0 = vpop.permute.xlu0 %1389  ;;  %853 = vst.msk [vmem:[#allocation4 + $0x10] sm:$0xff] %vm850_vm3, %v4778_v22  ;;  %854 = vst.msk [vmem:[#allocation4 + $0x18] sm:$0xff] %vm850_vm3, %v4778_v22 }
 0x3f0   : > { %1620 = vrot.lane.b32.xlu1 %v1601_v62, %s4776_s8  ;;  %v1409_v8 = vmul.f32 %v1390_v0, %v5243_v49  ;;  %v1361_v0 = vmul.f32 %v1338_v58, %v5352_v31  ;;  %v1367_v1 = vadd.f32 %v1359_v56, %v1222_v59  ;;  %855 = vst.msk [vmem:[#allocation4 + $0x20] sm:$0xff] %vm850_vm3, %v4778_v22 }
 0x3f1   : > { %v1585_v7 = vpop.permute.xlu1 %1584 }
 0x3f2   : > { %v1603_v9 = vadd.f32 %v1585_v7, %v1410_v3  ;;  %1618 = vrot.lane.b32.xlu0 %v1600_v2, %s4776_s8  ;;  %v1362_v2 = vmul.f32 %v4296_v60, %v5339_v16  ;;  %v1224_v7 = vmul.f32 %v5344_v28, %v5197_v19 }
 0x3f3   : > { %v1583_v25 = vpop.permute.xlu0 %1582 }
 0x3f4   : > { %v1602_v30 = vadd.f32 %v1583_v25, %v1409_v8  ;;  %1624 = vrot.lane.b32.xlu1 %v1603_v9, %s4776_s8  ;;  %v1369_v16 = vadd.f32 %v1361_v0, %v1224_v7  ;;  %v1370_v31 = vadd.f32 %v1362_v2, %v1225_v18 }
 0x3f6   : > { %1622 = vrot.lane.b32.xlu0 %v1602_v30, %s4776_s8 }
 0x456   : > { %v1617_v42 = vpop.permute.xlu1 %1616 }
 0x457   : > { %v1639_v52 = vmul.f32 %v1617_v42, %v1366_v50 }
 0x458   : > { %v1615_v10 = vpop.permute.xlu0 %1614 }
 0x459   : > { %v1638_v51 = vmul.f32 %v1615_v10, %v1365_v43 }
 0x45a   : > { %v1396_v54 = vpop.permute.xlu1 %1395 }
 0x45b   : > { %4328 = vmatprep.mubr.msk.f32.mxu0 %vm702_vm1, %v1638_v51  ;;  %v1412_v45 = vmul.f32 %v1396_v54, %v5253_v53 }
 0x45c   : > { %4329 = vmatmul.mubr.msk.f32.vlgmr.msra.gmra.mxu0 %vm702_vm1, %v1639_v52  ;;  %v1394_v21 = vpop.permute.xlu0 %1393  ;;  %v1798_v52 = vld [vmem:[%s1797_s16] sm:$0xff] }
 0x45d   : > { %v1411_v15 = vmul.f32 %v1394_v21, %v5255_v44 }
 0x45e   : > { %v1589_v14 = vpop.permute.xlu1 %1588 }
 0x45f   : > { %v1605_v55 = vadd.f32 %v1589_v14, %v1412_v45 }
 0x460   : > { %v1587_v47 = vpop.permute.xlu0 %1586 }
 0x461   : > { %v1604_v26 = vadd.f32 %v1587_v47, %v1411_v15  ;;  %1628 = vrot.lane.b32.xlu1 %v1605_v55, %s4776_s8 }
 0x462   : > { %v1621_v62 = vpop.permute.xlu1 %1620 }
 0x463   : > { %1626 = vrot.lane.b32.xlu0 %v1604_v26, %s4776_s8  ;;  %v1641_v33 = vmul.f32 %v1621_v62, %v1368_v61  ;;  %s2653_s8 = scalar_lea.vmem [#allocation4], %s5186_s3 }
 0x464   : > { %v1619_v3 = vpop.permute.xlu0 %1618 }
 0x465   : > { %v1640_v17 = vmul.f32 %v1619_v3, %v1367_v1  ;;  %2128 = vrot.lane.b32.xlu1 %v5223_v29, %s4777_s14 }
 0x466   : > { %v1625_v63 = vpop.permute.xlu1 %1624 }
 0x467   : > { %1956 = vrot.lane.b32.xlu0 %v5225_v35, %s4777_s14  ;;  %4331 = vmatprep.mubr.msk.f32.mxu0 %vm702_vm1, %v1640_v17  ;;  %v1643_v29 = vmul.f32 %v1625_v63, %v1370_v31  ;;  %v5466_v35 = vld [vmem:[%s5774_s9] sm:$0xf]  ;;  %s2490_s9 = scalar_lea.vmem [#allocation5], %s5173_s2 }
 0x468   : > { %4332 = vmatmul.mubr.msk.f32.gmra.mxu0 %vm702_vm1, %v1641_v33  ;;  %v1623_v19 = vpop.permute.xlu0 %1622  ;;  %4341 = vmatpush3.msk.msra.mxu1 %vm1806_vm4, %v5466_v35 }
 0x469   : > { %v1642_v28 = vmul.f32 %v1623_v19, %v1369_v16  ;;  %2472 = vrot.lane.b32.xlu1 %v5237_v4, %s4777_s14  ;;  %4345 = vmatprep.subr.mxu1 %v4774_v27 }
 0x46a   : > { %4351 = vmatpush3.msk.msra.mxu0 %vm1806_vm4, %v5466_v35 }
 0x46b   : > { %2300 = vrot.lane.b32.xlu0 %v5235_v41, %s4777_s14  ;;  %4334 = vmatprep.mubr.msk.f32.mxu0 %vm702_vm1, %v1642_v28  ;;  %v4299_v41 = vpop.f32.mrf.mxu0 }
 0x46c   : > { %4335 = vmatmul.mubr.msk.f32.gmra.mxu0 %vm702_vm1, %v1643_v29  ;;  %4360 = vmatprep.subr.mxu0 %v4774_v27 }
 0x46d   : > { %2816 = vrot.lane.b32.xlu1 %v5245_v6, %s4777_s14  ;;  %v1348_v4 = vpop.f32.mrf.mxu0  ;;  %v1364_v6 = vmul.f32 %v4299_v41, %v5378_v13 }
 0x46f   : > { %2644 = vrot.lane.b32.xlu0 %v5243_v49, %s4777_s14  ;;  %v1363_v49 = vmul.f32 %v1348_v4, %v5391_v57 }
 0x471   : > { %3160 = vrot.lane.b32.xlu1 %v5253_v53, %s4777_s14  ;;  %v1226_v53 = vmul.f32 %v5383_v20, %v5210_v23  ;;  %v1789_v23 = vld [vmem:[%s1788_s12] sm:$0xff] }
 0x473   : > { %2988 = vrot.lane.b32.xlu0 %v5255_v44, %s4777_s14  ;;  %v1227_v44 = vmul.f32 %v5371_v12, %v5215_v24  ;;  %v1371_v8 = vadd.f32 %v1363_v49, %v1226_v53 }
 0x475   : > { %v1372_v9 = vadd.f32 %v1364_v6, %v1227_v44 }
 0x4d3   : > { %v1629_v11 = vpop.permute.xlu1 %1628 }
 0x4d4   : > { %v1645_v34 = vmul.f32 %v1629_v11, %v1372_v9 }
 0x4d5   : > { %v1627_v25 = vpop.permute.xlu0 %1626 }
 0x4d6   : > { %v1644_v30 = vmul.f32 %v1627_v25, %v1371_v8 }
 0x4d8   : > { %4337 = vmatprep.mubr.msk.f32.mxu0 %vm702_vm1, %v1644_v30 }
 0x4d9   : > { %4338 = vmatmul.mubr.msk.f32.gmra.mxu0 %vm702_vm1, %v1645_v34 }
 0x4da   : > { %4352 = vmatprep.mubr.msk.f32.mxu0 %vm4779_vm5, %v4774_v27 }
 0x51c   : > { %v4330_v13 = vpop.f32.mrf.mxu0 }
 0x51d   : > { %v1780_v39 = vmul.f32 0.35355338, %v4330_v13 }
 0x51e   : > { %v1740_v57 = vpop.f32.mrf.mxu0 }
 0x51f   : > { %v1779_v20 = vmul.f32 0.35355338, %v1740_v57 }
 0x521   : > { %v1790_v24 = vmax.f32 %v1789_v23, %v1779_v20 }
 0x523   : > { %v1791_v12 = vsub.f32 %v1789_v23, %v1790_v24  ;;  %v1794_v36 = vsub.f32 %v1779_v20, %v1790_v24  ;;  %1962 = vst.msk [vmem:[%s1788_s12] sm:$0xff] %vm850_vm3, %v1790_v24  ;;  %s2662_s12 = scalar_lea.vmem [#allocation5], %s5186_s3 }
 0x525   : > { %v1792_v37 = vmul.f32 1.442695, %v1791_v12  ;;  %v1795_v38 = vmul.f32 1.442695, %v1794_v36 }
 0x527   : > { %4574 = vpow2.f32 %v1792_v37 }
 0x528   : > { %4576 = vpow2.f32 %v1795_v38  ;;  %v4333_v42 = vpop.f32.mrf.mxu0 }
 0x529   : > { %v1782_v59 = vmul.f32 0.35355338, %v4333_v42 }
 0x52a   : > { %v1966_v40 = vld [vmem:[%s1965_s13] sm:$0xff]  ;;  %v1750_v51 = vpop.f32.mrf.mxu0 }
 0x52b   : > { %v1967_v5 = vmax.f32 %v1966_v40, %v1780_v39  ;;  %v1781_v54 = vmul.f32 0.35355338, %v1750_v51 }
 0x52c   : > { %v4336_v2 = vpop.f32.mrf.mxu0 }
 0x52d   : > { %v1968_v43 = vsub.f32 %v1966_v40, %v1967_v5  ;;  %v1971_v48 = vsub.f32 %v1780_v39, %v1967_v5  ;;  %2134 = vst.msk [vmem:[%s1965_s13] sm:$0xff] %vm850_vm3, %v1967_v5  ;;  %v1784_v11 = vmul.f32 0.35355338, %v4336_v2  ;;  %s2825_s13 = scalar_lea.vmem [#allocation4], %s5188_s29 }
 0x52e   : > { %v1760_v63 = vpop.f32.mrf.mxu0 }
 0x52f   : > { %v1969_v50 = vmul.f32 1.442695, %v1968_v43  ;;  %v1972_v10 = vmul.f32 1.442695, %v1971_v48  ;;  %v1783_v16 = vmul.f32 0.35355338, %v1760_v63 }
 0x531   : > { %4578 = vpow2.f32 %v1969_v50 }
 0x532   : > { %4580 = vpow2.f32 %v1972_v10 }
 0x534   : > { %v4575_v60 = vpop.eup %4574  ;;  %v2138_v21 = vld [vmem:[%s2137_s27] sm:$0xff] }
 0x535   : > { %v1799_v45 = vmul.f32 %v4575_v60, %v1798_v52  ;;  %v2139_v14 = vmax.f32 %v2138_v21, %v1781_v54  ;;  %4343 = vmatmul.mubr.msk.f32.vlgmr.msra.gmra.mxu1 %vm850_vm3, %v4575_v60  ;;  %v4577_v56 = vpop.eup %4576 }
 0x536   : > { %4346 = vmatpush3.msk.msra.mxu1 %vm1806_vm4, %v5466_v35  ;;  %4347 = vmatprep.mubr.msk.f32.mxu1 %vm4779_vm5, %v4774_v27 }
 0x537   : > { %v1800_v15 = vadd.f32 %v4577_v56, %v1799_v45  ;;  %v2140_v55 = vsub.f32 %v2138_v21, %v2139_v14  ;;  %v2143_v46 = vsub.f32 %v1781_v54, %v2139_v14  ;;  %2306 = vst.msk [vmem:[%s2137_s27] sm:$0xff] %vm850_vm3, %v2139_v14  ;;  %4355 = vmatprep.subr.mxu1 %v4774_v27  ;;  %s2834_s27 = scalar_lea.vmem [#allocation5], %s5188_s29 }
 0x539   : > { %1802 = vst.msk [vmem:[%s1797_s16] sm:$0xff] %vm850_vm3, %v1800_v15  ;;  %v2141_v58 = vmul.f32 1.442695, %v2140_v55  ;;  %v2144_v47 = vmul.f32 1.442695, %v2143_v46  ;;  %4348 = vmatmul.mubr.msk.f32.vlgmr.msra.gmra.mxu1 %vm850_vm3, %v4577_v56  ;;  %s2997_s16 = scalar_lea.vmem [#allocation4], %s5201_s24 }
 0x53a   : > { %4356 = vmatpush3.msk.msra.mxu1 %vm1806_vm4, %v5466_v35  ;;  %4357 = vmatprep.mubr.msk.f32.mxu1 %vm4779_vm5, %v4774_v27 }
 0x53b   : > { %4582 = vpow2.f32 %v2141_v58  ;;  %4365 = vmatprep.subr.mxu1 %v4774_v27 }
 0x53c   : > { %4584 = vpow2.f32 %v2144_v47 }
 0x53e   : > { %v4579_v26 = vpop.eup %4578  ;;  %v2310_v32 = vld [vmem:[%s2309_s28] sm:$0xff] }
 0x53f   : > { %v4581_v62 = vpop.eup %4580  ;;  %v2311_v0 = vmax.f32 %v2310_v32, %v1782_v59  ;;  %4353 = vmatmul.mubr.msk.f32.vlgmr.msra.gmra.mxu0 %vm850_vm3, %v4579_v26 }
 0x540   : > { %v1975_v1 = vld [vmem:[%s1974_s21] sm:$0xff]  ;;  %4358 = vmatmul.mubr.msk.f32.vlgmr.msra.gmra.mxu1 %vm850_vm3, %v4581_v62  ;;  %4361 = vmatpush3.msk.msra.mxu0 %vm1806_vm4, %v5466_v35 }
 0x541   : > { %v1976_v61 = vmul.f32 %v4579_v26, %v1975_v1  ;;  %v2312_v3 = vsub.f32 %v2310_v32, %v2311_v0  ;;  %v2315_v7 = vsub.f32 %v1782_v59, %v2311_v0  ;;  %2478 = vst.msk [vmem:[%s2309_s28] sm:$0xff] %vm850_vm3, %v2311_v0  ;;  %4362 = vmatprep.mubr.msk.f32.mxu0 %vm4779_vm5, %v4774_v27  ;;  %s3006_s28 = scalar_lea.vmem [#allocation5], %s5201_s24 }
 0x542   : > { %4366 = vmatpush3.msk.msra.mxu1 %vm1806_vm4, %v5466_v35  ;;  %4367 = vmatprep.mubr.msk.f32.mxu1 %vm4779_vm5, %v4774_v27 }
 0x543   : > { %4370 = vmatprep.subr.mxu0 %v4774_v27  ;;  %v1977_v17 = vadd.f32 %v4581_v62, %v1976_v61  ;;  %v2313_v18 = vmul.f32 1.442695, %v2312_v3  ;;  %v2316_v33 = vmul.f32 1.442695, %v2315_v7  ;;  %4375 = vmatprep.subr.mxu1 %v4774_v27 }
 0x545   : > { %1978 = vst.msk [vmem:[%s1974_s21] sm:$0xff] %vm850_vm3, %v1977_v17  ;;  %4586 = vpow2.f32 %v2313_v18  ;;  %s1953_s21 = scalar_lea.vmem [#allocation6], %s5157_s1  ;;  %s2297_s1 = scalar_lea.vmem [#allocation6], %s5162_s19 }
 0x546   : > { %4588 = vpow2.f32 %v2316_v33  ;;  %s2641_s19 = scalar_lea.vmem [#allocation6], %s5173_s2  ;;  %s3157_s2 = scalar_lea.vmem [#allocation6], %s5201_s24 }
 0x547   : > { %s5776_s24 = sadd.s32 4294967295, %s4766_s18  }
 0x548   : > { %v4583_v31 = vpop.eup %4582  ;;  %v2482_v19 = vld [vmem:[%s2481_s15] sm:$0xff]  ;;  %p5692_p3 = scmp.eq.s32.totalorder %s5776_s24, 1 }
 0x549   : > { %v4585_v28 = vpop.eup %4584  ;;  %v2483_v29 = vmax.f32 %v2482_v19, %v1783_v16  ;;  %4363 = vmatmul.mubr.msk.f32.vlgmr.msra.gmra.mxu0 %vm850_vm3, %v4583_v31 }
 0x54a   : > { %4368 = vmatmul.mubr.msk.f32.vlgmr.msra.gmra.mxu1 %vm850_vm3, %v4585_v28  ;;  %4371 = vmatpush3.msk.msra.mxu0 %vm1806_vm4, %v5466_v35 }
 0x54b   : > { %v2484_v22 = vsub.f32 %v2482_v19, %v2483_v29  ;;  %v2487_v41 = vsub.f32 %v1783_v16, %v2483_v29  ;;  %2650 = vst.msk [vmem:[%s2481_s15] sm:$0xff] %vm850_vm3, %v2483_v29  ;;  %4372 = vmatprep.mubr.msk.f32.mxu0 %vm4779_vm5, %v4774_v27  ;;  %4376 = vmatpush3.msk.msra.mxu1 %vm1806_vm4, %v5466_v35  ;;  %s2125_s15 = scalar_lea.vmem [#allocation6], %s5159_s6  ;;  %s2469_s6 = scalar_lea.vmem [#allocation6], %s5165_s20 }
 0x54c   : > { %v2147_v4 = vld [vmem:[%s2146_s25] sm:$0xff]  ;;  %4377 = vmatprep.mubr.msk.f32.mxu1 %vm4779_vm5, %v4774_v27  ;;  %4380 = vmatprep.subr.mxu0 %v4774_v27  ;;  %s2985_s20 = scalar_lea.vmem [#allocation6], %s5188_s29  ;;  %s5775_s29 = scalar_lea.vmem %s5731_s11, %s5784_s0 }
 0x54d   : > { %v2148_v49 = vmul.f32 %v4583_v31, %v2147_v4  ;;  %v2485_v6 = vmul.f32 1.442695, %v2484_v22  ;;  %v2488_v53 = vmul.f32 1.442695, %v2487_v41  ;;  %4385 = vmatprep.subr.mxu1 %v4774_v27  ;;  %s4780_s0 = smov [#allocation15]  }
 0x54f   : > { %v2149_v44 = vadd.f32 %v4585_v28, %v2148_v49  ;;  %4590 = vpow2.f32 %v2485_v6  ;;  %v1954_v6 = vld [vmem:[%s1953_s21] sm:$0xff] }
 0x550   : > { %4592 = vpow2.f32 %v2488_v53 }
 0x551   : > { %2150 = vst.msk [vmem:[%s2146_s25] sm:$0xff] %vm850_vm3, %v2149_v44  ;;  %v1957_v44 = vpop.permute.xlu0 %1956 }
 0x552   : > { %v4587_v8 = vpop.eup %4586  ;;  %v2654_v9 = vld [vmem:[%s2653_s8] sm:$0xff] }
 0x553   : > { %v4589_v25 = vpop.eup %4588  ;;  %v2655_v30 = vmax.f32 %v2654_v9, %v1784_v11  ;;  %4373 = vmatmul.mubr.msk.f32.vlgmr.msra.gmra.mxu0 %vm850_vm3, %v4587_v8 }
 0x554   : > { %4378 = vmatmul.mubr.msk.f32.vlgmr.msra.gmra.mxu1 %vm850_vm3, %v4589_v25  ;;  %4381 = vmatpush3.msk.msra.mxu0 %vm1806_vm4, %v5466_v35 }
 0x555   : > { %v2656_v34 = vsub.f32 %v2654_v9, %v2655_v30  ;;  %v2659_v13 = vsub.f32 %v1784_v11, %v2655_v30  ;;  %2822 = vst.msk [vmem:[%s2653_s8] sm:$0xff] %vm850_vm3, %v2655_v30  ;;  %4382 = vmatprep.mubr.msk.f32.mxu0 %vm4779_vm5, %v4774_v27  ;;  %4386 = vmatpush3.msk.msra.mxu1 %vm1806_vm4, %v5466_v35 }
 0x556   : > { %4387 = vmatprep.mubr.msk.f32.mxu1 %vm4779_vm5, %v4774_v27  ;;  %4390 = vmatprep.subr.mxu0 %v4774_v27 }
 0x557   : > { %v2657_v57 = vmul.f32 1.442695, %v2656_v34  ;;  %v2660_v23 = vmul.f32 1.442695, %v2659_v13  ;;  %4395 = vmatprep.subr.mxu1 %v4774_v27 }
 0x558   : > { %v2319_v20 = vld [vmem:[%s2318_s10] sm:$0xff] }
 0x559   : > { %v2320_v24 = vmul.f32 %v4587_v8, %v2319_v20  ;;  %4594 = vpow2.f32 %v2657_v57  ;;  %v3294_v20 = vld [vmem:[%s4977_s22 + $0x18] sm:$0xff] }
 0x55a   : > { %4596 = vpow2.f32 %v2660_v23 }
 0x55b   : > { %v2321_v12 = vadd.f32 %v4589_v25, %v2320_v24  ;;  %v2129_v24 = vpop.permute.xlu1 %2128 }
 0x55c   : > { %v4591_v36 = vpop.eup %4590  ;;  %v2826_v54 = vld [vmem:[%s2825_s13] sm:$0xff] }
 0x55d   : > { %v4593_v37 = vpop.eup %4592  ;;  %2322 = vst.msk [vmem:[%s2318_s10] sm:$0xff] %vm850_vm3, %v2321_v12  ;;  %4383 = vmatmul.mubr.msk.f32.vlgmr.msra.gmra.mxu0 %vm850_vm3, %v4591_v36 }
 0x55e   : > { %4388 = vmatmul.mubr.msk.f32.vlgmr.msra.gmra.mxu1 %vm850_vm3, %v4593_v37  ;;  %4391 = vmatpush3.msk.msra.mxu0 %vm1806_vm4, %v5466_v35 }
 0x55f   : > { %4392 = vmatprep.mubr.msk.f32.mxu0 %vm4779_vm5, %v4774_v27  ;;  %4396 = vmatpush3.msk.msra.mxu1 %vm1806_vm4, %v5466_v35 }
 0x560   : > { %4397 = vmatprep.mubr.msk.f32.mxu1 %vm4779_vm5, %v4774_v27  ;;  %4400 = vmatprep.subr.mxu0 %v4774_v27 }
 0x561   : > { %4405 = vmatprep.subr.mxu1 %v4774_v27 }
 0x564   : > { %v2491_v38 = vld [vmem:[%s2490_s9] sm:$0xff] }
 0x565   : > { %v2492_v39 = vmul.f32 %v4591_v36, %v2491_v38 }
 0x566   : > { %v4595_v40 = vpop.eup %4594 }
 0x567   : > { %v4597_v5 = vpop.eup %4596  ;;  %v2493_v42 = vadd.f32 %v4593_v37, %v2492_v39  ;;  %4393 = vmatmul.mubr.msk.f32.vlgmr.msra.gmra.mxu0 %vm850_vm3, %v4595_v40 }
 0x568   : > { %4398 = vmatmul.mubr.msk.f32.vlgmr.msra.gmra.mxu1 %vm850_vm3, %v4597_v5  ;;  %4401 = vmatpush3.msk.msra.mxu0 %vm1806_vm4, %v5466_v35 }
 0x569   : > { %2494 = vst.msk [vmem:[%s2490_s9] sm:$0xff] %vm850_vm3, %v2493_v42  ;;  %4402 = vmatprep.mubr.msk.f32.mxu0 %vm4779_vm5, %v4774_v27  ;;  %4406 = vmatpush3.msk.msra.mxu1 %vm1806_vm4, %v5466_v35 }
 0x56a   : > { %4407 = vmatprep.mubr.msk.f32.mxu1 %vm4779_vm5, %v4774_v27  ;;  %4410 = vmatprep.subr.mxu0 %v4774_v27 }
 0x56b   : > { %4415 = vmatprep.subr.mxu1 %v4774_v27 }
 0x570   : > { %v2663_v43 = vld [vmem:[%s2662_s12] sm:$0xff] }
 0x571   : > { %v2664_v48 = vmul.f32 %v4595_v40, %v2663_v43  ;;  %v2301_v43 = vpop.permute.xlu0 %2300 }
 0x573   : > { %v2665_v50 = vadd.f32 %v4597_v5, %v2664_v48 }
 0x575   : > { %2666 = vst.msk [vmem:[%s2662_s12] sm:$0xff] %vm850_vm3, %v2665_v50 }
 0x57c   : > { %v2835_v62 = vld [vmem:[%s2834_s27] sm:$0xff] }
 0x599   : > { %v4339_v10 = vpop.f32.mrf.mxu0 }
 0x59a   : > { %v1786_v15 = vmul.f32 0.35355338, %v4339_v10 }
 0x59b   : > { %v1770_v51 = vpop.f32.mrf.mxu0 }
 0x59c   : > { %v1785_v52 = vmul.f32 0.35355338, %v1770_v51 }
 0x59e   : > { %v2827_v60 = vmax.f32 %v2826_v54, %v1785_v52 }
 0x5a0   : > { %v2828_v21 = vsub.f32 %v2826_v54, %v2827_v60  ;;  %v2831_v45 = vsub.f32 %v1785_v52, %v2827_v60  ;;  %2994 = vst.msk [vmem:[%s2825_s13] sm:$0xff] %vm850_vm3, %v2827_v60 }
 0x5a2   : > { %v2829_v14 = vmul.f32 1.442695, %v2828_v21  ;;  %v2832_v56 = vmul.f32 1.442695, %v2831_v45  ;;  %v2473_v45 = vpop.permute.xlu1 %2472 }
 0x5a4   : > { %4598 = vpow2.f32 %v2829_v14 }
 0x5a5   : > { %4600 = vpow2.f32 %v2832_v56 }
 0x5a7   : > { %v2998_v55 = vld [vmem:[%s2997_s16] sm:$0xff] }
 0x5a8   : > { %v2999_v46 = vmax.f32 %v2998_v55, %v1786_v15 }
 0x5aa   : > { %v3000_v58 = vsub.f32 %v2998_v55, %v2999_v46  ;;  %v3003_v47 = vsub.f32 %v1786_v15, %v2999_v46  ;;  %3166 = vst.msk [vmem:[%s2997_s16] sm:$0xff] %vm850_vm3, %v2999_v46  ;;  %v3293_v15 = vld [vmem:[%s4977_s22 + $0x10] sm:$0xff] }
 0x5ac   : > { %v3001_v59 = vmul.f32 1.442695, %v3000_v58  ;;  %v3004_v26 = vmul.f32 1.442695, %v3003_v47 }
 0x5ae   : > { %4602 = vpow2.f32 %v3001_v59  ;;  %v3292_v59 = vld [vmem:[%s4977_s22 + $0x8] sm:$0xff] }
 0x5af   : > { %4604 = vpow2.f32 %v3004_v26 }
 0x5b1   : > { %v4599_v32 = vpop.eup %4598 }
 0x5b2   : > { %v4601_v0 = vpop.eup %4600  ;;  %v2836_v1 = vmul.f32 %v4599_v32, %v2835_v62  ;;  %4403 = vmatmul.mubr.msk.f32.vlgmr.msra.gmra.mxu0 %vm850_vm3, %v4599_v32  ;;  %v3291_v62 = vld [vmem:[%s4977_s22] sm:$0xff]  ;;  %s2813_s22 = scalar_lea.vmem [#allocation6], %s5186_s3 }
 0x5b3   : > { %4408 = vmatmul.mubr.msk.f32.vlgmr.msra.gmra.mxu1 %vm850_vm3, %v4601_v0  ;;  %4411 = vmatpush3.msk.msra.mxu0 %vm1806_vm4, %v5466_v35 }
 0x5b4   : > { %v2837_v2 = vadd.f32 %v4601_v0, %v2836_v1  ;;  %4412 = vmatprep.mubr.msk.f32.mxu0 %vm4779_vm5, %v4774_v27  ;;  %4416 = vmatpush3.msk.msra.mxu1 %vm1806_vm4, %v5466_v35 }
 0x5b5   : > { %4417 = vmatprep.mubr.msk.f32.mxu1 %vm4779_vm5, %v4774_v27  ;;  %4420 = vmatprep.subr.msk.mxu0 %vm1806_vm4, %v5466_v35 }
 0x5b6   : > { %2838 = vst.msk [vmem:[%s2834_s27] sm:$0xff] %vm850_vm3, %v2837_v2  ;;  %4428 = vmatprep.subr.mxu1 %v3294_v20  ;;  %v2645_v2 = vpop.permute.xlu0 %2644 }
 0x5bb   : > { %v4603_v61 = vpop.eup %4602 }
 0x5bc   : > { %v4605_v3 = vpop.eup %4604  ;;  %4413 = vmatmul.mubr.msk.f32.vlgmr.msra.gmra.mxu0 %vm850_vm3, %v4603_v61 }
 0x5bd   : > { %v3007_v7 = vld [vmem:[%s3006_s28] sm:$0xff]  ;;  %4418 = vmatmul.mubr.msk.f32.vlgmr.msra.gmra.mxu1 %vm850_vm3, %v4605_v3  ;;  %4421 = vmatpush3.msk.msra.mxu0 %vm1806_vm4, %v5466_v35 }
 0x5be   : > { %v3008_v17 = vmul.f32 %v4603_v61, %v3007_v7  ;;  %4429 = vmatpush3.msra.mxu1 %v3294_v20 }
 0x5bf   : > { %4430 = vmatprep.subr.mxu1 %v3293_v15 }
 0x5c0   : > { %v3009_v18 = vadd.f32 %v4605_v3, %v3008_v17  ;;  %4431 = vmatpush3.msra.mxu1 %v3293_v15 }
 0x5c1   : > { %4432 = vmatprep.subr.mxu1 %v3292_v59 }
 0x5c2   : > { %3010 = vst.msk [vmem:[%s3006_s28] sm:$0xff] %vm850_vm3, %v3009_v18  ;;  %4433 = vmatpush3.msra.mxu1 %v3292_v59 }
 0x5c3   : > { %4434 = vmatprep.subr.mxu1 %v3291_v62 }
 0x5c4   : > { %4435 = vmatpush3.msra.mxu1 %v3291_v62 }
 0x5c9   : > { %v3171_v27 = vld [vmem:[#allocation5 + $0x8] sm:$0xff]  ;;  %v3170_v33 = vld [vmem:[#allocation5] sm:$0xff]  ;;  %v3172_v63 = vld [vmem:[#allocation5 + $0x10] sm:$0xff] }
 0x5ca   : > { %vm3175_vm6 = vcmp.gt.f32.partialorder %v3171_v27, 0.0  ;;  %vm3174_vm7 = vcmp.gt.f32.partialorder %v3170_v33, 0.0  ;;  %vm3176_vm8 = vcmp.gt.f32.partialorder %v3172_v63, 0.0  ;;  %v3173_v16 = vld [vmem:[#allocation5 + $0x18] sm:$0xff] }
 0x5cb   : > { %v3179_v31 = vsel %vm3175_vm6, %v3171_v27, 1.0  ;;  %v3178_v19 = vsel %vm3174_vm7, %v3170_v33, 1.0  ;;  %v3180_v28 = vsel %vm3176_vm8, %v3172_v63, 1.0  ;;  %vm3177_vm9 = vcmp.gt.f32.partialorder %v3173_v16, 0.0  ;;  %v2817_v33 = vpop.permute.xlu1 %2816 }
 0x5cc   : > { %4606 = vrcp.f32 %v3179_v31  ;;  %v3181_v35 = vsel %vm3177_vm9, %v3173_v16, 1.0 }
 0x5cd   : > { %4608 = vrcp.f32 %v3178_v19 }
 0x5ce   : > { %4610 = vrcp.f32 %v3180_v28 }
 0x5cf   : > { %4612 = vrcp.f32 %v3181_v35 }
 0x5d9   : > { %v4607_v29 = vpop.eup %4606 }
 0x5da   : > { %v4609_v22 = vpop.eup %4608 }
 0x5db   : > { %4422 = vmatprep.mubr.msk.f32.mxu0 %vm850_vm3, %v4609_v22  ;;  %v4611_v41 = vpop.eup %4610 }
 0x5dc   : > { %4423 = vmatmul.mubr.msk.f32.vlgmr.msra.gmra.mxu0 %vm850_vm3, %v4607_v29  ;;  %v4613_v4 = vpop.eup %4612  ;;  %v2989_v29 = vpop.permute.xlu0 %2988 }
 0x5dd   : > { %4425 = vmatprep.mubr.msk.f32.mxu0 %vm850_vm3, %v4611_v41 }
 0x5e0   : > { %4426 = vmatmul.mubr.msk.f32.gmra.mxu0 %vm850_vm3, %v4613_v4 }
 0x5f5   : > { %v1876_v49 = vpop.f32.mrf.mxu1 }
 0x5f6   : > { %v1955_v8 = vmul.f32 %v1954_v6, %v1876_v49 }
 0x5f7   : > { %v4344_v53 = vpop.f32.mrf.mxu1 }
 0x5f9   : > { %v1949_v11 = vpop.f32.mrf.mxu1 }
 0x5fa   : > { %v1959_v9 = vmul.f32 %v1957_v44, %v1949_v11 }
 0x5fb   : > { %v4349_v25 = vpop.f32.mrf.mxu1 }
 0x5fc   : > { %v1960_v30 = vadd.f32 %v1959_v9, %v1955_v8  ;;  %v3161_v9 = vpop.permute.xlu1 %3160 }
 0x5fe   : > { %1961 = vst.msk [vmem:[%s1953_s21] sm:$0xff] %vm702_vm1, %v1960_v30 }
 0x5ff   : > { %v2048_v34 = vpop.f32.mrf.mxu0 }
 0x600   : > { %v2121_v13 = vpop.f32.mrf.mxu1 }
 0x601   : > { %v4354_v57 = vpop.f32.mrf.mxu0  ;;  %v2131_v37 = vmul.f32 %v2129_v24, %v2121_v13 }
 0x602   : > { %v4359_v23 = vpop.f32.mrf.mxu1 }
 0x605   : > { %v2126_v12 = vld [vmem:[%s2125_s15] sm:$0xff] }
 0x606   : > { %v2127_v36 = vmul.f32 %v2126_v12, %v2048_v34 }
 0x608   : > { %v2132_v38 = vadd.f32 %v2131_v37, %v2127_v36 }
 0x609   : > { %v2220_v39 = vpop.f32.mrf.mxu0 }
 0x60a   : > { %2133 = vst.msk [vmem:[%s2125_s15] sm:$0xff] %vm702_vm1, %v2132_v38  ;;  %v2293_v40 = vpop.f32.mrf.mxu1 }
 0x60b   : > { %v4364_v5 = vpop.f32.mrf.mxu0  ;;  %v2303_v10 = vmul.f32 %v2301_v43, %v2293_v40 }
 0x60c   : > { %v4369_v42 = vpop.f32.mrf.mxu1 }
 0x611   : > { %v2298_v48 = vld [vmem:[%s2297_s1] sm:$0xff] }
 0x612   : > { %v2299_v50 = vmul.f32 %v2298_v48, %v2220_v39  ;;  %v3393_v48 = vld [vmem:[#allocation2 + $0x8] sm:$0xff] }
 0x613   : > { %v2392_v51 = vpop.f32.mrf.mxu0 }
 0x614   : > { %v2304_v52 = vadd.f32 %v2303_v10, %v2299_v50  ;;  %v2465_v54 = vpop.f32.mrf.mxu1  ;;  %v3392_v10 = vld [vmem:[#allocation2] sm:$0xff] }
 0x615   : > { %v4374_v60 = vpop.f32.mrf.mxu0  ;;  %v2475_v46 = vmul.f32 %v2473_v45, %v2465_v54  ;;  %v3395_v45 = vld [vmem:[#allocation2 + $0x18] sm:$0xff] }
 0x616   : > { %2305 = vst.msk [vmem:[%s2297_s1] sm:$0xff] %vm702_vm1, %v2304_v52  ;;  %v4379_v21 = vpop.f32.mrf.mxu1 }
 0x61d   : > { %v2470_v14 = vld [vmem:[%s2469_s6] sm:$0xff]  ;;  %v2564_v56 = vpop.f32.mrf.mxu0 }
 0x61e   : > { %v2471_v55 = vmul.f32 %v2470_v14, %v2392_v51  ;;  %v2637_v58 = vpop.f32.mrf.mxu1  ;;  %v3394_v14 = vld [vmem:[#allocation2 + $0x10] sm:$0xff] }
 0x61f   : > { %v4384_v47 = vpop.f32.mrf.mxu0  ;;  %v2647_v17 = vmul.f32 %v2645_v2, %v2637_v58  ;;  %v3444_v2 = vld [vmem:[%s4982_s26 + $0x8] sm:$0xff] }
 0x620   : > { %v2476_v26 = vadd.f32 %v2475_v46, %v2471_v55  ;;  %v4389_v32 = vpop.f32.mrf.mxu1 }
 0x622   : > { %2477 = vst.msk [vmem:[%s2469_s6] sm:$0xff] %vm702_vm1, %v2476_v26 }
 0x627   : > { %v2736_v0 = vpop.f32.mrf.mxu0 }
 0x628   : > { %v2809_v1 = vpop.f32.mrf.mxu1 }
 0x629   : > { %v2642_v61 = vld [vmem:[%s2641_s19] sm:$0xff]  ;;  %v4394_v3 = vpop.f32.mrf.mxu0  ;;  %v2819_v31 = vmul.f32 %v2817_v33, %v2809_v1  ;;  %v3445_v1 = vld [vmem:[%s4982_s26 + $0x10] sm:$0xff] }
 0x62a   : > { %v2643_v7 = vmul.f32 %v2642_v61, %v2564_v56  ;;  %v4399_v18 = vpop.f32.mrf.mxu1  ;;  %v3443_v61 = vld [vmem:[%s4982_s26] sm:$0xff] }
 0x62c   : > { %v2648_v27 = vadd.f32 %v2647_v17, %v2643_v7 }
 0x62e   : > { %2649 = vst.msk [vmem:[%s2641_s19] sm:$0xff] %vm702_vm1, %v2648_v27 }
 0x635   : > { %v2814_v63 = vld [vmem:[%s2813_s22] sm:$0xff] }
 0x636   : > { %v2815_v16 = vmul.f32 %v2814_v63, %v2736_v0  ;;  %v3446_v0 = vld [vmem:[%s4982_s26 + $0x18] sm:$0xff] }
 0x637   : > { %4442 = vmatprep.subr.mxu0 %v3446_v0 }
 0x638   : > { %v2820_v19 = vadd.f32 %v2819_v31, %v2815_v16  ;;  %4443 = vmatpush3.msra.mxu0 %v3446_v0 }
 0x639   : > { %4444 = vmatprep.subr.mxu0 %v3445_v1 }
 0x63a   : > { %2821 = vst.msk [vmem:[%s2813_s22] sm:$0xff] %vm702_vm1, %v2820_v19  ;;  %4445 = vmatpush3.msra.mxu0 %v3445_v1 }
 0x63b   : > { %4446 = vmatprep.subr.mxu0 %v3444_v2 }
 0x63c   : > { %4447 = vmatpush3.msra.mxu0 %v3444_v2 }
 0x63d   : > { %4448 = vmatprep.subr.mxu0 %v3443_v61 }
 0x63e   : > { %4449 = vmatpush3.msra.mxu0 %v3443_v61 }
 0x641   : > { %v2986_v35 = vld [vmem:[%s2985_s20] sm:$0xff] }
 0x672   : > { %v2908_v28 = vpop.f32.mrf.mxu0 }
 0x673   : > { %v2987_v22 = vmul.f32 %v2986_v35, %v2908_v28  ;;  %v2981_v41 = vpop.f32.mrf.mxu1 }
 0x674   : > { %v2991_v4 = vmul.f32 %v2989_v29, %v2981_v41  ;;  %v4404_v49 = vpop.f32.mrf.mxu0 }
 0x675   : > { %v4409_v6 = vpop.f32.mrf.mxu1 }
 0x676   : > { %v2992_v53 = vadd.f32 %v2991_v4, %v2987_v22  ;;  %v4102_v4 = vld [vmem:[%s5775_s29] ss:$0 sm:$0xff] }
 0x678   : > { %2993 = vst.msk [vmem:[%s2985_s20] sm:$0xff] %vm702_vm1, %v2992_v53 }
 0x67c   : > { %v3080_v44 = vpop.f32.mrf.mxu0 }
 0x67d   : > { %v3153_v11 = vpop.f32.mrf.mxu1 }
 0x67e   : > { %v4414_v8 = vpop.f32.mrf.mxu0  ;;  %v3163_v13 = vmul.f32 %v3161_v9, %v3153_v11 }
 0x67f   : > { %v3158_v25 = vld [vmem:[%s3157_s2] sm:$0xff]  ;;  %v4419_v30 = vpop.f32.mrf.mxu1 }
 0x680   : > { %v3159_v34 = vmul.f32 %v3158_v25, %v3080_v44 }
 0x682   : > { %v3164_v57 = vadd.f32 %v3163_v13, %v3159_v34  ;;  %v3599_v34 = vld [vmem:[%s4988_s23 + $0x38] sm:$0xff]  ;;  %v3598_v13 = vld [vmem:[%s4988_s23 + $0x30] sm:$0xff] }
 0x683   : > { %4456 = vmatprep.subr.mxu1 %v3599_v34 }
 0x684   : > { %3165 = vst.msk [vmem:[%s3157_s2] sm:$0xff] %vm702_vm1, %v3164_v57  ;;  %v3597_v57 = vld [vmem:[%s4988_s23 + $0x28] sm:$0xff] }
 0x68b   : > { %v3283_v24 = vld [vmem:[#allocation6] sm:$0xff]  ;;  %v3284_v12 = vld [vmem:[#allocation6 + $0x8] sm:$0xff]  ;;  %v3285_v40 = vld [vmem:[#allocation6 + $0x10] sm:$0xff] }
 0x68c   : > { %v3286_v5 = vld [vmem:[#allocation6 + $0x18] sm:$0xff] }
 0x69c   : > { %v4424_v23 = vpop.f32.mrf.mxu0 }
 0x69d   : > { %v3288_v37 = vmul.f32 %v4424_v23, %v3284_v12  ;;  %v3596_v23 = vld [vmem:[%s4988_s23 + $0x20] sm:$0xff]  ;;  %v3593_v12 = vld [vmem:[%s4988_s23 + $0x8] sm:$0xff] }
 0x69e   : > { %v3264_v20 = vpop.f32.mrf.mxu0 }
 0x69f   : > { %v3287_v36 = vmul.f32 %v3283_v24, %v3264_v20  ;;  %v3595_v20 = vld [vmem:[%s4988_s23 + $0x18] sm:$0xff]  ;;  %v3594_v24 = vld [vmem:[%s4988_s23 + $0x10] sm:$0xff] }
 0x6a0   : > { %v4427_v38 = vpop.f32.mrf.mxu0 }
 0x6a1   : > { %4436 = vmatprep.mubr.msk.f32.mxu1 %vm702_vm1, %v3287_v36  ;;  %v3290_v43 = vmul.f32 %v4427_v38, %v3286_v5  ;;  %v3592_v36 = vld [vmem:[%s4988_s23] sm:$0xff]  ;;  %s3716_s23 = sshll.u32 %s4780_s0, 4  ;;  %s3717_s23 = int_to_ptr.vmem [resolvable:$true] %s3716_s23 }
 0x6a2   : > { %v3274_v39 = vpop.f32.mrf.mxu0  ;;  %4437 = vmatmul.mubr.msk.f32.vlgmr.msra.gmra.mxu1 %vm702_vm1, %v3288_v37  ;;  %s4706_s25 = scalar_lea.vmem %s3717_s23, 512  ;;  %p4713_p0 = scmp.lt.s32.totalorder %s3717_s23, %s3717_s23 }
 0x6a3   : > { %v3289_v42 = vmul.f32 %v3285_v40, %v3274_v39  ;;  %4457 = vmatpush3.msra.mxu1 %v3599_v34  ;;  %p4707_p4 = scmp.ne.s32.totalorder %s3717_s23, %s4706_s25  ;;  %p4714_p1 = scmp.lt.s32.totalorder %s4706_s25, %s4706_s25 }
 0x6a4   : > { %4458 = vmatprep.subr.mxu1 %v3598_v13 }
 0x6a5   : > { %4439 = vmatprep.mubr.msk.f32.mxu1 %vm702_vm1, %v3289_v42  ;;  %4459 = vmatpush3.msra.mxu1 %v3598_v13  ;;  %p4708_p12 = pnand %p4707_p4, %p5692_p3  ;;  %p4715_p2 = por %p4714_p1, %p4713_p0 }
 0x6a6   : > { %4440 = vmatmul.mubr.msk.f32.gmra.mxu1 %vm702_vm1, %v3290_v43  ;;  %4460 = vmatprep.subr.mxu1 %v3597_v57 }
 0x6a7   : > { %4461 = vmatpush3.msra.mxu1 %v3597_v57  ;;  %p4709_p13 = pneg %p4708_p12 }
 0x6a8   : > { %4462 = vmatprep.subr.mxu1 %v3596_v23 }
 0x6a9   : > { %4463 = vmatpush3.msra.mxu1 %v3596_v23  ;;  %p4716_p5 = pnand %p4715_p2, %p4709_p13 }
 0x6aa   : > { %4464 = vmatprep.subr.mxu1 %v3595_v20 }
 0x6ab   : > { %4465 = vmatpush3.msra.mxu1 %v3595_v20 }
 0x6ac   : > { %4466 = vmatprep.subr.mxu1 %v3594_v24 }
 0x6ad   : > { %4467 = vmatpush3.msra.mxu1 %v3594_v24 }
 0x6ae   : > { %4468 = vmatprep.subr.mxu1 %v3593_v12 }
 0x6af   : > { %4469 = vmatpush3.msra.mxu1 %v3593_v12 }
 0x6b0   : > { %4470 = vmatprep.subr.mxu1 %v3592_v36 }
 0x6b1   : > { %4471 = vmatpush3.msra.mxu1 %v3592_v36 }
 0x762   : > { %v4438_v50 = vpop.f32.mrf.mxu1 }
 0x763   : > { %v5634_v51 = vadd.f32 %v4438_v50, %v3393_v48 }
 0x764   : > { %v3373_v52 = vpop.f32.mrf.mxu1 }
 0x765   : > { %v5636_v54 = vadd.f32 %v3392_v10, %v3373_v52  ;;  %v3402_v60 = vmul.f32 %v5634_v51, %v5634_v51 }
 0x766   : > { %v4441_v21 = vpop.f32.mrf.mxu1 }
 0x767   : > { %v3408_v56 = vsel %vm702_vm1, %v3402_v60, 0.0  ;;  %v3401_v15 = vmul.f32 %v5636_v54, %v5636_v54  ;;  %v5643_v46 = vadd.f32 %v4441_v21, %v3395_v45 }
 0x768   : > { %3409 = vadd.xlane.f32.xlu1 %v3408_v56  ;;  %v3383_v55 = vpop.f32.mrf.mxu1 }
 0x769   : > { %v5645_v58 = vadd.f32 %v3394_v14, %v3383_v55  ;;  %v3405_v47 = vsel %vm702_vm1, %v3401_v15, 0.0  ;;  %v3404_v32 = vmul.f32 %v5643_v46, %v5643_v46 }
 0x76a   : > { %3406 = vadd.xlane.f32.xlu0 %v3405_v47 }
 0x76b   : > { %v3403_v59 = vmul.f32 %v5645_v58, %v5645_v58  ;;  %v3414_v62 = vsel %vm702_vm1, %v3404_v32, 0.0 }
 0x76d   : > { %v3411_v26 = vsel %vm702_vm1, %v3403_v59, 0.0 }
 0x76e   : > { %3412 = vadd.xlane.f32.xlu0 %v3411_v26 }
 0x772   : > { %3415 = vadd.xlane.f32.xlu0 %v3414_v62 }
 0x7f1   : > { %v3410_v3 = vpop.xlane.xlu1 %3409 }
 0x7f2   : > { %v3418_v7 = vmul.f32 0.03125, %v3410_v3 }
 0x7f3   : > { %v3407_v17 = vpop.xlane.xlu0 %3406 }
 0x7f4   : > { %v3422_v18 = vadd.f32 1e-06, %v3418_v7  ;;  %v3417_v27 = vmul.f32 0.03125, %v3407_v17 }
 0x7f6   : > { %4614 = vrsqrt.f32 %v3422_v18  ;;  %v3421_v33 = vadd.f32 1e-06, %v3417_v27 }
 0x7f7   : > { %v3413_v63 = vpop.xlane.xlu0 %3412 }
 0x7f8   : > { %4616 = vrsqrt.f32 %v3421_v33  ;;  %v3419_v16 = vmul.f32 0.03125, %v3413_v63 }
 0x7fa   : > { %v3423_v31 = vadd.f32 1e-06, %v3419_v16 }
 0x7fb   : > { %v3416_v19 = vpop.xlane.xlu0 %3415 }
 0x7fc   : > { %4618 = vrsqrt.f32 %v3423_v31  ;;  %v3420_v28 = vmul.f32 0.03125, %v3416_v19 }
 0x7fe   : > { %v3424_v35 = vadd.f32 1e-06, %v3420_v28 }
 0x800   : > { %4620 = vrsqrt.f32 %v3424_v35 }
 0x803   : > { %v4615_v29 = vpop.eup %4614 }
 0x804   : > { %v3430_v41 = vmul.f32 %v4615_v29, %v5634_v51 }
 0x805   : > { %v4617_v22 = vpop.eup %4616 }
 0x806   : > { %v3429_v49 = vmul.f32 %v4617_v22, %v5636_v54  ;;  %v3440_v44 = vmul.f32 %v4102_v4, %v3430_v41 }
 0x808   : > { %v3439_v6 = vmul.f32 %v4102_v4, %v3429_v49 }
 0x809   : > { %v4619_v53 = vpop.eup %4618 }
 0x80a   : > { %4450 = vmatprep.mubr.msk.f32.mxu0 %vm702_vm1, %v3439_v6  ;;  %v3431_v11 = vmul.f32 %v4619_v53, %v5645_v58 }
 0x80b   : > { %4451 = vmatmul.mubr.msk.f32.vlgmr.msra.gmra.mxu0 %vm702_vm1, %v3440_v44 }
 0x80c   : > { %v3441_v8 = vmul.f32 %v4102_v4, %v3431_v11 }
 0x80d   : > { %v4621_v9 = vpop.eup %4620 }
 0x80e   : > { %4453 = vmatprep.mubr.msk.f32.mxu0 %vm702_vm1, %v3441_v8  ;;  %v3432_v25 = vmul.f32 %v4621_v9, %v5643_v46 }
 0x810   : > { %v3442_v30 = vmul.f32 %v4102_v4, %v3432_v25 }
 0x812   : > { %4454 = vmatmul.mubr.msk.f32.gmra.mxu0 %vm702_vm1, %v3442_v30 }
 0x8cb   : > { %v4452_v37 = vpop.f32.mrf.mxu0 }
 0x8cc   : > { %3578 = vrot.lane.b32.xlu1 %v4452_v37, %s4777_s14  ;;  %v4108_v42 = vmul.f32 -1.442695, %v4452_v37 }
 0x8cd   : > { %v3525_v38 = vpop.f32.mrf.mxu0 }
 0x8ce   : > { %3576 = vrot.lane.b32.xlu0 %v3525_v38, %s4777_s14  ;;  %v4107_v5 = vmul.f32 -1.442695, %v3525_v38 }
 0x8d0   : > { %4622 = vpow2.f32 %v4107_v5 }
 0x8d1   : > { %4624 = vpow2.f32 %v4108_v42 }
 0x8d2   : > { %v4455_v39 = vpop.f32.mrf.mxu0 }
 0x8d3   : > { %v4110_v48 = vmul.f32 -1.442695, %v4455_v39 }
 0x8d4   : > { %v3535_v40 = vpop.f32.mrf.mxu0 }
 0x8d5   : > { %3580 = vrot.lane.b32.xlu1 %v3535_v40, %s4777_s14  ;;  %v4109_v43 = vmul.f32 -1.442695, %v3535_v40 }
 0x8d7   : > { %4626 = vpow2.f32 %v4109_v43 }
 0x8d8   : > { %4628 = vpow2.f32 %v4110_v48 }
 0x8d9   : > { %3582 = vrot.lane.b32.xlu1 %v4455_v39, %s4777_s14 }
 0x8dd   : > { %v4623_v50 = vpop.eup %4622 }
 0x8de   : > { %v4625_v10 = vpop.eup %4624  ;;  %v3556_v52 = vadd.f32 1.0, %v4623_v50 }
 0x8df   : > { %v3557_v60 = vadd.f32 1.0, %v4625_v10 }
 0x8e0   : > { %4630 = vrcp.f32 %v3556_v52 }
 0x8e1   : > { %4632 = vrcp.f32 %v3557_v60 }
 0x8e4   : > { %v4627_v21 = vpop.eup %4626 }
 0x8e5   : > { %v3558_v45 = vadd.f32 1.0, %v4627_v21  ;;  %v4629_v14 = vpop.eup %4628 }
 0x8e6   : > { %v3559_v56 = vadd.f32 1.0, %v4629_v14 }
 0x8e7   : > { %4634 = vrcp.f32 %v3558_v45 }
 0x8e8   : > { %4636 = vrcp.f32 %v3559_v56 }
 0x8ed   : > { %v4631_v15 = vpop.eup %4630 }
 0x8ee   : > { %v4633_v55 = vpop.eup %4632  ;;  %v3568_v59 = vmul.f32 %v4631_v15, %v3525_v38 }
 0x8ef   : > { %v3569_v26 = vmul.f32 %v4633_v55, %v4452_v37 }
 0x8f4   : > { %v4635_v1 = vpop.eup %4634 }
 0x8f5   : > { %v3570_v2 = vmul.f32 %v4635_v1, %v3535_v40  ;;  %v4637_v61 = vpop.eup %4636 }
 0x8f6   : > { %v3571_v17 = vmul.f32 %v4637_v61, %v4455_v39 }
 0x93e   : > { %v3579_v47 = vpop.permute.xlu1 %3578 }
 0x93f   : > { %v3589_v0 = vmul.f32 %v3579_v47, %v3569_v26 }
 0x940   : > { %v3577_v32 = vpop.permute.xlu0 %3576 }
 0x941   : > { %v3588_v62 = vmul.f32 %v3577_v32, %v3568_v59 }
 0x943   : > { %4472 = vmatprep.mubr.msk.f32.mxu1 %vm3600_vm10, %v3588_v62 }
 0x944   : > { %4473 = vmatmul.mubr.msk.f32.vlgmr.msra.gmra.mxu1 %vm3600_vm10, %v3589_v0 }
 0x947   : > { %v3581_v3 = vpop.permute.xlu1 %3580 }
 0x948   : > { %v3590_v7 = vmul.f32 %v3581_v3, %v3570_v2 }
 0x94a   : > { %4475 = vmatprep.mubr.msk.f32.mxu1 %vm3600_vm10, %v3590_v7 }
 0x94b   : > { %v3583_v18 = vpop.permute.xlu1 %3582 }
 0x94c   : > { %v3591_v27 = vmul.f32 %v3583_v18, %v3571_v17 }
 0x94e   : > { %4476 = vmatmul.mubr.msk.f32.gmra.mxu1 %vm3600_vm10, %v3591_v27 }
 0xa04   : > { %v4474_v33 = vpop.f32.mrf.mxu1 }
 0xa05   : > { %v3699_v63 = vadd.f32 %v4474_v33, %v5634_v51 }
 0xa06   : > { %v3679_v16 = vpop.f32.mrf.mxu1 }
 0xa07   : > { %3703 = vst.msk [vmem:[#allocation2 + $0x8] sm:$0xff] %vm702_vm1, %v3699_v63  ;;  %3707 = vst.msk [vmem:[#allocation15 + $0x8] sm:$0xff] %vm702_vm1, %v3699_v63  ;;  %v3698_v31 = vadd.f32 %v3679_v16, %v5636_v54 }
 0xa09   : > { %3702 = vst.msk [vmem:[#allocation2] sm:$0xff] %vm702_vm1, %v3698_v31  ;;  %3706 = vst.msk [vmem:[#allocation15] sm:$0xff] %vm702_vm1, %v3698_v31 }
 0xa0e   : > { %v4477_v19 = vpop.f32.mrf.mxu1 }
 0xa0f   : > { %v3701_v28 = vadd.f32 %v4477_v19, %v5643_v46 }
 0xa10   : > { %v3689_v35 = vpop.f32.mrf.mxu1 }
 0xa11   : > { %3705 = vst.msk [vmem:[#allocation2 + $0x18] sm:$0xff] %vm702_vm1, %v3701_v28  ;;  %3709 = vst.msk [vmem:[#allocation15 + $0x18] sm:$0xff] %vm702_vm1, %v3701_v28  ;;  %v3700_v51 = vadd.f32 %v3689_v35, %v5645_v58 }
 0xa13   : > { %3704 = vst.msk [vmem:[#allocation2 + $0x10] sm:$0xff] %vm702_vm1, %v3700_v51  ;;  %3708 = vst.msk [vmem:[#allocation15 + $0x10] sm:$0xff] %vm702_vm1, %v3700_v51 }
 0xa14   : > { %4719 = shalt.err (!%p4716_p5)
}
 0xa15   : > { %s4781_s8 = smov 128   ;;  %s4782_s10 = smov 8  }
 0xa16   : > { %4495 = dma.vmem_to_hbm [thread:$0]  (%p5692_p3), %s3717_s23, 512, %s5737_s17, [#allocation12], %s4781_s8, %s4781_s8, %s4782_s10  }
 0xa17   : > { %4753 = dma.done.wait (%p5692_p3), [#allocation12], 512  }
 0xa18   : > { %4755 = vsyncadd (%p5692_p3), [#allocation12], 4294966784 }
 0xa19 PF: > { %s36_s18 = sadd.s32 1, %s4766_s18   ;;  %s5778_s13 = sld [smem:[#allocation20_spill]] }
 0xa1a   : > { %p33_p8 = scmp.ge.s32.totalorder %s36_s18, 4   ;;  %s5779_s0 = smov %s4762_s30 }
 0xa1c   :  { %35 = sbr.rel (!%p33_p8) target bundleno = 28 (0x1c), region = 193 }
 0xa1f   : > { %s5780_s30 = smov %s5778_s13 }
 0xa21   :  { %3732 = vsyncpa [#allocation11], 1 }
 0xa22   :  { %3734 = vsyncpa [#allocation11 + $0x1], 1 }
 0xa23   :  { %3735 = vsyncpa [#allocation14], 1 }
 0xa24   :  { %3736 = vsyncpa [#allocation12], 1 }
 0xa25   :  { %3738 = vsyncpa [#allocation12 + $0x1], 1 }

</bundles_post_ra>
